<compile_context>
chip_gen: v7x
topology: tpu7x:2x2x1
jax: 0.10.0
libtpu: 0.0.40
codegen_flags: <defaults>
</compile_context>

<pallas_src>
import functools

import jax
import jax.numpy as jnp
from jax import lax
from jax.experimental import pallas as pl
from jax.experimental.pallas import tpu as pltpu

LANE = 128


def _round_up(x, m):
    return (x + m - 1) // m * m


def _vmem_limit_bytes():
    # ~48 MiB on v7x (64 MiB physical), ~100 MiB on v5e/v6e (128 MiB physical).
    try:
        cap = getattr(pltpu.get_tpu_info(), "vmem_capacity_bytes", None)
    except Exception:
        cap = None
    if cap is None:
        return 48 * 1024 * 1024
    return int(max(32 * 1024 * 1024,
                   min(cap - 16 * 1024 * 1024, 100 * 1024 * 1024)))


# --------------------------------------------------------------------------- #
# Pass 1: depthwise conv on one whole padded image (+ per-image BN stats)
# --------------------------------------------------------------------------- #
def _dw_conv_kernel(x_ref, w_ref, y_ref, st_ref, *, K, dilation, Ho, Wo):
    """x_ref: (1, Hp, Wp, C) padded image; w_ref: (K, K, C) resident taps;
    y_ref: (1, Ho, Wo, C) bf16 output; st_ref: (1, 2, C) [sum, sum-of-squares]."""
    x = x_ref[0].astype(jnp.float32)                 # (Hp, Wp, C)
    w = w_ref[...].astype(jnp.float32)               # (K, K, C)
    C = w.shape[-1]

    acc = jnp.zeros((Ho, Wo, C), jnp.float32)
    for kh in range(K):
        for kw in range(K):
            xs = x[kh * dilation: kh * dilation + Ho,
                   kw * dilation: kw * dilation + Wo, :]
            acc = acc + xs * w[kh, kw]               # (C,) tap broadcast over lanes

    y_ref[0] = acc.astype(y_ref.dtype)
    # per-image partial BN statistics, accumulated in f32
    s1 = jnp.sum(acc, axis=(0, 1))[None, :]
    s2 = jnp.sum(acc * acc, axis=(0, 1))[None, :]
    st_ref[0] = jnp.concatenate([s1, s2], axis=0)


# --------------------------------------------------------------------------- #
# Pass 2: BN(dw)+ReLU -> pointwise 1x1 matmul (bf16 MXU) (+ partial BN(pw) stats)
# --------------------------------------------------------------------------- #
def _pointwise_kernel(y_ref, sc_ref, sh_ref, w_ref, z_ref, st_ref, *, n_valid):
    tr = y_ref.shape[0]

    y = y_ref[...].astype(jnp.float32)
    y = jnp.maximum(y * sc_ref[...] + sh_ref[...], 0.0)        # BN(dw) + ReLU (f32)

    # bf16 operands, f32 accumulation on the MXU
    z = jnp.dot(y.astype(jnp.bfloat16), w_ref[...],
                preferred_element_type=jnp.float32)            # (tr, Cout_p)
    z_ref[...] = z.astype(z_ref.dtype)

    i = pl.program_id(0)
    last = pl.num_programs(0) - 1

    # plain sums on every full tile; masked path only on the ragged last tile
    @pl.when(i != last)
    def _():
        s1 = jnp.sum(z, axis=0, keepdims=True)
        s2 = jnp.sum(z * z, axis=0, keepdims=True)
        st_ref[0] = jnp.concatenate([s1, s2], axis=0)

    @pl.when(i == last)
    def _():
        rows = i * tr + lax.broadcasted_iota(jnp.int32, (tr, 1), 0)
        zm = jnp.where(rows < n_valid, z, 0.0)
        s1 = jnp.sum(zm, axis=0, keepdims=True)
        s2 = jnp.sum(zm * zm, axis=0, keepdims=True)
        st_ref[0] = jnp.concatenate([s1, s2], axis=0)


# --------------------------------------------------------------------------- #
# Wrapper
# --------------------------------------------------------------------------- #
def depthwise_separable_conv(x_nchw, params, *, kernel_size=3, dilation=1,
                             padding=1, eps=1e-5, row_block=1024):
    """Forward pass matching the PyTorch module (training-mode BN). NCHW f32 in/out."""
    wdw, gdw, bdw, wpw, gpw, bpw = params
    N, Cin, H, W = x_nchw.shape
    K = kernel_size
    Cout = wpw.shape[-1]
    Ho = H + 2 * padding - dilation * (K - 1)
    Wo = W + 2 * padding - dilation * (K - 1)
    Hp, Wp = H + 2 * padding, W + 2 * padding

    Cin_p = _round_up(Cin, LANE)
    Cout_p = _round_up(Cout, LANE)
    # TODO(synk): for Cin/Cout >= 128 on v6e/v7x, pad toward multiples of 256 so the
    #             1x1 matmul presents 256-wide contraction/output dims to the MXU.

    cparams = pltpu.CompilerParams(dimension_semantics=("parallel",),
                                   vmem_limit_bytes=_vmem_limit_bytes())

    # NCHW -> NHWC, zero-pad spatial halo + channels to a full 128-lane slab.
    # TODO(synk): for Cin << 128 (demo Cin=4) a width-on-lanes pass-1 layout would
    #             avoid padding-dominated DMA/compute; not done here.
    x = jnp.transpose(x_nchw, (0, 2, 3, 1)).astype(jnp.float32)
    x = jnp.pad(x, ((0, 0), (padding, padding), (padding, padding), (0, Cin_p - Cin)))

    wdw_p = jnp.pad(wdw.astype(jnp.float32), ((0, 0), (0, 0), (0, Cin_p - Cin)))
    gdw_p = jnp.pad(gdw.reshape(-1).astype(jnp.float32), (0, Cin_p - Cin))
    bdw_p = jnp.pad(bdw.reshape(-1).astype(jnp.float32), (0, Cin_p - Cin))
    wpw_p = jnp.pad(wpw.astype(jnp.float32), ((0, Cin_p - Cin), (0, Cout_p - Cout)))
    gpw_p = jnp.pad(gpw.reshape(-1).astype(jnp.float32), (0, Cout_p - Cout))
    bpw_p = jnp.pad(bpw.reshape(-1).astype(jnp.float32), (0, Cout_p - Cout))

    # ---------------- pass 1: depthwise conv, one whole image per grid step -------
    # TODO(synk): for large images, tile the H axis with halo blocks (pl.Element)
    #             instead of whole-image blocks.
    dw_kernel = functools.partial(_dw_conv_kernel, K=K, dilation=dilation, Ho=Ho, Wo=Wo)
    y, st_dw = pl.pallas_call(
        dw_kernel,
        grid=(N,),
        in_specs=[pl.BlockSpec((1, Hp, Wp, Cin_p), lambda n: (n, 0, 0, 0)),
                  pl.BlockSpec((K, K, Cin_p), lambda n: (0, 0, 0))],   # resident taps
        out_specs=(pl.BlockSpec((1, Ho, Wo, Cin_p), lambda n: (n, 0, 0, 0)),
                   pl.BlockSpec((1, 2, Cin_p), lambda n: (n, 0, 0))),
        out_shape=(jax.ShapeDtypeStruct((N, Ho, Wo, Cin_p), jnp.bfloat16),
                   jax.ShapeDtypeStruct((N, 2, Cin_p), jnp.float32)),
        compiler_params=cparams,
    )(x, wdw_p)

    # ---------------- finalize BN(dw) statistics (exact global, tiny arrays) ------
    count = float(N * Ho * Wo)
    s1 = jnp.sum(st_dw[:, 0, :], axis=0)
    s2 = jnp.sum(st_dw[:, 1, :], axis=0)
    mean = s1 / count
    var = jnp.maximum(s2 / count - mean * mean, 0.0)      # biased var (training mode)
    inv = lax.rsqrt(var + eps)
    sc_dw = (gdw_p * inv)[None, :]
    sh_dw = (bdw_p - mean * gdw_p * inv)[None, :]

    # ---------------- pass 2: row-tiled BN+ReLU + bf16 pointwise matmul ----------
    R = N * Ho * Wo
    TR = _round_up(min(row_block, R), 16)                 # bf16-friendly sublane tile
    n_tiles = -(-R // TR)
    Rp = n_tiles * TR
    y_flat = y.reshape(R, Cin_p)
    if Rp > R:                                            # pad rows: no OOB blocks
        y_flat = jnp.pad(y_flat, ((0, Rp - R), (0, 0)))

    pw_kernel = functools.partial(_pointwise_kernel, n_valid=R)
    z, st_pw = pl.pallas_call(
        pw_kernel,
        grid=(n_tiles,),
        in_specs=[pl.BlockSpec((TR, Cin_p), lambda i: (i, 0)),
                  pl.BlockSpec((1, Cin_p), lambda i: (0, 0)),       # resident scale
                  pl.BlockSpec((1, Cin_p), lambda i: (0, 0)),       # resident shift
                  pl.BlockSpec((Cin_p, Cout_p), lambda i: (0, 0))], # resident weight
        out_specs=(pl.BlockSpec((TR, Cout_p), lambda i: (i, 0)),
                   pl.BlockSpec((1, 2, Cout_p), lambda i: (i, 0, 0))),
        out_shape=(jax.ShapeDtypeStruct((Rp, Cout_p), jnp.bfloat16),
                   jax.ShapeDtypeStruct((n_tiles, 2, Cout_p), jnp.float32)),
        compiler_params=cparams,
    )(y_flat, sc_dw, sh_dw, wpw_p.astype(jnp.bfloat16))

    # ------- finalize BN(pw) stats + fused XLA epilogue (BN + ReLU + slice + NCHW) -
    s1p = jnp.sum(st_pw[:, 0, :], axis=0)
    s2p = jnp.sum(st_pw[:, 1, :], axis=0)
    mean2 = s1p / count
    var2 = jnp.maximum(s2p / count - mean2 * mean2, 0.0)
    inv2 = lax.rsqrt(var2 + eps)
    sc_pw = gpw_p * inv2
    sh_pw = bpw_p - mean2 * gpw_p * inv2

    z_valid = z[:R].astype(jnp.float32)
    out_flat = jnp.maximum(z_valid * sc_pw[None, :] + sh_pw[None, :], 0.0)
    out = out_flat.reshape(N, Ho, Wo, Cout_p)[..., :Cout]
    return jnp.transpose(out, (0, 3, 1, 2))


# --------------------------------------------------------------------------- #
# Pure-JAX reference (PyTorch training-mode forward)
# --------------------------------------------------------------------------- #
def _reference(x_nchw, params, *, kernel_size=3, dilation=1, padding=1, eps=1e-5):
    wdw, gdw, bdw, wpw, gpw, bpw = params
    Cin = x_nchw.shape[1]

    def bn_relu(t, g, b):
        mean = t.mean(axis=(0, 2, 3), keepdims=True)
        var = ((t - mean) ** 2).mean(axis=(0, 2, 3), keepdims=True)
        t = (t - mean) / jnp.sqrt(var + eps)
        t = t * g.reshape(1, -1, 1, 1) + b.reshape(1, -1, 1, 1)
        return jnp.maximum(t, 0.0)

    w_dw = jnp.transpose(wdw, (2, 0, 1))[:, None, :, :]        # (Cin,1,K,K)
    y = lax.conv_general_dilated(
        x_nchw, w_dw, window_strides=(1, 1),
        padding=[(padding, padding), (padding, padding)],
        rhs_dilation=(dilation, dilation), feature_group_count=Cin,
        dimension_numbers=('NCHW', 'OIHW', 'NCHW'))
    y = bn_relu(y, gdw.reshape(-1), bdw.reshape(-1))

    w_pw = jnp.transpose(wpw, (1, 0))[:, :, None, None]        # (Cout,Cin,1,1)
    z = lax.conv_general_dilated(y, w_pw, (1, 1), 'VALID',
                                 dimension_numbers=('NCHW', 'OIHW', 'NCHW'))
    return bn_relu(z, gpw.reshape(-1), bpw.reshape(-1))


if __name__ == "__main__":
    N, Cin, Cout, H, W = 2, 4, 8, 16, 16
    K, dilation, padding = 3, 1, 1

    key = jax.random.PRNGKey(0)
    kx, kdw, kpw = jax.random.split(key, 3)

    x = jax.random.normal(kx, (N, Cin, H, W), dtype=jnp.float32)
    w_dw = 0.1 * jax.random.normal(kdw, (K, K, Cin), dtype=jnp.float32)   # depthwise taps
    w_pw = 0.1 * jax.random.normal(kpw, (Cin, Cout), dtype=jnp.float32)   # pointwise matmul
    g_dw = jnp.ones((Cin,), jnp.float32)
    b_dw = jnp.zeros((Cin,), jnp.float32)
    g_pw = jnp.ones((Cout,), jnp.float32)
    b_pw = jnp.zeros((Cout,), jnp.float32)
    params = (w_dw, g_dw, b_dw, w_pw, g_pw, b_pw)

    # row_block=96 exercises the multi-tile grid, the row padding, and the
    # masked ragged-last-tile stats path at this size (R=512 -> 6 tiles of 96).
    out = depthwise_separable_conv(x, params, kernel_size=K, dilation=dilation,
                                   padding=padding, row_block=96)
    out = jax.block_until_ready(out)

    ref = _reference(x, params, kernel_size=K, dilation=dilation, padding=padding)
    assert out.shape == (N, Cout, H, W), out.shape
    max_err = float(jnp.max(jnp.abs(out - ref)))
    # bf16 intermediates (y, z) and bf16 MXU operands -> relaxed tolerance.
    assert max_err < 5e-2, max_err

    print("KERNEL_OK")
</pallas_src>

<mosaic_0001>
module attributes {stable_mosaic.version = 11 : i64} {
  func.func @_dw_conv_kernel(%arg0: i32, %arg1: memref<1x18x18x128xf32, #tpu.memory_space<vmem>>, %arg2: memref<3x3x128xf32, #tpu.memory_space<vmem>>, %arg3: memref<1x16x16x128xbf16, #tpu.memory_space<vmem>>, %arg4: memref<1x2x128xf32, #tpu.memory_space<vmem>>) attributes {dimension_semantics = [#tpu.dimension_semantics<parallel>], iteration_bounds = array<i64: 2>, scalar_prefetch = 0 : i64, scratch_operands = 0 : i64, tpu.core_type = #tpu.core_type<tc>, window_params = [{transform_indices = @transform_0, window_bounds = array<i64: 1, 18, 18, 128>}, {pipeline_mode = #tpu.pipeline_mode<synchronous>, transform_indices = @transform_1, window_bounds = array<i64: 3, 3, 128>}, {transform_indices = @transform_2, window_bounds = array<i64: 1, 16, 16, 128>}, {transform_indices = @transform_3, window_bounds = array<i64: 1, 2, 128>}]} {
    %c0 = arith.constant 0 : index
    %c0_0 = arith.constant 0 : index
    %c0_1 = arith.constant 0 : index
    %c0_2 = arith.constant 0 : index
    %0 = vector.load %arg1[%c0, %c0_0, %c0_1, %c0_2] : memref<1x18x18x128xf32, #tpu.memory_space<vmem>>, vector<1x18x18x128xf32>
    %1 = vector.shape_cast %0 : vector<1x18x18x128xf32> to vector<18x18x128xf32>
    %c0_3 = arith.constant 0 : index
    %c0_4 = arith.constant 0 : index
    %c0_5 = arith.constant 0 : index
    %2 = vector.load %arg2[%c0_3, %c0_4, %c0_5] : memref<3x3x128xf32, #tpu.memory_space<vmem>>, vector<3x3x128xf32>
    %cst = arith.constant 0.000000e+00 : f32
    %3 = vector.broadcast %cst : f32 to vector<16x16x128xf32>
    %4 = vector.extract_strided_slice %1 {offsets = [0, 0, 0], sizes = [16, 16, 128], strides = [1, 1, 1]} : vector<18x18x128xf32> to vector<16x16x128xf32>
    %5 = vector.extract_strided_slice %2 {offsets = [0, 0, 0], sizes = [1, 1, 128], strides = [1, 1, 1]} : vector<3x3x128xf32> to vector<1x1x128xf32>
    %6 = vector.shape_cast %5 : vector<1x1x128xf32> to vector<128xf32>
    %7 = vector.shape_cast %6 : vector<128xf32> to vector<1x1x128xf32>
    %8 = vector.broadcast %7 : vector<1x1x128xf32> to vector<16x16x128xf32>
    %9 = arith.mulf %4, %8 : vector<16x16x128xf32>
    %10 = arith.addf %3, %9 : vector<16x16x128xf32>
    %11 = vector.extract_strided_slice %1 {offsets = [0, 1, 0], sizes = [16, 16, 128], strides = [1, 1, 1]} : vector<18x18x128xf32> to vector<16x16x128xf32>
    %12 = vector.extract_strided_slice %2 {offsets = [0, 1, 0], sizes = [1, 1, 128], strides = [1, 1, 1]} : vector<3x3x128xf32> to vector<1x1x128xf32>
    %13 = vector.shape_cast %12 : vector<1x1x128xf32> to vector<128xf32>
    %14 = vector.shape_cast %13 : vector<128xf32> to vector<1x1x128xf32>
    %15 = vector.broadcast %14 : vector<1x1x128xf32> to vector<16x16x128xf32>
    %16 = arith.mulf %11, %15 : vector<16x16x128xf32>
    %17 = arith.addf %10, %16 : vector<16x16x128xf32>
    %18 = vector.extract_strided_slice %1 {offsets = [0, 2, 0], sizes = [16, 16, 128], strides = [1, 1, 1]} : vector<18x18x128xf32> to vector<16x16x128xf32>
    %19 = vector.extract_strided_slice %2 {offsets = [0, 2, 0], sizes = [1, 1, 128], strides = [1, 1, 1]} : vector<3x3x128xf32> to vector<1x1x128xf32>
    %20 = vector.shape_cast %19 : vector<1x1x128xf32> to vector<128xf32>
    %21 = vector.shape_cast %20 : vector<128xf32> to vector<1x1x128xf32>
    %22 = vector.broadcast %21 : vector<1x1x128xf32> to vector<16x16x128xf32>
    %23 = arith.mulf %18, %22 : vector<16x16x128xf32>
    %24 = arith.addf %17, %23 : vector<16x16x128xf32>
    %25 = vector.extract_strided_slice %1 {offsets = [1, 0, 0], sizes = [16, 16, 128], strides = [1, 1, 1]} : vector<18x18x128xf32> to vector<16x16x128xf32>
    %26 = vector.extract_strided_slice %2 {offsets = [1, 0, 0], sizes = [1, 1, 128], strides = [1, 1, 1]} : vector<3x3x128xf32> to vector<1x1x128xf32>
    %27 = vector.shape_cast %26 : vector<1x1x128xf32> to vector<128xf32>
    %28 = vector.shape_cast %27 : vector<128xf32> to vector<1x1x128xf32>
    %29 = vector.broadcast %28 : vector<1x1x128xf32> to vector<16x16x128xf32>
    %30 = arith.mulf %25, %29 : vector<16x16x128xf32>
    %31 = arith.addf %24, %30 : vector<16x16x128xf32>
    %32 = vector.extract_strided_slice %1 {offsets = [1, 1, 0], sizes = [16, 16, 128], strides = [1, 1, 1]} : vector<18x18x128xf32> to vector<16x16x128xf32>
    %33 = vector.extract_strided_slice %2 {offsets = [1, 1, 0], sizes = [1, 1, 128], strides = [1, 1, 1]} : vector<3x3x128xf32> to vector<1x1x128xf32>
    %34 = vector.shape_cast %33 : vector<1x1x128xf32> to vector<128xf32>
    %35 = vector.shape_cast %34 : vector<128xf32> to vector<1x1x128xf32>
    %36 = vector.broadcast %35 : vector<1x1x128xf32> to vector<16x16x128xf32>
    %37 = arith.mulf %32, %36 : vector<16x16x128xf32>
    %38 = arith.addf %31, %37 : vector<16x16x128xf32>
    %39 = vector.extract_strided_slice %1 {offsets = [1, 2, 0], sizes = [16, 16, 128], strides = [1, 1, 1]} : vector<18x18x128xf32> to vector<16x16x128xf32>
    %40 = vector.extract_strided_slice %2 {offsets = [1, 2, 0], sizes = [1, 1, 128], strides = [1, 1, 1]} : vector<3x3x128xf32> to vector<1x1x128xf32>
    %41 = vector.shape_cast %40 : vector<1x1x128xf32> to vector<128xf32>
    %42 = vector.shape_cast %41 : vector<128xf32> to vector<1x1x128xf32>
    %43 = vector.broadcast %42 : vector<1x1x128xf32> to vector<16x16x128xf32>
    %44 = arith.mulf %39, %43 : vector<16x16x128xf32>
    %45 = arith.addf %38, %44 : vector<16x16x128xf32>
    %46 = vector.extract_strided_slice %1 {offsets = [2, 0, 0], sizes = [16, 16, 128], strides = [1, 1, 1]} : vector<18x18x128xf32> to vector<16x16x128xf32>
    %47 = vector.extract_strided_slice %2 {offsets = [2, 0, 0], sizes = [1, 1, 128], strides = [1, 1, 1]} : vector<3x3x128xf32> to vector<1x1x128xf32>
    %48 = vector.shape_cast %47 : vector<1x1x128xf32> to vector<128xf32>
    %49 = vector.shape_cast %48 : vector<128xf32> to vector<1x1x128xf32>
    %50 = vector.broadcast %49 : vector<1x1x128xf32> to vector<16x16x128xf32>
    %51 = arith.mulf %46, %50 : vector<16x16x128xf32>
    %52 = arith.addf %45, %51 : vector<16x16x128xf32>
    %53 = vector.extract_strided_slice %1 {offsets = [2, 1, 0], sizes = [16, 16, 128], strides = [1, 1, 1]} : vector<18x18x128xf32> to vector<16x16x128xf32>
    %54 = vector.extract_strided_slice %2 {offsets = [2, 1, 0], sizes = [1, 1, 128], strides = [1, 1, 1]} : vector<3x3x128xf32> to vector<1x1x128xf32>
    %55 = vector.shape_cast %54 : vector<1x1x128xf32> to vector<128xf32>
    %56 = vector.shape_cast %55 : vector<128xf32> to vector<1x1x128xf32>
    %57 = vector.broadcast %56 : vector<1x1x128xf32> to vector<16x16x128xf32>
    %58 = arith.mulf %53, %57 : vector<16x16x128xf32>
    %59 = arith.addf %52, %58 : vector<16x16x128xf32>
    %60 = vector.extract_strided_slice %1 {offsets = [2, 2, 0], sizes = [16, 16, 128], strides = [1, 1, 1]} : vector<18x18x128xf32> to vector<16x16x128xf32>
    %61 = vector.extract_strided_slice %2 {offsets = [2, 2, 0], sizes = [1, 1, 128], strides = [1, 1, 1]} : vector<3x3x128xf32> to vector<1x1x128xf32>
    %62 = vector.shape_cast %61 : vector<1x1x128xf32> to vector<128xf32>
    %63 = vector.shape_cast %62 : vector<128xf32> to vector<1x1x128xf32>
    %64 = vector.broadcast %63 : vector<1x1x128xf32> to vector<16x16x128xf32>
    %65 = arith.mulf %60, %64 : vector<16x16x128xf32>
    %66 = arith.addf %59, %65 : vector<16x16x128xf32>
    %67 = arith.truncf %66 : vector<16x16x128xf32> to vector<16x16x128xbf16>
    %c0_6 = arith.constant 0 : index
    %c0_7 = arith.constant 0 : index
    %c0_8 = arith.constant 0 : index
    %c0_9 = arith.constant 0 : index
    %68 = vector.load %arg3[%c0_6, %c0_7, %c0_8, %c0_9] : memref<1x16x16x128xbf16, #tpu.memory_space<vmem>>, vector<1x16x16x128xbf16>
    %69 = vector.shape_cast %68 : vector<1x16x16x128xbf16> to vector<16x16x128xbf16>
    %70 = vector.shape_cast %67 : vector<16x16x128xbf16> to vector<1x16x16x128xbf16>
    tpu.vector_store %arg3[%c0_6, %c0_7, %c0_8, %c0_9], %70 {strides = array<i32>} : memref<1x16x16x128xbf16, #tpu.memory_space<vmem>>, vector<1x16x16x128xbf16>,
    %cst_10 = arith.constant dense<0.000000e+00> : vector<128xf32>
    %71 = vector.multi_reduction <add>, %66, %cst_10 [0, 1] : vector<16x16x128xf32> to vector<128xf32>
    %72 = vector.shape_cast %71 : vector<128xf32> to vector<1x128xf32>
    %73 = arith.mulf %66, %66 : vector<16x16x128xf32>
    %cst_11 = arith.constant dense<0.000000e+00> : vector<128xf32>
    %74 = vector.multi_reduction <add>, %73, %cst_11 [0, 1] : vector<16x16x128xf32> to vector<128xf32>
    %75 = vector.shape_cast %74 : vector<128xf32> to vector<1x128xf32>
    %76 = tpu.concatenate %72, %75 in 0 : vector<1x128xf32>, vector<1x128xf32> -> vector<2x128xf32>
    %c0_12 = arith.constant 0 : index
    %c0_13 = arith.constant 0 : index
    %c0_14 = arith.constant 0 : index
    %77 = vector.load %arg4[%c0_12, %c0_13, %c0_14] : memref<1x2x128xf32, #tpu.memory_space<vmem>>, vector<1x2x128xf32>
    %78 = vector.shape_cast %77 : vector<1x2x128xf32> to vector<2x128xf32>
    %79 = vector.shape_cast %76 : vector<2x128xf32> to vector<1x2x128xf32>
    tpu.vector_store %arg4[%c0_12, %c0_13, %c0_14], %79 {strides = array<i32>} : memref<1x2x128xf32, #tpu.memory_space<vmem>>, vector<1x2x128xf32>,
    return
  }
  func.func @transform_0(%arg0: i32) -> (i32, i32, i32, i32) {
    %c0_i32 = arith.constant 0 : i32
    %c0_i32_0 = arith.constant 0 : i32
    %c0_i32_1 = arith.constant 0 : i32
    %c0_i32_2 = arith.constant 0 : i32
    return %arg0, %c0_i32, %c0_i32_0, %c0_i32_1 : i32, i32, i32, i32
  }
  func.func @transform_1(%arg0: i32) -> (i32, i32, i32) {
    %c0_i32 = arith.constant 0 : i32
    %c0_i32_0 = arith.constant 0 : i32
    %c0_i32_1 = arith.constant 0 : i32
    %c0_i32_2 = arith.constant 0 : i32
    return %c0_i32, %c0_i32_0, %c0_i32_1 : i32, i32, i32
  }
  func.func @transform_2(%arg0: i32) -> (i32, i32, i32, i32) {
    %c0_i32 = arith.constant 0 : i32
    %c0_i32_0 = arith.constant 0 : i32
    %c0_i32_1 = arith.constant 0 : i32
    %c0_i32_2 = arith.constant 0 : i32
    return %arg0, %c0_i32, %c0_i32_0, %c0_i32_1 : i32, i32, i32, i32
  }
  func.func @transform_3(%arg0: i32) -> (i32, i32, i32) {
    %c0_i32 = arith.constant 0 : i32
    %c0_i32_0 = arith.constant 0 : i32
    %c0_i32_1 = arith.constant 0 : i32
    return %arg0, %c0_i32, %c0_i32_0 : i32, i32, i32
  }
}

</mosaic_0001>

<bundles_post_ra>
// kernel: tpu_custom_call.1
= control target key start
LH: loop header
LB: loop body
LE: loop exit
PB: predicated region body
PF: predicated region fallthrough
CT: control target
= control target key end

     0   :  { %9 = vsyncpa [#allocation3], 0  ;;  %s6011_s0 = inlined_call_operand.vmem [shape: f32[2,18,18,128], index: 0, kind: input, shape index: {}]   ;;  %s6012_s1 = inlined_call_operand.vmem [shape: f32[3,3,128], index: 1, kind: input, shape index: {}]   ;;  %s6013_s2 = inlined_call_operand.hbm [shape: bf16[2,16,16,128], index: 2, kind: output, shape index: {0}]   ;;  %s6014_s3 = inlined_call_operand.hbm [shape: f32[2,2,128], index: 3, kind: output, shape index: {1}]  }
   0x1   :  { %11 = vsyncpa [#allocation3 + $0x1], 0 }
   0x2   :  { %12 = vsyncpa [#allocation5], 0 }
   0x3   :  { %14 = vsyncpa [#allocation5 + $0x1], 0  ;;  %s2692_s12 = smov 0   ;;  %s2694_s13 = smov 0  }
   0x4   :  { %s2696_s14 = smov 0   ;;  %s2698_s15 = smov 0  }
   0x5 LB: > { %s2713_s16 = sadd.s32 4294967295, %s2666_s15   ;;  %s2302_s17 = sadd.s32 4294967294, %s2666_s15   ;;  %s2666_s15 = sphi %s2698_s15, %s6941_s15   ;;  %s2662_s14 = sphi %s2696_s14, %s6940_s14   ;;  %s2658_s13 = sphi %s2694_s13, %s6939_s13   ;;  %s2654_s12 = sphi %s2692_s12, %s6938_s12  }
   0x6   : > { %s2717_s18 = sadd.s32 1, %s2666_s15   ;;  %s74_s19 = sadd.s32 1, %s2662_s14 }
   0x7   : > { %s71_s20 = ssub.s32 %s2666_s15, %s2717_s18  ;;  %p84_p0 = scmp.ne.s32.totalorder %s2662_s14, %s2658_s13 }
   0x8   : > { %p72_p1 = scmp.eq.s32.totalorder %s71_s20, 0  ;;  %p85_p2 = scmp.eq.s32.totalorder %s2713_s16, 1 }
   0x9   : > { %p90_p3 = scmp.ne.s32.totalorder %s2658_s13, %s2654_s12  ;;  %p91_p4 = scmp.eq.s32.totalorder %s2302_s17, 1 }
   0xa   : > { %s2728_s21 = scalar_select %p72_p1, %s2662_s14, %s74_s19  }
   0xb   : > { %p2730_p5 = por %p85_p2, %p84_p0  ;;  %p2734_p6 = por %p91_p4, %p90_p3 }
   0xc   : > { %p2305_p7 = scmp.ge.s32.totalorder %s2666_s15, 1  ;;  %p146_p8 = scmp.lt.s32.totalorder %s2666_s15, 3 }
   0xe   : > { %p147_p9 = pnand %p2305_p7, %p146_p8 }
  0x10   : > { %150 = sbr.rel (%p147_p9) target bundleno = 480 (0x1e0), region = 28 }
  0x17   : > { %p175_p10 = scmp.lt.s32.totalorder %s2713_s16, 1  ;;  %v237_v0 = vlaneseq  ;;  %v234_v2 = vld [vmem:[%s6012_s1] sm:$0x7]  ;;  %v235_v6 = vld [vmem:[%s6012_s1 + $0x4] sm:$0x7]  ;;  %vm405_vm0 = vcmask 1046528  }
  0x18   : > { %vm650_vm1 = vcmask 1045504   ;;  %s5664_s10 = sand.u32 1, %s2658_s13   ;;  %s2380_s17 = sshll.u32 %s2713_s16, 11 }
  0x19   : > { %v238_v1 = vshrl.u32 %v237_v0, 7  ;;  %s176_s24 = scalar_select %p175_p10, %s2713_s16, 1 }
  0x1a   : > { %s2306_s11 = sshll.u32 %s5664_s10, 7  ;;  %s5819_s26 = scalar_lea.hbm %s6013_s2, %s2380_s17 }
  0x1b   : > { %v2745_v3 = vsub.s32 0, %v238_v1  ;;  %v2747_v4 = vsub.s32 1, %v238_v1  ;;  %s2476_s27 = smul.u32 432, %s176_s24  ;;  %v2749_v5 = vsub.s32 2, %v238_v1  ;;  %s5785_s19 = scalar_lea.vmem [#allocation2], %s2306_s11 }
  0x1c   : > { %s2195_s20 = sshll.u32 %s5785_s19, 4  ;;  %s2668_s29 = smov [#allocation2]   ;;  %s5821_s20 = int_to_ptr.vmem [resolvable:$true] %s2195_s20 }
  0x1d   : > { %6213 = vst [vmem:[#allocation8_spill] sm:$0xff] %v2745_v3  ;;  %6214 = vst [vmem:[#allocation9_spill] sm:$0xff] %v2747_v4  ;;  %v2755_v7 = vrot.slane %v234_v2, %v2745_v3  ;;  %v2758_v8 = vrot.slane %v234_v2, %v2747_v4  ;;  %s2763_s5 = scalar_lea.vmem %s6011_s0, %s2476_s27  ;;  %v2784_v15 = vrot.slane %v234_v2, %v2749_v5  ;;  %s2177_s27 = scalar_lea.sflag [#allocation3], %s5664_s10 }
  0x1e   : > { %6215 = vst [vmem:[#allocation10_spill] sm:$0xff] %v2749_v5  ;;  %v2766_v9 = vld [vmem:[%s2763_s5] sm:$0xff]  ;;  %v2769_v10 = vld [vmem:[%s2763_s5 + $0x8] sm:$0xff]  ;;  %v2772_v11 = vld [vmem:[%s2763_s5 + $0x10] sm:$0x3]  ;;  %v2787_v16 = vrot.slane %v235_v6, %v2745_v3  ;;  %v2790_v17 = vrot.slane %v235_v6, %v2747_v4  ;;  %s2572_s28 = scalar_lea.vmem %s5821_s20, 2048 }
  0x1f   : > { %6216 = vst [vmem:[#allocation11_spill] sm:$0xff] %v2766_v9  ;;  %6217 = vst [vmem:[#allocation12_spill] sm:$0xff] %v2769_v10  ;;  %v2775_v12 = vld [vmem:[%s2763_s5 + $0x18] sm:$0xff]  ;;  %v2778_v13 = vld [vmem:[%s2763_s5 + $0x20] sm:$0xff]  ;;  %v2800_v20 = vmul.f32 %v2755_v7, %v2766_v9  ;;  %v2804_v21 = vmul.f32 %v2755_v7, %v2769_v10  ;;  %v2808_v22 = vmul.f32 %v2758_v8, %v2766_v9  ;;  %p2573_p11 = scmp.ne.s32.totalorder %s5821_s20, %s2572_s28  ;;  %s2576_s30 = sshll.u32 %s2668_s29, 4  ;;  %s2577_s30 = int_to_ptr.vmem [resolvable:$false] %s2576_s30 }
  0x20   : > { %6218 = vst [vmem:[#allocation13_spill] sm:$0xff] %v2772_v11  ;;  %6219 = vst [vmem:[#allocation14_spill] sm:$0xff] %v2775_v12  ;;  %v2781_v14 = vld [vmem:[%s2763_s5 + $0x28] sm:$0x3]  ;;  %v2793_v18 = vld [vmem:[%s2763_s5 + $0x30] sm:$0xff]  ;;  %v2812_v23 = vmul.f32 %v2758_v8, %v2769_v10  ;;  %v2822_v26 = vmul.f32 %v2755_v7, %v2775_v12  ;;  %v2826_v27 = vmul.f32 %v2755_v7, %v2778_v13  ;;  %s2578_s4 = scalar_lea.vmem %s2577_s30, 4096  ;;  %p2579_p0 = scmp.lt.s32.totalorder %s5821_s20, %s2577_s30 }
  0x21   : > { %6220 = vst [vmem:[#allocation15_spill] sm:$0xff] %v2778_v13  ;;  %6221 = vst [vmem:[#allocation16_spill] sm:$0xff] %v2781_v14  ;;  %v2796_v19 = vld [vmem:[%s2763_s5 + $0x38] sm:$0xff]  ;;  %v2815_v24 = vld [vmem:[%s2763_s5 + $0x40] sm:$0x3]  ;;  %v2830_v28 = vmul.f32 %v2758_v8, %v2772_v11  ;;  %v2834_v29 = vmul.f32 %v2758_v8, %v2775_v12  ;;  %v2844_v32 = vmul.f32 %v2755_v7, %v2793_v18  ;;  %p2574_p12 = pnand %p2573_p11, %p2730_p5  ;;  %p2580_p1 = scmp.lt.s32.totalorder %s2578_s4, %s2572_s28 }
  0x22   : > { %6222 = vst [vmem:[#allocation17_spill] sm:$0xff] %v2784_v15  ;;  %6223 = vst [vmem:[#allocation18_spill] sm:$0xff] %v2787_v16  ;;  %v2818_v25 = vld [vmem:[%s2763_s5 + $0x48] sm:$0xff]  ;;  %v2837_v30 = vld [vmem:[%s2763_s5 + $0x50] sm:$0xff]  ;;  %v2848_v33 = vmul.f32 %v2755_v7, %v2796_v19  ;;  %v2852_v34 = vmul.f32 %v2758_v8, %v2778_v13  ;;  %v2856_v35 = vmul.f32 %v2758_v8, %v2781_v14 }
  0x23   : > { %6224 = vst [vmem:[#allocation19_spill] sm:$0xff] %v2790_v17  ;;  %6225 = vst [vmem:[#allocation20_spill] sm:$0xff] %v2793_v18  ;;  %v2840_v31 = vld [vmem:[%s2763_s5 + $0x58] sm:$0x3]  ;;  %v2859_v36 = vld [vmem:[%s2763_s5 + $0x60] sm:$0xff]  ;;  %v2866_v38 = vmul.f32 %v2755_v7, %v2818_v25  ;;  %v2870_v39 = vmul.f32 %v2755_v7, %v2837_v30  ;;  %v2874_v40 = vmul.f32 %v2758_v8, %v2793_v18  ;;  %p2575_p13 = pneg %p2574_p12  ;;  %p2581_p2 = por %p2580_p1, %p2579_p0 }
  0x24   : > { %6226 = vst [vmem:[#allocation21_spill] sm:$0xff] %v2796_v19  ;;  %6227 = vst [vmem:[#allocation22_spill] sm:$0xff] %v2815_v24  ;;  %v2862_v37 = vld [vmem:[%s2763_s5 + $0x68] sm:$0xff]  ;;  %v2878_v41 = vmul.f32 %v2758_v8, %v2796_v19  ;;  %v2881_v42 = vld [vmem:[%s2763_s5 + $0x70] sm:$0x3]  ;;  %v2891_v45 = vmul.f32 %v2755_v7, %v2859_v36  ;;  %v2899_v47 = vmul.f32 %v2758_v8, %v2815_v24 }
  0x25   : > { %6228 = vst [vmem:[#allocation23_spill] sm:$0xff] %v2818_v25  ;;  %6229 = vst [vmem:[#allocation24_spill] sm:$0xff] %v2837_v30  ;;  %v2884_v43 = vld [vmem:[%s2763_s5 + $0x78] sm:$0xff]  ;;  %v2887_v44 = vld [vmem:[%s2763_s5 + $0x80] sm:$0xff]  ;;  %v2895_v46 = vmul.f32 %v2755_v7, %v2862_v37  ;;  %v2903_v48 = vmul.f32 %v2758_v8, %v2818_v25  ;;  %v2924_v54 = vmul.f32 %v2758_v8, %v2837_v30  ;;  %p2582_p3 = pnand %p2581_p2, %p2575_p13 }
  0x26   : > { %6230 = vst [vmem:[#allocation25_spill] sm:$0xff] %v2840_v31  ;;  %6231 = vst [vmem:[#allocation26_spill] sm:$0xff] %v2859_v36  ;;  %v2906_v49 = vld [vmem:[%s2763_s5 + $0x88] sm:$0x3]  ;;  %v2909_v50 = vld [vmem:[%s2763_s5 + $0x90] sm:$0xff]  ;;  %v2916_v52 = vmul.f32 %v2755_v7, %v2884_v43  ;;  %v2920_v53 = vmul.f32 %v2755_v7, %v2887_v44  ;;  %v2928_v55 = vmul.f32 %v2758_v8, %v2840_v31 }
  0x27   : > { %6232 = vst [vmem:[#allocation27_spill] sm:$0xff] %v2862_v37  ;;  %6233 = vst [vmem:[#allocation28_spill] sm:$0xff] %v2866_v38  ;;  %v2912_v51 = vld [vmem:[%s2763_s5 + $0x98] sm:$0xff]  ;;  %v2931_v56 = vld [vmem:[%s2763_s5 + $0xa8] sm:$0xff]  ;;  %v2938_v58 = vmul.f32 %v2755_v7, %v2909_v50  ;;  %v2946_v60 = vmul.f32 %v2758_v8, %v2859_v36  ;;  %v2950_v61 = vmul.f32 %v2758_v8, %v2862_v37  ;;  %v417_v38 = vrot.slane %v2878_v41, 1 }
  0x28   : > { %6234 = vst [vmem:[#allocation29_spill] sm:$0xff] %v2870_v39  ;;  %6235 = vst [vmem:[#allocation30_spill] sm:$0xff] %v2881_v42  ;;  %v2934_v57 = vld [vmem:[%s2763_s5 + $0xb0] sm:$0xff]  ;;  %v2942_v59 = vmul.f32 %v2755_v7, %v2912_v51  ;;  %v2953_v62 = vld [vmem:[%s2763_s5 + $0xa0] sm:$0x3]  ;;  %v2963_v1 = vmul.f32 %v2755_v7, %v2931_v56  ;;  %v2971_v6 = vmul.f32 %v2758_v8, %v2881_v42  ;;  %v414_v39 = vrot.slane %v2856_v35, 1 }
  0x29   : > { %6236 = vst [vmem:[#allocation31_spill] sm:$0xff] %v2884_v43  ;;  %6237 = vst [vmem:[#allocation32_spill] sm:$0xff] %v2887_v44  ;;  %v2956_v63 = vld [vmem:[%s2763_s5 + $0xc0] sm:$0xff]  ;;  %v2959_v0 = vld [vmem:[%s2763_s5 + $0xc8] sm:$0xff]  ;;  %v2967_v2 = vmul.f32 %v2755_v7, %v2934_v57  ;;  %v2975_v4 = vmul.f32 %v2758_v8, %v2884_v43  ;;  %v2996_v43 = vmul.f32 %v2758_v8, %v2887_v44  ;;  %v421_v35 = vrot.slane %v2903_v48, 1 }
  0x2a   : > { %6238 = vst [vmem:[#allocation33_spill] sm:$0xff] %v2891_v45  ;;  %6239 = vst [vmem:[#allocation34_spill] sm:$0xff] %v2895_v46  ;;  %v2978_v3 = vld [vmem:[%s2763_s5 + $0xb8] sm:$0x3]  ;;  %v2984_v17 = vld [vmem:[%s2763_s5 + $0xe0] sm:$0xff]  ;;  %v2988_v16 = vmul.f32 %v2755_v7, %v2956_v63  ;;  %v2992_v42 = vmul.f32 %v2755_v7, %v2959_v0  ;;  %v3000_v37 = vmul.f32 %v2758_v8, %v2906_v49  ;;  %v407_v46 = vrot.slane %v2812_v23, 1 }
  0x2b   : > { %6240 = vst [vmem:[#allocation35_spill] sm:$0xff] %v2906_v49  ;;  %6241 = vst [vmem:[#allocation36_spill] sm:$0xff] %v2909_v50  ;;  %v2981_v5 = vld [vmem:[%s2763_s5 + $0xd8] sm:$0xff]  ;;  %v3003_v36 = vld [vmem:[%s2763_s5 + $0xf0] sm:$0xff]  ;;  %v3014_v25 = vmul.f32 %v2755_v7, %v2984_v17  ;;  %v3018_v44 = vmul.f32 %v2758_v8, %v2909_v50  ;;  %v3022_v49 = vmul.f32 %v2758_v8, %v2912_v51  ;;  %v411_v45 = vrot.slane %v2834_v29, 1 }
  0x2c   : > { %6242 = vst [vmem:[#allocation37_spill] sm:$0xff] %v2912_v51  ;;  %6243 = vst [vmem:[#allocation38_spill] sm:$0xff] %v2916_v52  ;;  %v3006_v31 = vld [vmem:[%s2763_s5 + $0xf8] sm:$0xff]  ;;  %v3010_v30 = vmul.f32 %v2755_v7, %v2981_v5  ;;  %v3025_v24 = vld [vmem:[%s2763_s5 + $0xd0] sm:$0x3]  ;;  %v3035_v14 = vmul.f32 %v2755_v7, %v3003_v36  ;;  %v3043_v51 = vmul.f32 %v2758_v8, %v2953_v62  ;;  %v406_v52 = vrot.slane %v2808_v22, 1 }
  0x2d   : > { %6244 = vst [vmem:[#allocation39_spill] sm:$0xff] %v2920_v53  ;;  %6245 = vst [vmem:[#allocation40_spill] sm:$0xff] %v2931_v56  ;;  %v3028_v19 = vld [vmem:[%s2763_s5 + $0x108] sm:$0xff]  ;;  %v3031_v18 = vld [vmem:[%s2763_s5 + $0x110] sm:$0xff]  ;;  %v3039_v50 = vmul.f32 %v2755_v7, %v3006_v31  ;;  %v3047_v13 = vmul.f32 %v2758_v8, %v2931_v56  ;;  %v3068_v56 = vmul.f32 %v2758_v8, %v2934_v57  ;;  %v427_v48 = vrot.slane %v2950_v61, 1 }
  0x2e   : > { %6246 = vst [vmem:[#allocation41_spill] sm:$0xff] %v2934_v57  ;;  %6247 = vst [vmem:[#allocation42_spill] sm:$0xff] %v2938_v58  ;;  %v3050_v12 = vld [vmem:[%s2763_s5 + $0xe8] sm:$0x3]  ;;  %v3053_v11 = vld [vmem:[%s2763_s5 + $0x120] sm:$0xff]  ;;  %v3060_v15 = vmul.f32 %v2755_v7, %v3028_v19  ;;  %v3072_v9 = vmul.f32 %v2758_v8, %v2978_v3 }
  0x2f   : > { %6248 = vst [vmem:[#allocation43_spill] sm:$0xff] %v2942_v59  ;;  %6249 = vst [vmem:[#allocation44_spill] sm:$0xff] %v2953_v62  ;;  %v3056_v10 = vld [vmem:[%s2763_s5 + $0x128] sm:$0xff]  ;;  %v3064_v62 = vmul.f32 %v2755_v7, %v3031_v18  ;;  %v3131_v59 = vld [vmem:[%s2763_s5 + $0x170] sm:$0xff] }
  0x30   : > { %6250 = vst [vmem:[#allocation45_spill] sm:$0xff] %v2956_v63  ;;  %6251 = vst [vmem:[#allocation46_spill] sm:$0xff] %v2959_v0  ;;  %v3089_v57 = vmul.f32 %v2755_v7, %v3056_v10  ;;  %v3150_v58 = vld [vmem:[%s2763_s5 + $0x148] sm:$0x3]  ;;  %v3240_v23 = vmul.f32 %v2758_v8, %v3131_v59 }
  0x31   : > { %6252 = vst [vmem:[#allocation47_spill] sm:$0xff] %v2963_v1  ;;  %6253 = vst [vmem:[#allocation48_spill] sm:$0xff] %v2967_v2  ;;  %v3125_v2 = vld [vmem:[%s2763_s5 + $0x130] sm:$0x3]  ;;  %v3128_v1 = vld [vmem:[%s2763_s5 + $0x168] sm:$0xff] }
  0x32   : > { %6254 = vst [vmem:[#allocation49_spill] sm:$0xff] %v2978_v3  ;;  %6255 = vst [vmem:[#allocation50_spill] sm:$0xff] %v2981_v5  ;;  %v3093_v3 = vmul.f32 %v2758_v8, %v2956_v63  ;;  %v3118_v63 = vmul.f32 %v2758_v8, %v3025_v24  ;;  %v3154_v53 = vmul.f32 %v2755_v7, %v3128_v1 }
  0x33   : > { %6256 = vst [vmem:[#allocation51_spill] sm:$0xff] %v2984_v17  ;;  %6257 = vst [vmem:[#allocation52_spill] sm:$0xff] %v2988_v16  ;;  %v3106_v16 = vld [vmem:[%s2763_s5 + $0x158] sm:$0xff]  ;;  %v3236_v22 = vmul.f32 %v2758_v8, %v3128_v1 }
  0x34   : > { %6258 = vst [vmem:[#allocation53_spill] sm:$0xff] %v2992_v42  ;;  %6259 = vst [vmem:[#allocation54_spill] sm:$0xff] %v3003_v36  ;;  %v3103_v42 = vld [vmem:[%s2763_s5 + $0x150] sm:$0xff] }
  0x35   : > { %6260 = vst [vmem:[#allocation55_spill] sm:$0xff] %v3006_v31  ;;  %6261 = vst [vmem:[#allocation56_spill] sm:$0xff] %v3010_v30  ;;  %v3100_v30 = vld [vmem:[%s2763_s5 + $0x118] sm:$0x3] }
  0x36   : > { %6262 = vst [vmem:[#allocation57_spill] sm:$0xff] %v3014_v25  ;;  %6263 = vst [vmem:[#allocation58_spill] sm:$0xff] %v3025_v24  ;;  %v3097_v25 = vmul.f32 %v2758_v8, %v2959_v0  ;;  %v3122_v0 = vmul.f32 %v2758_v8, %v2981_v5  ;;  %v3143_v24 = vmul.f32 %v2758_v8, %v2984_v17 }
  0x37   : > { %6264 = vst [vmem:[#allocation59_spill] sm:$0xff] %v3028_v19  ;;  %6265 = vst [vmem:[#allocation60_spill] sm:$0xff] %v3031_v18  ;;  %v3147_v5 = vmul.f32 %v2758_v8, %v3050_v12  ;;  %v3166_v17 = vmul.f32 %v2758_v8, %v3006_v31  ;;  %v3186_v31 = vmul.f32 %v2758_v8, %v3053_v11 }
  0x38   : > { %6266 = vst [vmem:[#allocation61_spill] sm:$0xff] %v3035_v14  ;;  %6267 = vst [vmem:[#allocation62_spill] sm:$0xff] %v3039_v50  ;;  %v3075_v50 = vld [vmem:[%s2763_s5 + $0x100] sm:$0x3]  ;;  %v3078_v14 = vld [vmem:[%s2763_s5 + $0x138] sm:$0xff] }
  0x39   : > { %6268 = vst [vmem:[#allocation63_spill] sm:$0xff] %v3050_v12  ;;  %6269 = vst [vmem:[#allocation64_spill] sm:$0xff] %v3053_v11  ;;  %v3170_v12 = vmul.f32 %v2758_v8, %v3075_v50 }
  0x3a   : > { %6270 = vst [vmem:[#allocation65_spill] sm:$0xff] %v3056_v10  ;;  %6271 = vst [vmem:[#allocation66_spill] sm:$0xff] %v3060_v15  ;;  %v3081_v15 = vld [vmem:[%s2763_s5 + $0x140] sm:$0xff] }
  0x3b   : > { %6272 = vst [vmem:[#allocation67_spill] sm:$0xff] %v3064_v62  ;;  %6273 = vst [vmem:[#allocation68_spill] sm:$0xff] %v3075_v50  ;;  %v3085_v62 = vmul.f32 %v2755_v7, %v3053_v11  ;;  %v3190_v50 = vmul.f32 %v2758_v8, %v3056_v10  ;;  %v3209_v11 = vmul.f32 %v2758_v8, %v3150_v58 }
  0x3c   : > { %6274 = vst [vmem:[#allocation69_spill] sm:$0xff] %v3078_v14  ;;  %6275 = vst [vmem:[#allocation70_spill] sm:$0xff] %v3081_v15  ;;  %v3213_v10 = vmul.f32 %v2758_v8, %v3103_v42 }
  0x3d   : > { %6276 = vst [vmem:[#allocation71_spill] sm:$0xff] %v3085_v62  ;;  %6277 = vst [vmem:[#allocation72_spill] sm:$0xff] %v3089_v57  ;;  %v3110_v62 = vmul.f32 %v2755_v7, %v3078_v14  ;;  %v3114_v57 = vmul.f32 %v2755_v7, %v3081_v15 }
  0x3e   : > { %6278 = vst [vmem:[#allocation73_spill] sm:$0xff] %v3100_v30  ;;  %6279 = vst [vmem:[#allocation74_spill] sm:$0xff] %v3103_v42 }
  0x3f   : > { %6280 = vst [vmem:[#allocation75_spill] sm:$0xff] %v3106_v16  ;;  %6281 = vst [vmem:[#allocation76_spill] sm:$0xff] %v3110_v62  ;;  %v3135_v62 = vmul.f32 %v2755_v7, %v3103_v42  ;;  %v416_v42 = vrot.slane %v2874_v40, 1  ;;  %v422_v40 = vrot.slane %v2924_v54, 1  ;;  %v429_v54 = vrot.slane %v2971_v6, 1 }
  0x40   : > { %6282 = vst [vmem:[#allocation77_spill] sm:$0xff] %v3114_v57  ;;  %6283 = vst [vmem:[#allocation78_spill] sm:$0xff] %v3125_v2  ;;  %v3139_v57 = vmul.f32 %v2755_v7, %v3106_v16  ;;  %v441_v6 = vrot.slane %v3047_v13, 1  ;;  %v451_v13 = vrot.slane %v3122_v0, 1 }
  0x41   : > { %6284 = vst [vmem:[#allocation79_spill] sm:$0xff] %v3128_v1  ;;  %6285 = vst [vmem:[#allocation80_spill] sm:$0xff] %v3131_v59 }
  0x42   : > { %6286 = vst [vmem:[#allocation81_spill] sm:$0xff] %v3135_v62  ;;  %6287 = vst [vmem:[#allocation82_spill] sm:$0xff] %v3139_v57  ;;  %v3158_v62 = vmul.f32 %v2755_v7, %v3131_v59  ;;  %v3162_v57 = vmul.f32 %v2758_v8, %v3003_v36  ;;  %v3178_v7 = vmul.f32 %v2758_v8, %v3031_v18 }
  0x43   : > { %6288 = vst [vmem:[#allocation83_spill] sm:$0xff] %v3150_v58  ;;  %6289 = vst [vmem:[#allocation84_spill] sm:$0xff] %v3154_v53  ;;  %v3174_v53 = vmul.f32 %v2758_v8, %v3028_v19  ;;  %v3182_v36 = vmul.f32 %v2758_v8, %v3100_v30  ;;  %v3194_v19 = vmul.f32 %v2758_v8, %v3125_v2  ;;  %v412_v58 = vrot.slane %v2852_v34, 1 }
  0x44   : > { %6290 = vst [vmem:[#allocation85_spill] sm:$0xff] %v3158_v62  ;;  %v3198_v18 = vmul.f32 %v2758_v8, %v3078_v14  ;;  %v3201_v62 = vld [vmem:[%s2763_s5 + $0x160] sm:$0x3]  ;;  %v3205_v30 = vmul.f32 %v2758_v8, %v3081_v15  ;;  %v3217_v2 = vmul.f32 %v2758_v8, %v3106_v16  ;;  %v3220_v14 = vld [vmem:[%s2763_s5 + $0x178] sm:$0x3]  ;;  %v409_v15 = vrot.slane %v2830_v28, 1 }
  0x45   : > { %6291 = vst [vmem:[#allocation86_spill] sm:$0xff] %v3201_v62  ;;  %6292 = vst [vmem:[#allocation87_spill] sm:$0xff] %v3220_v14  ;;  %v3232_v16 = vmul.f32 %v2758_v8, %v3201_v62  ;;  %v419_v28 = vrot.slane %v2899_v47, 1  ;;  %v3245_v29 = vmul.f32 %v2758_v8, %v3220_v14  ;;  %v3248_v34 = vsel %vm405_vm0, %v406_v52, %v407_v46 }
  0x46   : > { %v3253_v41 = vsel %vm405_vm0, %v407_v46, %v409_v15  ;;  %v3256_v1 = vsel %vm405_vm0, %v411_v45, %v412_v58  ;;  %v3259_v59 = vsel %vm405_vm0, %v412_v58, %v414_v39  ;;  %v424_v47 = vrot.slane %v2928_v55, 1 }
  0x47   : > { %v3263_v8 = vsel %vm405_vm0, %v416_v42, %v417_v38  ;;  %v426_v52 = vrot.slane %v2946_v60, 1  ;;  %v3269_v15 = vsel %vm405_vm0, %v417_v38, %v419_v28  ;;  %v431_v45 = vrot.slane %v2975_v4, 1 }
  0x48   : > { %v432_v46 = vrot.slane %v2996_v43, 1  ;;  %v434_v39 = vrot.slane %v3000_v37, 1  ;;  %v423_v55 = vsel %vm405_vm0, %v421_v35, %v422_v40  ;;  %v436_v42 = vrot.slane %v3018_v44, 1 }
  0x49   : > { %v437_v58 = vrot.slane %v3022_v49, 1  ;;  %v439_v60 = vrot.slane %v3043_v51, 1  ;;  %v425_v61 = vsel %vm405_vm0, %v422_v40, %v424_v47  ;;  %v442_v38 = vrot.slane %v3068_v56, 1 }
  0x4a   : > { %v444_v4 = vrot.slane %v3072_v9, 1  ;;  %v428_v43 = vsel %vm405_vm0, %v426_v52, %v427_v48  ;;  %v430_v37 = vsel %vm405_vm0, %v427_v48, %v429_v54  ;;  %v446_v28 = vrot.slane %v3093_v3, 1 }
  0x4b   : > { %v447_v44 = vrot.slane %v3097_v25, 1  ;;  %v433_v49 = vsel %vm405_vm0, %v431_v45, %v432_v46  ;;  %v435_v51 = vsel %vm405_vm0, %v432_v46, %v434_v39  ;;  %v449_v35 = vrot.slane %v3118_v63, 1 }
  0x4c   : > { %v438_v56 = vsel %vm405_vm0, %v436_v42, %v437_v58  ;;  %v440_v9 = vsel %vm405_vm0, %v437_v58, %v439_v60  ;;  %v452_v40 = vrot.slane %v3143_v24, 1  ;;  %v454_v47 = vrot.slane %v3147_v5, 1 }
  0x4d   : > { %v443_v3 = vsel %vm405_vm0, %v441_v6, %v442_v38  ;;  %v445_v25 = vsel %vm405_vm0, %v442_v38, %v444_v4  ;;  %v456_v52 = vrot.slane %v3162_v57, 1  ;;  %v457_v48 = vrot.slane %v3166_v17, 1 }
  0x4e   : > { %v448_v63 = vsel %vm405_vm0, %v446_v28, %v447_v44  ;;  %v450_v0 = vsel %vm405_vm0, %v447_v44, %v449_v35  ;;  %v459_v54 = vrot.slane %v3170_v12, 1  ;;  %v461_v45 = vrot.slane %v3174_v53, 1 }
  0x4f   : > { %v453_v24 = vsel %vm405_vm0, %v451_v13, %v452_v40  ;;  %v455_v5 = vsel %vm405_vm0, %v452_v40, %v454_v47  ;;  %v462_v46 = vrot.slane %v3178_v7, 1  ;;  %v464_v39 = vrot.slane %v3182_v36, 1  ;;  %v6297_v40 = vld [vmem:[#allocation29_spill] sm:$0xff] }
  0x50   : > { %v466_v57 = vrot.slane %v3186_v31, 1  ;;  %v467_v17 = vrot.slane %v3190_v50, 1  ;;  %v469_v42 = vrot.slane %v3194_v19, 1  ;;  %v471_v58 = vrot.slane %v3198_v18, 1 }
  0x51   : > { %v458_v12 = vsel %vm405_vm0, %v456_v52, %v457_v48  ;;  %v472_v53 = vrot.slane %v3205_v30, 1  ;;  %v474_v60 = vrot.slane %v3209_v11, 1  ;;  %v476_v6 = vrot.slane %v3213_v10, 1  ;;  %v6301_v52 = vld [vmem:[#allocation34_spill] sm:$0xff] }
  0x52   : > { %v460_v7 = vsel %vm405_vm0, %v457_v48, %v459_v54  ;;  %v477_v36 = vrot.slane %v3217_v2, 1  ;;  %v479_v31 = vrot.slane %v3232_v16, 1  ;;  %v481_v50 = vrot.slane %v3236_v22, 1 }
  0x53   : > { %v463_v19 = vsel %vm405_vm0, %v461_v45, %v462_v46  ;;  %v465_v18 = vsel %vm405_vm0, %v462_v46, %v464_v39  ;;  %v482_v38 = vrot.slane %v3240_v23, 1  ;;  %v484_v30 = vrot.slane %v3245_v29, 1 }
  0x54   : > { %v468_v11 = vsel %vm405_vm0, %v466_v57, %v467_v17  ;;  %v470_v10 = vsel %vm405_vm0, %v467_v17, %v469_v42  ;;  %v473_v4 = vsel %vm405_vm0, %v471_v58, %v472_v53  ;;  %v475_v2 = vsel %vm405_vm0, %v472_v53, %v474_v60 }
  0x55   : > { %v478_v16 = vsel %vm405_vm0, %v476_v6, %v477_v36  ;;  %v480_v22 = vsel %vm405_vm0, %v477_v36, %v479_v31  ;;  %v3330_v28 = vadd.f32 %v3248_v34, %v2800_v20  ;;  %v3334_v23 = vadd.f32 %v3253_v41, %v2804_v21  ;;  %v6295_v34 = vld [vmem:[#allocation28_spill] sm:$0xff] }
  0x56   : > { %v483_v29 = vsel %vm405_vm0, %v481_v50, %v482_v38  ;;  %v485_v44 = vsel %vm405_vm0, %v482_v38, %v484_v30  ;;  %v3340_v35 = vadd.f32 %v3256_v1, %v2822_v26  ;;  %v3344_v13 = vadd.f32 %v3259_v59, %v2826_v27  ;;  %v6299_v26 = vld [vmem:[#allocation33_spill] sm:$0xff]  ;;  %v6303_v59 = vld [vmem:[#allocation38_spill] sm:$0xff] }
  0x57   : > { %v3348_v20 = vadd.f32 %v3263_v8, %v2844_v32  ;;  %v3352_v21 = vadd.f32 %v3269_v15, %v2848_v33  ;;  %v3355_v41 = vadd.f32 %v423_v55, %v6295_v34  ;;  %v3358_v47 = vadd.f32 %v425_v61, %v6297_v40  ;;  %v6305_v32 = vld [vmem:[#allocation39_spill] sm:$0xff]  ;;  %v6307_v33 = vld [vmem:[#allocation42_spill] sm:$0xff] }
  0x58   : > { %v3361_v1 = vadd.f32 %v428_v43, %v6299_v26  ;;  %v3364_v27 = vadd.f32 %v430_v37, %v6301_v52  ;;  %v3367_v48 = vadd.f32 %v433_v49, %v6303_v59  ;;  %v3370_v8 = vadd.f32 %v435_v51, %v6305_v32  ;;  %v6309_v55 = vld [vmem:[#allocation43_spill] sm:$0xff]  ;;  %v6313_v43 = vld [vmem:[#allocation48_spill] sm:$0xff]  ;;  %v6317_v49 = vld [vmem:[#allocation53_spill] sm:$0xff] }
  0x59   : > { %6293 = vst [vmem:[#allocation88_spill] sm:$0xff] %v3348_v20  ;;  %6294 = vst [vmem:[#allocation89_spill] sm:$0xff] %v3352_v21  ;;  %v3373_v15 = vadd.f32 %v438_v56, %v6307_v33  ;;  %v3376_v54 = vadd.f32 %v440_v9, %v6309_v55  ;;  %v6311_v61 = vld [vmem:[#allocation47_spill] sm:$0xff]  ;;  %v3382_v46 = vadd.f32 %v445_v25, %v6313_v43  ;;  %v6315_v37 = vld [vmem:[#allocation52_spill] sm:$0xff] }
  0x5a   : > { %6296 = vst [vmem:[#allocation28_spill] sm:$0xff] %v3355_v41  ;;  %6298 = vst [vmem:[#allocation29_spill] sm:$0xff] %v3358_v47  ;;  %v3379_v45 = vadd.f32 %v443_v3, %v6311_v61  ;;  %v3385_v39 = vadd.f32 %v448_v63, %v6315_v37  ;;  %v3388_v57 = vadd.f32 %v450_v0, %v6317_v49  ;;  %v6319_v51 = vld [vmem:[#allocation56_spill] sm:$0xff]  ;;  %v6321_v56 = vld [vmem:[#allocation57_spill] sm:$0xff] }
  0x5b   : > { %6300 = vst [vmem:[#allocation33_spill] sm:$0xff] %v3361_v1  ;;  %6302 = vst [vmem:[#allocation34_spill] sm:$0xff] %v3364_v27  ;;  %v3391_v17 = vadd.f32 %v453_v24, %v6319_v51  ;;  %v3394_v42 = vadd.f32 %v455_v5, %v6321_v56  ;;  %v6323_v9 = vld [vmem:[#allocation61_spill] sm:$0xff]  ;;  %v6325_v3 = vld [vmem:[#allocation62_spill] sm:$0xff] }
  0x5c   : > { %6304 = vst [vmem:[#allocation38_spill] sm:$0xff] %v3367_v48  ;;  %6306 = vst [vmem:[#allocation39_spill] sm:$0xff] %v3370_v8  ;;  %v3397_v58 = vadd.f32 %v458_v12, %v6323_v9  ;;  %v3400_v53 = vadd.f32 %v460_v7, %v6325_v3  ;;  %v6327_v25 = vld [vmem:[#allocation66_spill] sm:$0xff]  ;;  %v6329_v63 = vld [vmem:[#allocation67_spill] sm:$0xff] }
  0x5d   : > { %6308 = vst [vmem:[#allocation42_spill] sm:$0xff] %v3373_v15  ;;  %6310 = vst [vmem:[#allocation43_spill] sm:$0xff] %v3376_v54  ;;  %v3403_v60 = vadd.f32 %v463_v19, %v6327_v25  ;;  %v3406_v6 = vadd.f32 %v465_v18, %v6329_v63  ;;  %v6331_v0 = vld [vmem:[#allocation71_spill] sm:$0xff]  ;;  %v6333_v24 = vld [vmem:[#allocation72_spill] sm:$0xff] }
  0x5e   : > { %6312 = vst [vmem:[#allocation47_spill] sm:$0xff] %v3379_v45  ;;  %6314 = vst [vmem:[#allocation48_spill] sm:$0xff] %v3382_v46  ;;  %v3409_v36 = vadd.f32 %v468_v11, %v6331_v0  ;;  %v3412_v31 = vadd.f32 %v470_v10, %v6333_v24  ;;  %v6335_v5 = vld [vmem:[#allocation76_spill] sm:$0xff]  ;;  %v6337_v12 = vld [vmem:[#allocation77_spill] sm:$0xff] }
  0x5f   : > { %6316 = vst [vmem:[#allocation52_spill] sm:$0xff] %v3385_v39  ;;  %6318 = vst [vmem:[#allocation53_spill] sm:$0xff] %v3388_v57  ;;  %v3415_v50 = vadd.f32 %v473_v4, %v6335_v5  ;;  %v3418_v38 = vadd.f32 %v475_v2, %v6337_v12  ;;  %v6339_v7 = vld [vmem:[#allocation81_spill] sm:$0xff]  ;;  %v6341_v19 = vld [vmem:[#allocation82_spill] sm:$0xff] }
  0x60   : > { %6320 = vst [vmem:[#allocation56_spill] sm:$0xff] %v3391_v17  ;;  %6322 = vst [vmem:[#allocation57_spill] sm:$0xff] %v3394_v42  ;;  %v3421_v30 = vadd.f32 %v478_v16, %v6339_v7  ;;  %v3424_v34 = vadd.f32 %v480_v22, %v6341_v19  ;;  %v6343_v18 = vld [vmem:[#allocation84_spill] sm:$0xff]  ;;  %v6345_v11 = vld [vmem:[#allocation85_spill] sm:$0xff] }
  0x61   : > { %6324 = vst [vmem:[#allocation61_spill] sm:$0xff] %v3397_v58  ;;  %6326 = vst [vmem:[#allocation62_spill] sm:$0xff] %v3400_v53  ;;  %v3427_v40 = vadd.f32 %v483_v29, %v6343_v18  ;;  %v3430_v26 = vadd.f32 %v485_v44, %v6345_v11  ;;  %v6347_v10 = vld [vmem:[#allocation11_spill] sm:$0xff]  ;;  %v6348_v52 = vld [vmem:[#allocation17_spill] sm:$0xff] }
  0x62   : > { %6328 = vst [vmem:[#allocation66_spill] sm:$0xff] %v3403_v60  ;;  %6330 = vst [vmem:[#allocation67_spill] sm:$0xff] %v3406_v6  ;;  %v554_v59 = vmul.f32 %v6348_v52, %v6347_v10  ;;  %v6349_v4 = vld [vmem:[#allocation12_spill] sm:$0xff]  ;;  %v6350_v2 = vld [vmem:[#allocation13_spill] sm:$0xff] }
  0x63   : > { %6332 = vst [vmem:[#allocation71_spill] sm:$0xff] %v3409_v36  ;;  %6334 = vst [vmem:[#allocation72_spill] sm:$0xff] %v3412_v31  ;;  %v555_v32 = vmul.f32 %v6348_v52, %v6349_v4  ;;  %v556_v33 = vmul.f32 %v6348_v52, %v6350_v2  ;;  %v6351_v16 = vld [vmem:[#allocation14_spill] sm:$0xff]  ;;  %v6352_v22 = vld [vmem:[#allocation15_spill] sm:$0xff] }
  0x64   : > { %6336 = vst [vmem:[#allocation76_spill] sm:$0xff] %v3415_v50  ;;  %6338 = vst [vmem:[#allocation77_spill] sm:$0xff] %v3418_v38  ;;  %v557_v55 = vmul.f32 %v6348_v52, %v6351_v16  ;;  %v558_v61 = vmul.f32 %v6348_v52, %v6352_v22  ;;  %v6353_v29 = vld [vmem:[#allocation16_spill] sm:$0xff]  ;;  %v6355_v49 = vld [vmem:[#allocation21_spill] sm:$0xff]  ;;  %v651_v8 = vrot.slane %v554_v59, 2 }
  0x65   : > { %6340 = vst [vmem:[#allocation81_spill] sm:$0xff] %v3421_v30  ;;  %6342 = vst [vmem:[#allocation82_spill] sm:$0xff] %v3424_v34  ;;  %v559_v43 = vmul.f32 %v6348_v52, %v6353_v29  ;;  %v6354_v44 = vld [vmem:[#allocation20_spill] sm:$0xff]  ;;  %v3448_v51 = vmul.f32 %v6348_v52, %v6355_v49  ;;  %v6356_v56 = vld [vmem:[#allocation22_spill] sm:$0xff]  ;;  %v652_v48 = vrot.slane %v555_v32, 2  ;;  %v3610_v32 = vmul.f32 %v6348_v52, %v3220_v14 }
  0x66   : > { %6344 = vst [vmem:[#allocation84_spill] sm:$0xff] %v3427_v40  ;;  %6346 = vst [vmem:[#allocation85_spill] sm:$0xff] %v3430_v26  ;;  %v560_v37 = vmul.f32 %v6348_v52, %v6354_v44  ;;  %v3452_v9 = vmul.f32 %v6348_v52, %v6356_v56  ;;  %v6357_v3 = vld [vmem:[#allocation23_spill] sm:$0xff]  ;;  %v6358_v63 = vld [vmem:[#allocation24_spill] sm:$0xff]  ;;  %v656_v27 = vrot.slane %v557_v55, 2  ;;  %v657_v1 = vrot.slane %v558_v61, 2 }
  0x67   : > { %v3456_v25 = vmul.f32 %v6348_v52, %v6357_v3  ;;  %v3460_v0 = vmul.f32 %v6348_v52, %v6358_v63  ;;  %v6359_v24 = vld [vmem:[#allocation25_spill] sm:$0xff]  ;;  %v6360_v12 = vld [vmem:[#allocation26_spill] sm:$0xff]  ;;  %v6361_v19 = vld [vmem:[#allocation27_spill] sm:$0xff]  ;;  %v659_v47 = vrot.slane %v559_v43, 2  ;;  %v662_v41 = vrot.slane %v3448_v51, 2 }
  0x68   : > { %v3464_v5 = vmul.f32 %v6348_v52, %v6359_v24  ;;  %v3468_v7 = vmul.f32 %v6348_v52, %v6360_v12  ;;  %v3472_v18 = vmul.f32 %v6348_v52, %v6361_v19  ;;  %v6362_v11 = vld [vmem:[#allocation30_spill] sm:$0xff]  ;;  %v6363_v4 = vld [vmem:[#allocation31_spill] sm:$0xff]  ;;  %v6364_v56 = vld [vmem:[#allocation32_spill] sm:$0xff]  ;;  %v664_v59 = vrot.slane %v3452_v9, 2 }
  0x69   : > { %v3476_v10 = vmul.f32 %v6348_v52, %v6362_v11  ;;  %v3480_v2 = vmul.f32 %v6348_v52, %v6363_v4  ;;  %v3484_v24 = vmul.f32 %v6348_v52, %v6364_v56  ;;  %v6365_v29 = vld [vmem:[#allocation35_spill] sm:$0xff]  ;;  %v6366_v63 = vld [vmem:[#allocation36_spill] sm:$0xff]  ;;  %v6367_v3 = vld [vmem:[#allocation37_spill] sm:$0xff]  ;;  %v666_v55 = vrot.slane %v3456_v25, 2 }
  0x6a   : > { %v3488_v12 = vmul.f32 %v6348_v52, %v6365_v29  ;;  %v3492_v19 = vmul.f32 %v6348_v52, %v6366_v63  ;;  %v3496_v11 = vmul.f32 %v6348_v52, %v6367_v3  ;;  %v6368_v49 = vld [vmem:[#allocation44_spill] sm:$0xff]  ;;  %v6370_v22 = vld [vmem:[#allocation41_spill] sm:$0xff]  ;;  %v6373_v40 = vld [vmem:[#allocation46_spill] sm:$0xff]  ;;  %v667_v61 = vrot.slane %v3460_v0, 2 }
  0x6b   : > { %v3500_v4 = vmul.f32 %v6348_v52, %v6368_v49  ;;  %v6369_v44 = vld [vmem:[#allocation40_spill] sm:$0xff]  ;;  %v3508_v29 = vmul.f32 %v6348_v52, %v6370_v22  ;;  %v6371_v16 = vld [vmem:[#allocation49_spill] sm:$0xff]  ;;  %v3520_v49 = vmul.f32 %v6348_v52, %v6373_v40  ;;  %v6374_v34 = vld [vmem:[#allocation58_spill] sm:$0xff]  ;;  %v3624_v51 = vsel %vm650_vm1, %v657_v1, %v659_v47 }
  0x6c   : > { %v3504_v56 = vmul.f32 %v6348_v52, %v6369_v44  ;;  %v3512_v63 = vmul.f32 %v6348_v52, %v6371_v16  ;;  %v6372_v26 = vld [vmem:[#allocation45_spill] sm:$0xff]  ;;  %v3524_v44 = vmul.f32 %v6348_v52, %v6374_v34  ;;  %v6375_v30 = vld [vmem:[#allocation50_spill] sm:$0xff]  ;;  %v6376_v38 = vld [vmem:[#allocation51_spill] sm:$0xff]  ;;  %v669_v9 = vrot.slane %v3464_v5, 2 }
  0x6d   : > { %v3516_v3 = vmul.f32 %v6348_v52, %v6372_v26  ;;  %v3528_v22 = vmul.f32 %v6348_v52, %v6375_v30  ;;  %v3532_v16 = vmul.f32 %v6348_v52, %v6376_v38  ;;  %v6377_v50 = vld [vmem:[#allocation63_spill] sm:$0xff]  ;;  %v6378_v31 = vld [vmem:[#allocation54_spill] sm:$0xff]  ;;  %v6380_v6 = vld [vmem:[#allocation68_spill] sm:$0xff]  ;;  %v672_v25 = vrot.slane %v3472_v18, 2 }
  0x6e   : > { %v3536_v26 = vmul.f32 %v6348_v52, %v6377_v50  ;;  %v3540_v40 = vmul.f32 %v6348_v52, %v6378_v31  ;;  %v6379_v36 = vld [vmem:[#allocation55_spill] sm:$0xff]  ;;  %v3548_v30 = vmul.f32 %v6348_v52, %v6380_v6  ;;  %v6382_v53 = vld [vmem:[#allocation60_spill] sm:$0xff]  ;;  %v6383_v58 = vld [vmem:[#allocation73_spill] sm:$0xff]  ;;  %v674_v0 = vrot.slane %v3476_v10, 2 }
  0x6f   : > { %v3544_v34 = vmul.f32 %v6348_v52, %v6379_v36  ;;  %v6381_v60 = vld [vmem:[#allocation59_spill] sm:$0xff]  ;;  %v3556_v50 = vmul.f32 %v6348_v52, %v6382_v53  ;;  %v3560_v31 = vmul.f32 %v6348_v52, %v6383_v58  ;;  %v6384_v42 = vld [vmem:[#allocation64_spill] sm:$0xff]  ;;  %v6385_v17 = vld [vmem:[#allocation65_spill] sm:$0xff]  ;;  %v679_v47 = vrot.slane %v3488_v12, 2 }
  0x70   : > { %v3552_v38 = vmul.f32 %v6348_v52, %v6381_v60  ;;  %v3564_v36 = vmul.f32 %v6348_v52, %v6384_v42  ;;  %v3568_v6 = vmul.f32 %v6348_v52, %v6385_v17  ;;  %v6386_v57 = vld [vmem:[#allocation78_spill] sm:$0xff]  ;;  %v6387_v39 = vld [vmem:[#allocation69_spill] sm:$0xff]  ;;  %v6389_v45 = vld [vmem:[#allocation83_spill] sm:$0xff]  ;;  %v682_v5 = vrot.slane %v3496_v11, 2 }
  0x71   : > { %v3572_v60 = vmul.f32 %v6348_v52, %v6386_v57  ;;  %v3576_v53 = vmul.f32 %v6348_v52, %v6387_v39  ;;  %v6388_v46 = vld [vmem:[#allocation70_spill] sm:$0xff]  ;;  %v3584_v42 = vmul.f32 %v6348_v52, %v6389_v45  ;;  %v6391_v15 = vld [vmem:[#allocation75_spill] sm:$0xff]  ;;  %v654_v39 = vrot.slane %v556_v33, 2  ;;  %v6393_v20 = vld [vmem:[#allocation80_spill] sm:$0xff] }
  0x72   : > { %v3580_v58 = vmul.f32 %v6348_v52, %v6388_v46  ;;  %v6390_v54 = vld [vmem:[#allocation74_spill] sm:$0xff]  ;;  %v3592_v57 = vmul.f32 %v6348_v52, %v6391_v15  ;;  %v661_v46 = vrot.slane %v560_v37, 2  ;;  %v3597_v45 = vmul.f32 %v6348_v52, %v3201_v62  ;;  %v6392_v21 = vld [vmem:[#allocation79_spill] sm:$0xff]  ;;  %v6445_v62 = vld [vmem:[#allocation45_spill] sm:$0xff] }
  0x73   : > { %v3588_v17 = vmul.f32 %v6348_v52, %v6390_v54  ;;  %v3601_v54 = vmul.f32 %v6348_v52, %v6392_v21  ;;  %v3605_v15 = vmul.f32 %v6348_v52, %v6393_v20  ;;  %v3613_v33 = vsel %vm650_vm1, %v651_v8, %v652_v48 }
  0x74   : > { %v3618_v43 = vsel %vm650_vm1, %v652_v48, %v654_v39  ;;  %v3621_v37 = vsel %vm650_vm1, %v656_v27, %v657_v1  ;;  %v3628_v52 = vsel %vm650_vm1, %v661_v46, %v662_v41  ;;  %v671_v8 = vrot.slane %v3468_v7, 2 }
  0x75   : > { %v3634_v48 = vsel %vm650_vm1, %v662_v41, %v664_v59  ;;  %v676_v27 = vrot.slane %v3480_v2, 2  ;;  %v677_v39 = vrot.slane %v3484_v24, 2  ;;  %v668_v1 = vsel %vm650_vm1, %v666_v55, %v667_v61 }
  0x76   : > { %v681_v46 = vrot.slane %v3492_v19, 2  ;;  %v684_v7 = vrot.slane %v3500_v4, 2  ;;  %v670_v18 = vsel %vm650_vm1, %v667_v61, %v669_v9  ;;  %v686_v10 = vrot.slane %v3504_v56, 2 }
  0x77   : > { %v687_v41 = vrot.slane %v3508_v29, 2  ;;  %v689_v2 = vrot.slane %v3512_v63, 2  ;;  %v673_v24 = vsel %vm650_vm1, %v671_v8, %v672_v25  ;;  %v675_v12 = vsel %vm650_vm1, %v672_v25, %v674_v0 }
  0x78   : > { %v691_v59 = vrot.slane %v3516_v3, 2  ;;  %v692_v19 = vrot.slane %v3520_v49, 2  ;;  %v678_v11 = vsel %vm650_vm1, %v676_v27, %v677_v39  ;;  %v680_v4 = vsel %vm650_vm1, %v677_v39, %v679_v47 }
  0x79   : > { %v694_v55 = vrot.slane %v3524_v44, 2  ;;  %v696_v56 = vrot.slane %v3528_v22, 2  ;;  %v683_v29 = vsel %vm650_vm1, %v681_v46, %v682_v5  ;;  %v685_v63 = vsel %vm650_vm1, %v682_v5, %v684_v7 }
  0x7a   : > { %v697_v61 = vrot.slane %v3532_v16, 2  ;;  %v699_v9 = vrot.slane %v3536_v26, 2  ;;  %v688_v3 = vsel %vm650_vm1, %v686_v10, %v687_v41  ;;  %v690_v49 = vsel %vm650_vm1, %v687_v41, %v689_v2 }
  0x7b   : > { %v701_v8 = vrot.slane %v3540_v40, 2  ;;  %v702_v25 = vrot.slane %v3544_v34, 2  ;;  %v693_v44 = vsel %vm650_vm1, %v691_v59, %v692_v19  ;;  %v695_v22 = vsel %vm650_vm1, %v692_v19, %v694_v55 }
  0x7c   : > { %v704_v0 = vrot.slane %v3548_v30, 2  ;;  %v706_v27 = vrot.slane %v3552_v38, 2  ;;  %v698_v16 = vsel %vm650_vm1, %v696_v56, %v697_v61  ;;  %v700_v26 = vsel %vm650_vm1, %v697_v61, %v699_v9  ;;  %v6394_v61 = vld [vmem:[#allocation88_spill] sm:$0xff] }
  0x7d   : > { %v707_v39 = vrot.slane %v3556_v50, 2  ;;  %v709_v47 = vrot.slane %v3560_v31, 2  ;;  %v711_v40 = vrot.slane %v3564_v36, 2  ;;  %v712_v34 = vrot.slane %v3568_v6, 2 }
  0x7e   : > { %v714_v46 = vrot.slane %v3572_v60, 2  ;;  %v716_v5 = vrot.slane %v3576_v53, 2  ;;  %v703_v30 = vsel %vm650_vm1, %v701_v8, %v702_v25  ;;  %v717_v38 = vrot.slane %v3580_v58, 2  ;;  %v6397_v8 = vld [vmem:[#allocation29_spill] sm:$0xff] }
  0x7f   : > { %v719_v7 = vrot.slane %v3584_v42, 2  ;;  %v721_v10 = vrot.slane %v3588_v17, 2  ;;  %v705_v50 = vsel %vm650_vm1, %v702_v25, %v704_v0  ;;  %v722_v31 = vrot.slane %v3592_v57, 2  ;;  %v6399_v0 = vld [vmem:[#allocation34_spill] sm:$0xff] }
  0x80   : > { %v724_v36 = vrot.slane %v3597_v45, 2  ;;  %v726_v6 = vrot.slane %v3601_v54, 2  ;;  %v708_v60 = vsel %vm650_vm1, %v706_v27, %v707_v39  ;;  %v710_v53 = vsel %vm650_vm1, %v707_v39, %v709_v47 }
  0x81   : > { %v727_v41 = vrot.slane %v3605_v15, 2  ;;  %v729_v58 = vrot.slane %v3610_v32, 2  ;;  %v713_v42 = vsel %vm650_vm1, %v711_v40, %v712_v34  ;;  %v715_v17 = vsel %vm650_vm1, %v712_v34, %v714_v46 }
  0x82   : > { %v718_v2 = vsel %vm650_vm1, %v716_v5, %v717_v38  ;;  %v720_v57 = vsel %vm650_vm1, %v717_v38, %v719_v7  ;;  %v723_v45 = vsel %vm650_vm1, %v721_v10, %v722_v31  ;;  %v725_v54 = vsel %vm650_vm1, %v722_v31, %v724_v36 }
  0x83   : > { %v3695_v59 = vadd.f32 %v3613_v33, %v3330_v28  ;;  %v3699_v15 = vadd.f32 %v3618_v43, %v3334_v23  ;;  %v728_v32 = vsel %vm650_vm1, %v726_v6, %v727_v41  ;;  %v730_v19 = vsel %vm650_vm1, %v727_v41, %v729_v58  ;;  %v6395_v33 = vld [vmem:[#allocation89_spill] sm:$0xff]  ;;  %v6396_v43 = vld [vmem:[#allocation28_spill] sm:$0xff] }
  0x84   : > { %v3705_v55 = vadd.f32 %v3621_v37, %v3340_v35  ;;  %v3709_v56 = vadd.f32 %v3624_v51, %v3344_v13  ;;  %v3713_v28 = vadd.f32 %v3628_v52, %v6394_v61  ;;  %v3717_v23 = vadd.f32 %v3634_v48, %v6395_v33  ;;  %v6398_v35 = vld [vmem:[#allocation33_spill] sm:$0xff]  ;;  %v6400_v51 = vld [vmem:[#allocation38_spill] sm:$0xff]  ;;  %v6401_v52 = vld [vmem:[#allocation39_spill] sm:$0xff] }
  0x85   : > { %v3720_v9 = vadd.f32 %v668_v1, %v6396_v43  ;;  %v3723_v25 = vadd.f32 %v670_v18, %v6397_v8  ;;  %v3726_v37 = vadd.f32 %v673_v24, %v6398_v35  ;;  %v3729_v13 = vadd.f32 %v675_v12, %v6399_v0  ;;  %v6402_v48 = vld [vmem:[#allocation42_spill] sm:$0xff]  ;;  %v6403_v1 = vld [vmem:[#allocation43_spill] sm:$0xff]  ;;  %v6405_v24 = vld [vmem:[#allocation48_spill] sm:$0xff] }
  0x86   : > { %v3732_v27 = vadd.f32 %v678_v11, %v6400_v51  ;;  %v3735_v39 = vadd.f32 %v680_v4, %v6401_v52  ;;  %v3738_v47 = vadd.f32 %v683_v29, %v6402_v48  ;;  %v3741_v40 = vadd.f32 %v685_v63, %v6403_v1  ;;  %v6404_v18 = vld [vmem:[#allocation47_spill] sm:$0xff]  ;;  %v6406_v12 = vld [vmem:[#allocation52_spill] sm:$0xff]  ;;  %v6407_v11 = vld [vmem:[#allocation53_spill] sm:$0xff] }
  0x87   : > { %v3744_v34 = vadd.f32 %v688_v3, %v6404_v18  ;;  %v3747_v46 = vadd.f32 %v690_v49, %v6405_v24  ;;  %v3750_v5 = vadd.f32 %v693_v44, %v6406_v12  ;;  %v3753_v38 = vadd.f32 %v695_v22, %v6407_v11  ;;  %v6408_v4 = vld [vmem:[#allocation56_spill] sm:$0xff]  ;;  %v6409_v29 = vld [vmem:[#allocation57_spill] sm:$0xff]  ;;  %v6411_v3 = vld [vmem:[#allocation62_spill] sm:$0xff] }
  0x88   : > { %v3756_v7 = vadd.f32 %v698_v16, %v6408_v4  ;;  %v3759_v10 = vadd.f32 %v700_v26, %v6409_v29  ;;  %v6410_v63 = vld [vmem:[#allocation61_spill] sm:$0xff]  ;;  %v3765_v36 = vadd.f32 %v705_v50, %v6411_v3  ;;  %v6412_v49 = vld [vmem:[#allocation66_spill] sm:$0xff]  ;;  %v6413_v44 = vld [vmem:[#allocation67_spill] sm:$0xff] }
  0x89   : > { %v3762_v31 = vadd.f32 %v703_v30, %v6410_v63  ;;  %v3768_v6 = vadd.f32 %v708_v60, %v6412_v49  ;;  %v3771_v41 = vadd.f32 %v710_v53, %v6413_v44  ;;  %v6414_v22 = vld [vmem:[#allocation71_spill] sm:$0xff]  ;;  %v6416_v16 = vld [vmem:[#allocation72_spill] sm:$0xff]  ;;  %v6420_v30 = vld [vmem:[#allocation77_spill] sm:$0xff] }
  0x8a   : > { %v3774_v58 = vadd.f32 %v713_v42, %v6414_v22  ;;  %v3777_v61 = vadd.f32 %v715_v17, %v6416_v16  ;;  %v6418_v26 = vld [vmem:[#allocation76_spill] sm:$0xff]  ;;  %v3783_v43 = vadd.f32 %v720_v57, %v6420_v30  ;;  %v6422_v50 = vld [vmem:[#allocation81_spill] sm:$0xff]  ;;  %v6424_v60 = vld [vmem:[#allocation82_spill] sm:$0xff] }
  0x8b   : > { %v3780_v33 = vadd.f32 %v718_v2, %v6418_v26  ;;  %v3786_v8 = vadd.f32 %v723_v45, %v6422_v50  ;;  %v3789_v35 = vadd.f32 %v725_v54, %v6424_v60  ;;  %v6426_v53 = vld [vmem:[#allocation84_spill] sm:$0xff]  ;;  %v6428_v42 = vld [vmem:[#allocation85_spill] sm:$0xff]  ;;  %v6430_v17 = vld [vmem:[#allocation14_spill] sm:$0xff] }
  0x8c   : > { %6415 = vst [vmem:[#allocation11_spill] sm:$0xff] %v3774_v58  ;;  %6417 = vst [vmem:[#allocation17_spill] sm:$0xff] %v3777_v61  ;;  %v3792_v0 = vadd.f32 %v728_v32, %v6426_v53  ;;  %v3795_v51 = vadd.f32 %v730_v19, %v6428_v42  ;;  %v6431_v52 = vld [vmem:[#allocation18_spill] sm:$0xff]  ;;  %v6432_v2 = vld [vmem:[#allocation15_spill] sm:$0xff] }
  0x8d   : > { %6419 = vst [vmem:[#allocation12_spill] sm:$0xff] %v3780_v33  ;;  %6421 = vst [vmem:[#allocation13_spill] sm:$0xff] %v3783_v43  ;;  %v799_v48 = vmul.f32 %v6431_v52, %v6430_v17  ;;  %v800_v57 = vmul.f32 %v6431_v52, %v6432_v2  ;;  %v6433_v1 = vld [vmem:[#allocation20_spill] sm:$0xff]  ;;  %v6434_v18 = vld [vmem:[#allocation21_spill] sm:$0xff] }
  0x8e   : > { %6423 = vst [vmem:[#allocation88_spill] sm:$0xff] %v3786_v8  ;;  %6425 = vst [vmem:[#allocation89_spill] sm:$0xff] %v3789_v35  ;;  %v801_v45 = vmul.f32 %v6431_v52, %v6433_v1  ;;  %v802_v54 = vmul.f32 %v6431_v52, %v6434_v18  ;;  %v6435_v24 = vld [vmem:[#allocation23_spill] sm:$0xff]  ;;  %v6436_v12 = vld [vmem:[#allocation24_spill] sm:$0xff] }
  0x8f   : > { %6427 = vst [vmem:[#allocation28_spill] sm:$0xff] %v3792_v0  ;;  %6429 = vst [vmem:[#allocation29_spill] sm:$0xff] %v3795_v51  ;;  %v803_v32 = vmul.f32 %v6431_v52, %v6435_v24  ;;  %v804_v19 = vmul.f32 %v6431_v52, %v6436_v12  ;;  %v6437_v11 = vld [vmem:[#allocation26_spill] sm:$0xff]  ;;  %v6438_v29 = vld [vmem:[#allocation27_spill] sm:$0xff] }
  0x90   : > { %v805_v4 = vmul.f32 %v6431_v52, %v6437_v11  ;;  %v806_v63 = vmul.f32 %v6431_v52, %v6438_v29  ;;  %v6439_v3 = vld [vmem:[#allocation31_spill] sm:$0xff]  ;;  %v6440_v44 = vld [vmem:[#allocation32_spill] sm:$0xff]  ;;  %v6442_v30 = vld [vmem:[#allocation37_spill] sm:$0xff]  ;;  %v813_v29 = vmul.f32 %v6431_v52, %v6445_v62 }
  0x91   : > { %v807_v49 = vmul.f32 %v6431_v52, %v6439_v3  ;;  %v808_v22 = vmul.f32 %v6431_v52, %v6440_v44  ;;  %v6441_v16 = vld [vmem:[#allocation36_spill] sm:$0xff]  ;;  %v810_v50 = vmul.f32 %v6431_v52, %v6442_v30  ;;  %v6444_v42 = vld [vmem:[#allocation41_spill] sm:$0xff]  ;;  %v6446_v3 = vld [vmem:[#allocation46_spill] sm:$0xff] }
  0x92   : > { %v809_v26 = vmul.f32 %v6431_v52, %v6441_v16  ;;  %v6443_v60 = vld [vmem:[#allocation40_spill] sm:$0xff]  ;;  %v812_v14 = vmul.f32 %v6431_v52, %v6444_v42  ;;  %v814_v11 = vmul.f32 %v6431_v52, %v6446_v3  ;;  %v6448_v12 = vld [vmem:[#allocation50_spill] sm:$0xff]  ;;  %v6449_v24 = vld [vmem:[#allocation51_spill] sm:$0xff] }
  0x93   : > { %v811_v53 = vmul.f32 %v6431_v52, %v6443_v60  ;;  %v3830_v44 = vld [vmem:[%s2763_s5 + $0x180] sm:$0xff]  ;;  %v815_v16 = vmul.f32 %v6431_v52, %v6448_v12  ;;  %v816_v30 = vmul.f32 %v6431_v52, %v6449_v24  ;;  %v6450_v18 = vld [vmem:[#allocation54_spill] sm:$0xff]  ;;  %v6455_v35 = vld [vmem:[#allocation65_spill] sm:$0xff] }
  0x94   : > { %6447 = vst [vmem:[#allocation33_spill] sm:$0xff] %v3830_v44  ;;  %v817_v60 = vmul.f32 %v6431_v52, %v6450_v18  ;;  %v6451_v1 = vld [vmem:[#allocation55_spill] sm:$0xff]  ;;  %v6453_v17 = vld [vmem:[#allocation60_spill] sm:$0xff]  ;;  %v822_v12 = vmul.f32 %v6431_v52, %v6455_v35  ;;  %v6457_v24 = vld [vmem:[#allocation69_spill] sm:$0xff]  ;;  %v828_v35 = vmul.f32 %v6431_v52, %v6393_v20  ;;  %v829_v58 = vmul.f32 %v6431_v52, %v3830_v44 }
  0x95   : > { %v818_v42 = vmul.f32 %v6431_v52, %v6451_v1  ;;  %v6452_v2 = vld [vmem:[#allocation59_spill] sm:$0xff]  ;;  %v820_v3 = vmul.f32 %v6431_v52, %v6453_v17  ;;  %v6454_v51 = vld [vmem:[#allocation64_spill] sm:$0xff]  ;;  %v823_v18 = vmul.f32 %v6431_v52, %v6457_v24  ;;  %v6458_v43 = vld [vmem:[#allocation70_spill] sm:$0xff]  ;;  %v3880_v20 = vadd.f32 %v803_v32, %v3713_v28 }
  0x96   : > { %v819_v62 = vmul.f32 %v6431_v52, %v6452_v2  ;;  %v821_v0 = vmul.f32 %v6431_v52, %v6454_v51  ;;  %v3849_v8 = vld [vmem:[%s2763_s5 + $0x188] sm:$0xff]  ;;  %v824_v1 = vmul.f32 %v6431_v52, %v6458_v43  ;;  %v6459_v33 = vld [vmem:[#allocation74_spill] sm:$0xff]  ;;  %v6460_v61 = vld [vmem:[#allocation75_spill] sm:$0xff]  ;;  %v827_v51 = vmul.f32 %v6431_v52, %v6392_v21 }
  0x97   : > { %6456 = vst [vmem:[#allocation34_spill] sm:$0xff] %v3849_v8  ;;  %v825_v2 = vmul.f32 %v6431_v52, %v6459_v33  ;;  %v826_v17 = vmul.f32 %v6431_v52, %v6460_v61  ;;  %v830_v24 = vmul.f32 %v6431_v52, %v3849_v8  ;;  %v3868_v43 = vadd.f32 %v799_v48, %v3695_v59 }
  0x98   : > { %v3871_v33 = vadd.f32 %v800_v57, %v3699_v15  ;;  %v3874_v61 = vadd.f32 %v801_v45, %v3705_v55  ;;  %v3877_v21 = vadd.f32 %v802_v54, %v3709_v56  ;;  %6461 = vst [vmem:[#allocation38_spill] sm:$0xff] %v3880_v20  ;;  %v3883_v44 = vadd.f32 %v804_v19, %v3717_v23 }
  0x99   : > { %v3886_v52 = vadd.f32 %v805_v4, %v3720_v9  ;;  %v3889_v59 = vadd.f32 %v806_v63, %v3723_v25  ;;  %v3892_v15 = vadd.f32 %v807_v49, %v3726_v37  ;;  %v3895_v55 = vadd.f32 %v808_v22, %v3729_v13  ;;  %v6505_v22 = vld [vmem:[#allocation24_spill] sm:$0xff] }
  0x9a   : > { %6462 = vst [vmem:[#allocation39_spill] sm:$0xff] %v3883_v44  ;;  %v3898_v56 = vadd.f32 %v809_v26, %v3732_v27  ;;  %v3901_v28 = vadd.f32 %v810_v50, %v3735_v39  ;;  %v3904_v23 = vadd.f32 %v811_v53, %v3738_v47  ;;  %v3907_v9 = vadd.f32 %v812_v14, %v3741_v40  ;;  %v6506_v26 = vld [vmem:[#allocation25_spill] sm:$0xff]  ;;  %v6507_v50 = vld [vmem:[#allocation26_spill] sm:$0xff]  ;;  %v6508_v53 = vld [vmem:[#allocation27_spill] sm:$0xff] }
  0x9b   : > { %6463 = vst [vmem:[#allocation42_spill] sm:$0xff] %v3886_v52  ;;  %6464 = vst [vmem:[#allocation43_spill] sm:$0xff] %v3889_v59  ;;  %v3910_v25 = vadd.f32 %v813_v29, %v3744_v34  ;;  %v3913_v37 = vadd.f32 %v814_v11, %v3747_v46  ;;  %v3916_v13 = vadd.f32 %v815_v16, %v3750_v5  ;;  %v6481_v5 = vld [vmem:[#allocation11_spill] sm:$0xff] }
  0x9c   : > { %6465 = vst [vmem:[#allocation47_spill] sm:$0xff] %v3892_v15  ;;  %6466 = vst [vmem:[#allocation48_spill] sm:$0xff] %v3895_v55  ;;  %v3919_v27 = vadd.f32 %v816_v30, %v3753_v38  ;;  %v3922_v39 = vadd.f32 %v817_v60, %v3756_v7  ;;  %v3925_v47 = vadd.f32 %v818_v42, %v3759_v10  ;;  %v6483_v7 = vld [vmem:[#allocation17_spill] sm:$0xff]  ;;  %v6485_v10 = vld [vmem:[#allocation12_spill] sm:$0xff] }
  0x9d   : > { %6467 = vst [vmem:[#allocation52_spill] sm:$0xff] %v3898_v56  ;;  %6468 = vst [vmem:[#allocation53_spill] sm:$0xff] %v3901_v28  ;;  %v3928_v14 = vadd.f32 %v819_v62, %v3762_v31  ;;  %v3931_v40 = vadd.f32 %v820_v3, %v3765_v36  ;;  %v3934_v34 = vadd.f32 %v821_v0, %v3768_v6  ;;  %v6487_v62 = vld [vmem:[#allocation13_spill] sm:$0xff]  ;;  %v6489_v36 = vld [vmem:[#allocation88_spill] sm:$0xff] }
  0x9e   : > { %6469 = vst [vmem:[#allocation56_spill] sm:$0xff] %v3904_v23  ;;  %6470 = vst [vmem:[#allocation57_spill] sm:$0xff] %v3907_v9  ;;  %v3937_v46 = vadd.f32 %v822_v12, %v3771_v41  ;;  %v3940_v38 = vadd.f32 %v823_v18, %v6481_v5  ;;  %v3943_v48 = vadd.f32 %v824_v1, %v6483_v7  ;;  %v6491_v6 = vld [vmem:[#allocation89_spill] sm:$0xff]  ;;  %v6493_v41 = vld [vmem:[#allocation28_spill] sm:$0xff] }
  0x9f   : > { %6471 = vst [vmem:[#allocation61_spill] sm:$0xff] %v3910_v25  ;;  %6472 = vst [vmem:[#allocation62_spill] sm:$0xff] %v3913_v37  ;;  %v3946_v57 = vadd.f32 %v825_v2, %v6485_v10  ;;  %v3949_v31 = vadd.f32 %v826_v17, %v6487_v62  ;;  %v3952_v45 = vadd.f32 %v827_v51, %v6489_v36  ;;  %v6495_v18 = vld [vmem:[#allocation29_spill] sm:$0xff]  ;;  %v6497_v1 = vld [vmem:[#allocation14_spill] sm:$0xff] }
  0xa0   : > { %6473 = vst [vmem:[#allocation66_spill] sm:$0xff] %v3916_v13  ;;  %6474 = vst [vmem:[#allocation67_spill] sm:$0xff] %v3919_v27  ;;  %v3955_v0 = vadd.f32 %v828_v35, %v6491_v6  ;;  %v3958_v54 = vadd.f32 %v829_v58, %v6493_v41  ;;  %v3961_v32 = vadd.f32 %v830_v24, %v6495_v18  ;;  %v6498_v12 = vld [vmem:[#allocation19_spill] sm:$0xff]  ;;  %v6500_v17 = vld [vmem:[#allocation16_spill] sm:$0xff] }
  0xa1   : > { %6475 = vst [vmem:[#allocation71_spill] sm:$0xff] %v3922_v39  ;;  %6476 = vst [vmem:[#allocation72_spill] sm:$0xff] %v3925_v47  ;;  %v867_v19 = vmul.f32 %v6498_v12, %v6497_v1  ;;  %v6499_v2 = vld [vmem:[#allocation15_spill] sm:$0xff]  ;;  %v869_v4 = vmul.f32 %v6498_v12, %v6500_v17  ;;  %v6501_v51 = vld [vmem:[#allocation20_spill] sm:$0xff]  ;;  %v3979_v16 = vmul.f32 %v6498_v12, %v6505_v22 }
  0xa2   : > { %6477 = vst [vmem:[#allocation76_spill] sm:$0xff] %v3928_v14  ;;  %6478 = vst [vmem:[#allocation77_spill] sm:$0xff] %v3931_v40  ;;  %v868_v11 = vmul.f32 %v6498_v12, %v6499_v2  ;;  %v870_v29 = vmul.f32 %v6498_v12, %v6501_v51  ;;  %v6502_v35 = vld [vmem:[#allocation21_spill] sm:$0xff]  ;;  %v6503_v58 = vld [vmem:[#allocation22_spill] sm:$0xff]  ;;  %v3983_v30 = vmul.f32 %v6498_v12, %v6506_v26 }
  0xa3   : > { %6479 = vst [vmem:[#allocation81_spill] sm:$0xff] %v3934_v34  ;;  %6480 = vst [vmem:[#allocation82_spill] sm:$0xff] %v3937_v46  ;;  %v871_v63 = vmul.f32 %v6498_v12, %v6502_v35  ;;  %v872_v3 = vmul.f32 %v6498_v12, %v6503_v58  ;;  %v6504_v24 = vld [vmem:[#allocation23_spill] sm:$0xff]  ;;  %v3987_v60 = vmul.f32 %v6498_v12, %v6507_v50  ;;  %v6509_v5 = vld [vmem:[#allocation30_spill] sm:$0xff]  ;;  %v966_v56 = vrot.slane %v869_v4, 1 }
  0xa4   : > { %6482 = vst [vmem:[#allocation84_spill] sm:$0xff] %v3940_v38  ;;  %6484 = vst [vmem:[#allocation85_spill] sm:$0xff] %v3943_v48  ;;  %v873_v49 = vmul.f32 %v6498_v12, %v6504_v24  ;;  %v3991_v42 = vmul.f32 %v6498_v12, %v6508_v53  ;;  %v3995_v7 = vmul.f32 %v6498_v12, %v6509_v5  ;;  %v6510_v10 = vld [vmem:[#allocation31_spill] sm:$0xff]  ;;  %v6511_v36 = vld [vmem:[#allocation32_spill] sm:$0xff]  ;;  %v964_v28 = vrot.slane %v868_v11, 1 }
  0xa5   : > { %6486 = vst [vmem:[#allocation18_spill] sm:$0xff] %v3946_v57  ;;  %6488 = vst [vmem:[#allocation11_spill] sm:$0xff] %v3949_v31  ;;  %v3999_v62 = vmul.f32 %v6498_v12, %v6510_v10  ;;  %v4003_v6 = vmul.f32 %v6498_v12, %v6511_v36  ;;  %v6512_v41 = vld [vmem:[#allocation35_spill] sm:$0xff]  ;;  %v6513_v1 = vld [vmem:[#allocation36_spill] sm:$0xff]  ;;  %v968_v55 = vrot.slane %v870_v29, 1  ;;  %v971_v15 = vrot.slane %v872_v3, 1 }
  0xa6   : > { %6490 = vst [vmem:[#allocation17_spill] sm:$0xff] %v3952_v45  ;;  %6492 = vst [vmem:[#allocation12_spill] sm:$0xff] %v3955_v0  ;;  %v4007_v18 = vmul.f32 %v6498_v12, %v6512_v41  ;;  %v4011_v2 = vmul.f32 %v6498_v12, %v6513_v1  ;;  %v6514_v17 = vld [vmem:[#allocation37_spill] sm:$0xff]  ;;  %v6515_v35 = vld [vmem:[#allocation44_spill] sm:$0xff]  ;;  %v973_v59 = vrot.slane %v873_v49, 1  ;;  %v979_v29 = vrot.slane %v3991_v42, 1 }
  0xa7   : > { %6494 = vst [vmem:[#allocation13_spill] sm:$0xff] %v3958_v54  ;;  %6496 = vst [vmem:[#allocation88_spill] sm:$0xff] %v3961_v32  ;;  %v4015_v51 = vmul.f32 %v6498_v12, %v6514_v17  ;;  %v4019_v58 = vmul.f32 %v6498_v12, %v6515_v35  ;;  %v6516_v24 = vld [vmem:[#allocation40_spill] sm:$0xff]  ;;  %v6517_v26 = vld [vmem:[#allocation41_spill] sm:$0xff] }
  0xa8   : > { %v4023_v22 = vmul.f32 %v6498_v12, %v6516_v24  ;;  %v4027_v50 = vmul.f32 %v6498_v12, %v6517_v26  ;;  %v6518_v53 = vld [vmem:[#allocation49_spill] sm:$0xff]  ;;  %v6520_v41 = vld [vmem:[#allocation46_spill] sm:$0xff]  ;;  %v6523_v32 = vld [vmem:[#allocation51_spill] sm:$0xff]  ;;  %v986_v42 = vrot.slane %v4007_v18, 1 }
  0xa9   : > { %v4031_v5 = vmul.f32 %v6498_v12, %v6518_v53  ;;  %v6519_v10 = vld [vmem:[#allocation45_spill] sm:$0xff]  ;;  %v4039_v1 = vmul.f32 %v6498_v12, %v6520_v41  ;;  %v6521_v17 = vld [vmem:[#allocation58_spill] sm:$0xff]  ;;  %v4051_v53 = vmul.f32 %v6498_v12, %v6523_v32  ;;  %v6524_v54 = vld [vmem:[#allocation63_spill] sm:$0xff] }
  0xaa   : > { %v4035_v36 = vmul.f32 %v6498_v12, %v6519_v10  ;;  %v4043_v35 = vmul.f32 %v6498_v12, %v6521_v17  ;;  %v6522_v24 = vld [vmem:[#allocation50_spill] sm:$0xff]  ;;  %v4055_v10 = vmul.f32 %v6498_v12, %v6524_v54  ;;  %v6526_v45 = vld [vmem:[#allocation55_spill] sm:$0xff]  ;;  %v6527_v31 = vld [vmem:[#allocation68_spill] sm:$0xff] }
  0xab   : > { %v4047_v26 = vmul.f32 %v6498_v12, %v6522_v24  ;;  %v6525_v0 = vld [vmem:[#allocation54_spill] sm:$0xff]  ;;  %v4063_v17 = vmul.f32 %v6498_v12, %v6526_v45  ;;  %v4067_v24 = vmul.f32 %v6498_v12, %v6527_v31  ;;  %v6528_v57 = vld [vmem:[#allocation59_spill] sm:$0xff]  ;;  %v6529_v48 = vld [vmem:[#allocation60_spill] sm:$0xff] }
  0xac   : > { %v4059_v41 = vmul.f32 %v6498_v12, %v6525_v0  ;;  %v4071_v32 = vmul.f32 %v6498_v12, %v6528_v57  ;;  %v4075_v54 = vmul.f32 %v6498_v12, %v6529_v48  ;;  %v6530_v38 = vld [vmem:[#allocation73_spill] sm:$0xff]  ;;  %v6531_v46 = vld [vmem:[#allocation64_spill] sm:$0xff]  ;;  %v6533_v40 = vld [vmem:[#allocation78_spill] sm:$0xff]  ;;  %v998_v18 = vrot.slane %v4035_v36, 1 }
  0xad   : > { %v4079_v0 = vmul.f32 %v6498_v12, %v6530_v38  ;;  %v4083_v45 = vmul.f32 %v6498_v12, %v6531_v46  ;;  %v6532_v34 = vld [vmem:[#allocation65_spill] sm:$0xff]  ;;  %v4091_v57 = vmul.f32 %v6498_v12, %v6533_v40  ;;  %v6535_v47 = vld [vmem:[#allocation70_spill] sm:$0xff]  ;;  %v6536_v39 = vld [vmem:[#allocation83_spill] sm:$0xff] }
  0xae   : > { %v4087_v31 = vmul.f32 %v6498_v12, %v6532_v34  ;;  %v6534_v14 = vld [vmem:[#allocation69_spill] sm:$0xff]  ;;  %v4099_v38 = vmul.f32 %v6498_v12, %v6535_v47  ;;  %v4103_v46 = vmul.f32 %v6498_v12, %v6536_v39  ;;  %v6537_v27 = vld [vmem:[#allocation74_spill] sm:$0xff]  ;;  %v6538_v13 = vld [vmem:[#allocation75_spill] sm:$0xff]  ;;  %v1008_v36 = vrot.slane %v4059_v41, 1 }
  0xaf   : > { %v4095_v48 = vmul.f32 %v6498_v12, %v6534_v14  ;;  %v4107_v34 = vmul.f32 %v6498_v12, %v6537_v27  ;;  %v4111_v40 = vmul.f32 %v6498_v12, %v6538_v13  ;;  %v6539_v37 = vld [vmem:[#allocation86_spill] sm:$0xff]  ;;  %v6540_v25 = vld [vmem:[#allocation79_spill] sm:$0xff]  ;;  %v6541_v9 = vld [vmem:[#allocation80_spill] sm:$0xff]  ;;  %v963_v27 = vrot.slane %v867_v19, 1 }
  0xb0   : > { %v4115_v14 = vmul.f32 %v6498_v12, %v6539_v37  ;;  %v4119_v47 = vmul.f32 %v6498_v12, %v6540_v25  ;;  %v4123_v39 = vmul.f32 %v6498_v12, %v6541_v9  ;;  %v4126_v23 = vld [vmem:[%s2763_s5 + $0x190] sm:$0x3]  ;;  %v969_v13 = vrot.slane %v871_v63, 1  ;;  %v6543_v52 = vld [vmem:[#allocation87_spill] sm:$0xff] }
  0xb1   : > { %6542 = vst [vmem:[#allocation89_spill] sm:$0xff] %v4126_v23  ;;  %v974_v37 = vrot.slane %v3979_v16, 1  ;;  %v4131_v44 = vmul.f32 %v6498_v12, %v6543_v52  ;;  %v6544_v25 = vld [vmem:[#allocation33_spill] sm:$0xff]  ;;  %v4139_v9 = vmul.f32 %v6498_v12, %v3849_v8  ;;  %v976_v19 = vrot.slane %v3983_v30, 1 }
  0xb2   : > { %v4135_v20 = vmul.f32 %v6498_v12, %v6544_v25  ;;  %v4144_v11 = vmul.f32 %v6498_v12, %v4126_v23  ;;  %v4147_v4 = vsel %vm405_vm0, %v963_v27, %v964_v28  ;;  %v978_v52 = vrot.slane %v3987_v60, 1 }
  0xb3   : > { %v4152_v63 = vsel %vm405_vm0, %v964_v28, %v966_v56  ;;  %v4155_v3 = vsel %vm405_vm0, %v968_v55, %v969_v13  ;;  %v4158_v49 = vsel %vm405_vm0, %v969_v13, %v971_v15  ;;  %v981_v16 = vrot.slane %v3995_v7, 1 }
  0xb4   : > { %v4162_v12 = vsel %vm405_vm0, %v973_v59, %v974_v37  ;;  %v983_v30 = vrot.slane %v3999_v62, 1  ;;  %v984_v60 = vrot.slane %v4003_v6, 1  ;;  %v4168_v56 = vsel %vm405_vm0, %v974_v37, %v976_v19 }
  0xb5   : > { %v988_v55 = vrot.slane %v4011_v2, 1  ;;  %v989_v28 = vrot.slane %v4015_v51, 1  ;;  %v991_v15 = vrot.slane %v4019_v58, 1  ;;  %v980_v7 = vsel %vm405_vm0, %v978_v52, %v979_v29 }
  0xb6   : > { %v993_v59 = vrot.slane %v4023_v22, 1  ;;  %v994_v27 = vrot.slane %v4027_v50, 1  ;;  %v996_v62 = vrot.slane %v4031_v5, 1  ;;  %v982_v6 = vsel %vm405_vm0, %v979_v29, %v981_v16 }
  0xb7   : > { %v999_v13 = vrot.slane %v4039_v1, 1  ;;  %v1001_v2 = vrot.slane %v4043_v35, 1  ;;  %v985_v51 = vsel %vm405_vm0, %v983_v30, %v984_v60  ;;  %v987_v58 = vsel %vm405_vm0, %v984_v60, %v986_v42 }
  0xb8   : > { %v1003_v37 = vrot.slane %v4047_v26, 1  ;;  %v1004_v22 = vrot.slane %v4051_v53, 1  ;;  %v990_v50 = vsel %vm405_vm0, %v988_v55, %v989_v28  ;;  %v992_v5 = vsel %vm405_vm0, %v989_v28, %v991_v15 }
  0xb9   : > { %v1006_v19 = vrot.slane %v4055_v10, 1  ;;  %v995_v1 = vsel %vm405_vm0, %v993_v59, %v994_v27  ;;  %v997_v35 = vsel %vm405_vm0, %v994_v27, %v996_v62  ;;  %v1009_v52 = vrot.slane %v4063_v17, 1 }
  0xba   : > { %v1011_v29 = vrot.slane %v4067_v24, 1  ;;  %v1000_v26 = vsel %vm405_vm0, %v998_v18, %v999_v13  ;;  %v1002_v53 = vsel %vm405_vm0, %v999_v13, %v1001_v2  ;;  %v1013_v16 = vrot.slane %v4071_v32, 1 }
  0xbb   : > { %v1014_v30 = vrot.slane %v4075_v54, 1  ;;  %v1005_v10 = vsel %vm405_vm0, %v1003_v37, %v1004_v22  ;;  %v1007_v41 = vsel %vm405_vm0, %v1004_v22, %v1006_v19  ;;  %v1016_v60 = vrot.slane %v4079_v0, 1 }
  0xbc   : > { %v1018_v42 = vrot.slane %v4083_v45, 1  ;;  %v1010_v17 = vsel %vm405_vm0, %v1008_v36, %v1009_v52  ;;  %v1012_v24 = vsel %vm405_vm0, %v1009_v52, %v1011_v29  ;;  %v1019_v55 = vrot.slane %v4087_v31, 1  ;;  %v6545_v36 = vld [vmem:[#allocation38_spill] sm:$0xff]  ;;  %v6550_v29 = vld [vmem:[#allocation43_spill] sm:$0xff] }
  0xbd   : > { %v1021_v28 = vrot.slane %v4091_v57, 1  ;;  %v1023_v32 = vrot.slane %v4095_v48, 1  ;;  %v1024_v54 = vrot.slane %v4099_v38, 1  ;;  %v1026_v15 = vrot.slane %v4103_v46, 1 }
  0xbe   : > { %v1028_v59 = vrot.slane %v4107_v34, 1  ;;  %v1015_v0 = vsel %vm405_vm0, %v1013_v16, %v1014_v30  ;;  %v1029_v45 = vrot.slane %v4111_v40, 1  ;;  %v1031_v27 = vrot.slane %v4115_v14, 1 }
  0xbf   : > { %v1033_v62 = vrot.slane %v4119_v47, 1  ;;  %v1017_v31 = vsel %vm405_vm0, %v1014_v30, %v1016_v60  ;;  %v1034_v57 = vrot.slane %v4123_v39, 1  ;;  %v1036_v48 = vrot.slane %v4131_v44, 1  ;;  %v6554_v30 = vld [vmem:[#allocation48_spill] sm:$0xff] }
  0xc0   : > { %v1038_v38 = vrot.slane %v4135_v20, 1  ;;  %v1020_v46 = vsel %vm405_vm0, %v1018_v42, %v1019_v55  ;;  %v1022_v34 = vsel %vm405_vm0, %v1019_v55, %v1021_v28  ;;  %v1039_v18 = vrot.slane %v4139_v9, 1 }
  0xc1   : > { %v1041_v40 = vrot.slane %v4144_v11, 1  ;;  %v1025_v14 = vsel %vm405_vm0, %v1023_v32, %v1024_v54  ;;  %v1027_v47 = vsel %vm405_vm0, %v1024_v54, %v1026_v15  ;;  %v1030_v13 = vsel %vm405_vm0, %v1028_v59, %v1029_v45 }
  0xc2   : > { %v1032_v39 = vsel %vm405_vm0, %v1029_v45, %v1031_v27  ;;  %v1035_v44 = vsel %vm405_vm0, %v1033_v62, %v1034_v57  ;;  %v1037_v20 = vsel %vm405_vm0, %v1034_v57, %v1036_v48  ;;  %v4229_v2 = vadd.f32 %v4147_v4, %v3868_v43  ;;  %v6546_v4 = vld [vmem:[#allocation39_spill] sm:$0xff]  ;;  %v6582_v48 = vld [vmem:[#allocation82_spill] sm:$0xff] }
  0xc3   : > { %v4233_v9 = vadd.f32 %v4152_v63, %v3871_v33  ;;  %v1040_v11 = vsel %vm405_vm0, %v1038_v38, %v1039_v18  ;;  %v1042_v37 = vsel %vm405_vm0, %v1039_v18, %v1041_v40  ;;  %v4239_v22 = vadd.f32 %v4155_v3, %v3874_v61  ;;  %v6548_v63 = vld [vmem:[#allocation42_spill] sm:$0xff]  ;;  %v6552_v61 = vld [vmem:[#allocation47_spill] sm:$0xff]  ;;  %v6584_v38 = vld [vmem:[#allocation84_spill] sm:$0xff] }
  0xc4   : > { %v4243_v19 = vadd.f32 %v4158_v49, %v3877_v21  ;;  %v4247_v43 = vadd.f32 %v4162_v12, %v6545_v36  ;;  %v4251_v33 = vadd.f32 %v4168_v56, %v6546_v4  ;;  %v4254_v52 = vadd.f32 %v980_v7, %v6548_v63  ;;  %v6556_v49 = vld [vmem:[#allocation52_spill] sm:$0xff]  ;;  %v6558_v12 = vld [vmem:[#allocation53_spill] sm:$0xff]  ;;  %v6588_v36 = vld [vmem:[#allocation18_spill] sm:$0xff] }
  0xc5   : > { %v4257_v16 = vadd.f32 %v982_v6, %v6550_v29  ;;  %v4260_v3 = vadd.f32 %v985_v51, %v6552_v61  ;;  %v4263_v21 = vadd.f32 %v987_v58, %v6554_v30  ;;  %v4266_v60 = vadd.f32 %v990_v50, %v6556_v49  ;;  %v6560_v56 = vld [vmem:[#allocation56_spill] sm:$0xff]  ;;  %v6562_v7 = vld [vmem:[#allocation57_spill] sm:$0xff]  ;;  %v6566_v51 = vld [vmem:[#allocation62_spill] sm:$0xff] }
  0xc6   : > { %6547 = vst [vmem:[#allocation28_spill] sm:$0xff] %v4251_v33  ;;  %6549 = vst [vmem:[#allocation29_spill] sm:$0xff] %v4254_v52  ;;  %v4269_v42 = vadd.f32 %v992_v5, %v6558_v12  ;;  %v4272_v55 = vadd.f32 %v995_v1, %v6560_v56  ;;  %v4275_v28 = vadd.f32 %v997_v35, %v6562_v7  ;;  %v6564_v6 = vld [vmem:[#allocation61_spill] sm:$0xff]  ;;  %v6568_v58 = vld [vmem:[#allocation66_spill] sm:$0xff] }
  0xc7   : > { %6551 = vst [vmem:[#allocation14_spill] sm:$0xff] %v4257_v16  ;;  %6553 = vst [vmem:[#allocation19_spill] sm:$0xff] %v4260_v3  ;;  %v4278_v32 = vadd.f32 %v1000_v26, %v6564_v6  ;;  %v4281_v54 = vadd.f32 %v1002_v53, %v6566_v51  ;;  %v4284_v15 = vadd.f32 %v1005_v10, %v6568_v58  ;;  %v6570_v50 = vld [vmem:[#allocation67_spill] sm:$0xff]  ;;  %v6574_v1 = vld [vmem:[#allocation72_spill] sm:$0xff] }
  0xc8   : > { %6555 = vst [vmem:[#allocation15_spill] sm:$0xff] %v4263_v21  ;;  %6557 = vst [vmem:[#allocation16_spill] sm:$0xff] %v4266_v60  ;;  %v4287_v59 = vadd.f32 %v1007_v41, %v6570_v50  ;;  %v6572_v5 = vld [vmem:[#allocation71_spill] sm:$0xff]  ;;  %v4293_v27 = vadd.f32 %v1012_v24, %v6574_v1  ;;  %v236_v35 = vld [vmem:[%s6012_s1 + $0x8] sm:$0x7]  ;;  %v4311_v24 = vadd.f32 %v1025_v14, %v6584_v38 }
  0xc9   : > { %6559 = vst [vmem:[#allocation20_spill] sm:$0xff] %v4269_v42  ;;  %6561 = vst [vmem:[#allocation21_spill] sm:$0xff] %v4272_v55  ;;  %v4290_v45 = vadd.f32 %v1010_v17, %v6572_v5  ;;  %v6576_v26 = vld [vmem:[#allocation76_spill] sm:$0xff]  ;;  %v6578_v53 = vld [vmem:[#allocation77_spill] sm:$0xff]  ;;  %v4308_v17 = vadd.f32 %v1022_v34, %v6582_v48 }
  0xca   : > { %6563 = vst [vmem:[#allocation22_spill] sm:$0xff] %v4275_v28  ;;  %6565 = vst [vmem:[#allocation23_spill] sm:$0xff] %v4278_v32  ;;  %v4299_v62 = vadd.f32 %v1015_v0, %v6576_v26  ;;  %v4302_v57 = vadd.f32 %v1017_v31, %v6578_v53  ;;  %v6580_v10 = vld [vmem:[#allocation81_spill] sm:$0xff]  ;;  %v4317_v0 = vadd.f32 %v1030_v13, %v6588_v36  ;;  %v6590_v31 = vld [vmem:[#allocation11_spill] sm:$0xff] }
  0xcb   : > { %6567 = vst [vmem:[#allocation24_spill] sm:$0xff] %v4281_v54  ;;  %6569 = vst [vmem:[#allocation25_spill] sm:$0xff] %v4284_v15  ;;  %v4305_v41 = vadd.f32 %v1020_v46, %v6580_v10  ;;  %v6586_v18 = vld [vmem:[#allocation85_spill] sm:$0xff]  ;;  %v4320_v4 = vadd.f32 %v1032_v39, %v6590_v31  ;;  %v6594_v34 = vld [vmem:[#allocation12_spill] sm:$0xff] }
  0xcc   : > { %6571 = vst [vmem:[#allocation26_spill] sm:$0xff] %v4287_v59  ;;  %6573 = vst [vmem:[#allocation27_spill] sm:$0xff] %v4290_v45  ;;  %v4314_v40 = vadd.f32 %v1027_v47, %v6586_v18  ;;  %v6592_v63 = vld [vmem:[#allocation17_spill] sm:$0xff]  ;;  %v4326_v29 = vadd.f32 %v1037_v20, %v6594_v34  ;;  %v2523_v47 = vld [vmem:[%s6012_s1 + $0x4] sm:$0x7] }
  0xcd   : > { %6575 = vst [vmem:[#allocation30_spill] sm:$0xff] %v4293_v27  ;;  %6577 = vst [vmem:[#allocation31_spill] sm:$0xff] %v4299_v62  ;;  %v4323_v46 = vadd.f32 %v1035_v44, %v6592_v63  ;;  %v6596_v61 = vld [vmem:[#allocation13_spill] sm:$0xff]  ;;  %v6598_v13 = vld [vmem:[#allocation10_spill] sm:$0xff] }
  0xce   : > { %6579 = vst [vmem:[#allocation32_spill] sm:$0xff] %v4302_v57  ;;  %6581 = vst [vmem:[#allocation35_spill] sm:$0xff] %v4305_v41  ;;  %v4329_v14 = vadd.f32 %v1040_v11, %v6596_v61  ;;  %v4335_v30 = vrot.slane %v2523_v47, %v6598_v13  ;;  %v6599_v39 = vld [vmem:[#allocation88_spill] sm:$0xff]  ;;  %v6603_v20 = vld [vmem:[#allocation9_spill] sm:$0xff]  ;;  %v4347_v11 = vrot.slane %v236_v35, %v6598_v13 }
  0xcf   : > { %6583 = vst [vmem:[#allocation36_spill] sm:$0xff] %v4308_v17  ;;  %6585 = vst [vmem:[#allocation37_spill] sm:$0xff] %v4311_v24  ;;  %v4338_v49 = vadd.f32 %v1042_v37, %v6599_v39  ;;  %v6601_v44 = vld [vmem:[#allocation8_spill] sm:$0xff]  ;;  %v4344_v56 = vrot.slane %v236_v35, %v6603_v20  ;;  %v2524_v7 = vld [vmem:[%s2763_s5 + $0x18] sm:$0xff] }
  0xd0   : > { %6587 = vst [vmem:[#allocation44_spill] sm:$0xff] %v4314_v40  ;;  %6589 = vst [vmem:[#allocation40_spill] sm:$0xff] %v4317_v0  ;;  %v4341_v12 = vrot.slane %v236_v35, %v6601_v44  ;;  %v4351_v6 = vmul.f32 %v2524_v7, %v4335_v30  ;;  %v2525_v51 = vld [vmem:[%s2763_s5 + $0x20] sm:$0xff]  ;;  %v2526_v58 = vld [vmem:[%s2763_s5 + $0x28] sm:$0x3]  ;;  %v4665_v60 = vmul.f32 %v4335_v30, %v4126_v23 }
  0xd1   : > { %6591 = vst [vmem:[#allocation41_spill] sm:$0xff] %v4320_v4  ;;  %6593 = vst [vmem:[#allocation49_spill] sm:$0xff] %v4323_v46  ;;  %v4355_v37 = vmul.f32 %v2525_v51, %v4335_v30  ;;  %v4359_v50 = vmul.f32 %v2526_v58, %v4335_v30  ;;  %v4362_v5 = vld [vmem:[%s2763_s5 + $0x30] sm:$0xff]  ;;  %v4369_v35 = vld [vmem:[%s2763_s5 + $0x38] sm:$0xff] }
  0xd2   : > { %6595 = vst [vmem:[#allocation45_spill] sm:$0xff] %v4326_v29  ;;  %6597 = vst [vmem:[#allocation46_spill] sm:$0xff] %v4329_v14  ;;  %v4366_v1 = vmul.f32 %v4362_v5, %v4335_v30  ;;  %v4373_v26 = vmul.f32 %v4369_v35, %v4335_v30  ;;  %v4376_v53 = vld [vmem:[%s2763_s5 + $0x40] sm:$0x3]  ;;  %v4383_v48 = vld [vmem:[%s2763_s5 + $0x48] sm:$0xff] }
  0xd3   : > { %6600 = vst [vmem:[#allocation58_spill] sm:$0xff] %v4338_v49  ;;  %6602 = vst [vmem:[#allocation50_spill] sm:$0xff] %v4341_v12  ;;  %v4380_v10 = vmul.f32 %v4376_v53, %v4335_v30  ;;  %v4387_v38 = vmul.f32 %v4383_v48, %v4335_v30  ;;  %v4390_v18 = vld [vmem:[%s2763_s5 + $0x50] sm:$0xff]  ;;  %v4397_v31 = vld [vmem:[%s2763_s5 + $0x58] sm:$0x3]  ;;  %v1208_v21 = vrot.slane %v4355_v37, 2 }
  0xd4   : > { %6604 = vst [vmem:[#allocation51_spill] sm:$0xff] %v4344_v56  ;;  %6605 = vst [vmem:[#allocation63_spill] sm:$0xff] %v4347_v11  ;;  %v4394_v36 = vmul.f32 %v4390_v18, %v4335_v30  ;;  %v4401_v63 = vmul.f32 %v4397_v31, %v4335_v30  ;;  %v4404_v34 = vld [vmem:[%s2763_s5 + $0x60] sm:$0xff]  ;;  %v4411_v47 = vld [vmem:[%s2763_s5 + $0x68] sm:$0xff]  ;;  %v1210_v3 = vrot.slane %v4359_v50, 2  ;;  %v1213_v16 = vrot.slane %v4373_v26, 2 }
  0xd5   : > { %6606 = vst [vmem:[#allocation54_spill] sm:$0xff] %v4362_v5  ;;  %6607 = vst [vmem:[#allocation55_spill] sm:$0xff] %v4369_v35  ;;  %v4408_v61 = vmul.f32 %v4404_v34, %v4335_v30  ;;  %v4415_v13 = vmul.f32 %v4411_v47, %v4335_v30  ;;  %v4418_v39 = vld [vmem:[%s2763_s5 + $0x70] sm:$0x3]  ;;  %v4425_v20 = vld [vmem:[%s2763_s5 + $0x78] sm:$0xff]  ;;  %v1217_v52 = vrot.slane %v4387_v38, 2 }
  0xd6   : > { %6608 = vst [vmem:[#allocation68_spill] sm:$0xff] %v4376_v53  ;;  %6609 = vst [vmem:[#allocation59_spill] sm:$0xff] %v4383_v48  ;;  %v4422_v44 = vmul.f32 %v4418_v39, %v4335_v30  ;;  %v4429_v7 = vmul.f32 %v4425_v20, %v4335_v30  ;;  %v4432_v51 = vld [vmem:[%s2763_s5 + $0x80] sm:$0xff]  ;;  %v4439_v11 = vld [vmem:[%s2763_s5 + $0x88] sm:$0x3] }
  0xd7   : > { %6610 = vst [vmem:[#allocation60_spill] sm:$0xff] %v4390_v18  ;;  %6611 = vst [vmem:[#allocation73_spill] sm:$0xff] %v4397_v31  ;;  %v4436_v58 = vmul.f32 %v4432_v51, %v4335_v30  ;;  %v4446_v31 = vld [vmem:[%s2763_s5 + $0x90] sm:$0xff]  ;;  %v4453_v56 = vld [vmem:[%s2763_s5 + $0x98] sm:$0xff]  ;;  %v1222_v37 = vrot.slane %v4408_v61, 2 }
  0xd8   : > { %6612 = vst [vmem:[#allocation64_spill] sm:$0xff] %v4404_v34  ;;  %6613 = vst [vmem:[#allocation65_spill] sm:$0xff] %v4411_v47  ;;  %v4450_v53 = vmul.f32 %v4446_v31, %v4335_v30  ;;  %v4467_v47 = vld [vmem:[%s2763_s5 + $0xa8] sm:$0xff]  ;;  %v4474_v34 = vld [vmem:[%s2763_s5 + $0xb0] sm:$0xff] }
  0xd9   : > { %6614 = vst [vmem:[#allocation78_spill] sm:$0xff] %v4418_v39  ;;  %6615 = vst [vmem:[#allocation69_spill] sm:$0xff] %v4425_v20  ;;  %v4443_v39 = vmul.f32 %v4439_v11, %v4335_v30  ;;  %v4460_v20 = vld [vmem:[%s2763_s5 + $0xa0] sm:$0x3]  ;;  %v4481_v18 = vld [vmem:[%s2763_s5 + $0xb8] sm:$0x3] }
  0xda   : > { %6616 = vst [vmem:[#allocation70_spill] sm:$0xff] %v4432_v51  ;;  %6617 = vst [vmem:[#allocation83_spill] sm:$0xff] %v4439_v11  ;;  %v4457_v51 = vmul.f32 %v4453_v56, %v4335_v30  ;;  %v4464_v11 = vmul.f32 %v4460_v20, %v4335_v30  ;;  %v4488_v48 = vld [vmem:[%s2763_s5 + $0xc0] sm:$0xff]  ;;  %v4495_v35 = vld [vmem:[%s2763_s5 + $0xc8] sm:$0xff]  ;;  %v1228_v38 = vrot.slane %v4436_v58, 2 }
  0xdb   : > { %6618 = vst [vmem:[#allocation74_spill] sm:$0xff] %v4446_v31  ;;  %6619 = vst [vmem:[#allocation75_spill] sm:$0xff] %v4453_v56  ;;  %v4471_v31 = vmul.f32 %v4467_v47, %v4335_v30  ;;  %v4478_v56 = vmul.f32 %v4474_v34, %v4335_v30  ;;  %v4502_v5 = vld [vmem:[%s2763_s5 + $0xd0] sm:$0x3]  ;;  %v4509_v12 = vld [vmem:[%s2763_s5 + $0xd8] sm:$0xff] }
  0xdc   : > { %6620 = vst [vmem:[#allocation86_spill] sm:$0xff] %v4460_v20  ;;  %6621 = vst [vmem:[#allocation79_spill] sm:$0xff] %v4467_v47  ;;  %v4485_v20 = vmul.f32 %v4481_v18, %v4335_v30  ;;  %v4492_v47 = vmul.f32 %v4488_v48, %v4335_v30  ;;  %v4516_v49 = vld [vmem:[%s2763_s5 + $0xe0] sm:$0xff]  ;;  %v4523_v14 = vld [vmem:[%s2763_s5 + $0xe8] sm:$0x3] }
  0xdd   : > { %6622 = vst [vmem:[#allocation80_spill] sm:$0xff] %v4474_v34  ;;  %6623 = vst [vmem:[#allocation87_spill] sm:$0xff] %v4481_v18  ;;  %v4499_v34 = vmul.f32 %v4495_v35, %v4335_v30  ;;  %v4506_v18 = vmul.f32 %v4502_v5, %v4335_v30  ;;  %v4530_v29 = vld [vmem:[%s2763_s5 + $0xf0] sm:$0xff]  ;;  %v4537_v46 = vld [vmem:[%s2763_s5 + $0xf8] sm:$0xff]  ;;  %v1237_v61 = vrot.slane %v4471_v31, 2 }
  0xde   : > { %6624 = vst [vmem:[#allocation38_spill] sm:$0xff] %v4488_v48  ;;  %6625 = vst [vmem:[#allocation39_spill] sm:$0xff] %v4495_v35  ;;  %v4513_v48 = vmul.f32 %v4509_v12, %v4335_v30  ;;  %v4520_v35 = vmul.f32 %v4516_v49, %v4335_v30  ;;  %v4544_v4 = vld [vmem:[%s2763_s5 + $0x100] sm:$0x3]  ;;  %v4551_v0 = vld [vmem:[%s2763_s5 + $0x108] sm:$0xff] }
  0xdf   : > { %6626 = vst [vmem:[#allocation42_spill] sm:$0xff] %v4502_v5  ;;  %6627 = vst [vmem:[#allocation43_spill] sm:$0xff] %v4509_v12  ;;  %v4527_v5 = vmul.f32 %v4523_v14, %v4335_v30  ;;  %v4534_v12 = vmul.f32 %v4530_v29, %v4335_v30  ;;  %v4558_v40 = vld [vmem:[%s2763_s5 + $0x110] sm:$0xff]  ;;  %v4565_v24 = vld [vmem:[%s2763_s5 + $0x118] sm:$0x3]  ;;  %v1243_v58 = vrot.slane %v4499_v34, 2 }
  0xe0   : > { %6628 = vst [vmem:[#allocation47_spill] sm:$0xff] %v4516_v49  ;;  %6629 = vst [vmem:[#allocation48_spill] sm:$0xff] %v4523_v14  ;;  %v4541_v49 = vmul.f32 %v4537_v46, %v4335_v30  ;;  %v4548_v14 = vmul.f32 %v4544_v4, %v4335_v30  ;;  %v4572_v17 = vld [vmem:[%s2763_s5 + $0x120] sm:$0xff]  ;;  %v4579_v41 = vld [vmem:[%s2763_s5 + $0x128] sm:$0xff] }
  0xe1   : > { %6630 = vst [vmem:[#allocation52_spill] sm:$0xff] %v4530_v29  ;;  %6631 = vst [vmem:[#allocation53_spill] sm:$0xff] %v4537_v46  ;;  %v4555_v29 = vmul.f32 %v4551_v0, %v4335_v30  ;;  %v4562_v46 = vmul.f32 %v4558_v40, %v4335_v30  ;;  %v4586_v57 = vld [vmem:[%s2763_s5 + $0x130] sm:$0x3]  ;;  %v4593_v62 = vld [vmem:[%s2763_s5 + $0x138] sm:$0xff] }
  0xe2   : > { %6632 = vst [vmem:[#allocation56_spill] sm:$0xff] %v4544_v4  ;;  %6633 = vst [vmem:[#allocation57_spill] sm:$0xff] %v4551_v0  ;;  %v4569_v4 = vmul.f32 %v4565_v24, %v4335_v30  ;;  %v4576_v0 = vmul.f32 %v4572_v17, %v4335_v30  ;;  %v4600_v27 = vld [vmem:[%s2763_s5 + $0x140] sm:$0xff]  ;;  %v4607_v45 = vld [vmem:[%s2763_s5 + $0x148] sm:$0x3] }
  0xe3   : > { %6634 = vst [vmem:[#allocation61_spill] sm:$0xff] %v4558_v40  ;;  %6635 = vst [vmem:[#allocation62_spill] sm:$0xff] %v4565_v24  ;;  %v4583_v40 = vmul.f32 %v4579_v41, %v4335_v30  ;;  %v4590_v24 = vmul.f32 %v4586_v57, %v4335_v30  ;;  %v4611_v59 = vmul.f32 %v4607_v45, %v4335_v30 }
  0xe4   : > { %6636 = vst [vmem:[#allocation66_spill] sm:$0xff] %v4572_v17  ;;  %6637 = vst [vmem:[#allocation67_spill] sm:$0xff] %v4579_v41  ;;  %v4597_v17 = vmul.f32 %v4593_v62, %v4335_v30  ;;  %v4604_v41 = vmul.f32 %v4600_v27, %v4335_v30 }
  0xe5   : > { %6638 = vst [vmem:[#allocation71_spill] sm:$0xff] %v4586_v57  ;;  %6639 = vst [vmem:[#allocation72_spill] sm:$0xff] %v4593_v62  ;;  %v4614_v57 = vld [vmem:[%s2763_s5 + $0x150] sm:$0xff]  ;;  %v4621_v62 = vld [vmem:[%s2763_s5 + $0x158] sm:$0xff] }
  0xe6   : > { %6640 = vst [vmem:[#allocation76_spill] sm:$0xff] %v4600_v27  ;;  %6641 = vst [vmem:[#allocation77_spill] sm:$0xff] %v4607_v45  ;;  %v4618_v15 = vmul.f32 %v4614_v57, %v4335_v30  ;;  %v4625_v54 = vmul.f32 %v4621_v62, %v4335_v30  ;;  %v4628_v27 = vld [vmem:[%s2763_s5 + $0x160] sm:$0x3]  ;;  %v4635_v45 = vld [vmem:[%s2763_s5 + $0x168] sm:$0xff] }
  0xe7   : > { %6642 = vst [vmem:[#allocation81_spill] sm:$0xff] %v4614_v57  ;;  %6643 = vst [vmem:[#allocation82_spill] sm:$0xff] %v4621_v62  ;;  %v4632_v32 = vmul.f32 %v4628_v27, %v4335_v30  ;;  %v4639_v28 = vmul.f32 %v4635_v45, %v4335_v30  ;;  %v4642_v57 = vld [vmem:[%s2763_s5 + $0x170] sm:$0xff]  ;;  %v4649_v62 = vld [vmem:[%s2763_s5 + $0x178] sm:$0x3] }
  0xe8   : > { %6644 = vst [vmem:[#allocation84_spill] sm:$0xff] %v4628_v27  ;;  %6645 = vst [vmem:[#allocation85_spill] sm:$0xff] %v4635_v45  ;;  %v4646_v55 = vmul.f32 %v4642_v57, %v4335_v30  ;;  %v4653_v42 = vmul.f32 %v4649_v62, %v4335_v30  ;;  %v4657_v27 = vmul.f32 %v4335_v30, %v6544_v25  ;;  %v1215_v25 = vrot.slane %v4380_v10, 2  ;;  %v6699_v23 = vld [vmem:[#allocation47_spill] sm:$0xff] }
  0xe9   : > { %6646 = vst [vmem:[#allocation18_spill] sm:$0xff] %v4642_v57  ;;  %6647 = vst [vmem:[#allocation11_spill] sm:$0xff] %v4649_v62  ;;  %v4661_v45 = vmul.f32 %v4335_v30, %v3849_v8  ;;  %v1207_v57 = vrot.slane %v4351_v6, 2  ;;  %v1212_v62 = vrot.slane %v4366_v1, 2  ;;  %v1218_v8 = vrot.slane %v4394_v36, 2 }
  0xea   : > { %v4679_v30 = vsel %vm650_vm1, %v1208_v21, %v1210_v3  ;;  %v1220_v6 = vrot.slane %v4401_v63, 2  ;;  %v4687_v1 = vsel %vm650_vm1, %v1213_v16, %v1215_v25  ;;  %v1223_v10 = vrot.slane %v4415_v13, 2 }
  0xeb   : > { %v4676_v33 = vsel %vm650_vm1, %v1207_v57, %v1208_v21  ;;  %v4684_v50 = vsel %vm650_vm1, %v1212_v62, %v1213_v16  ;;  %v4690_v26 = vsel %vm650_vm1, %v1217_v52, %v1218_v8  ;;  %v1225_v3 = vrot.slane %v4422_v44, 2 }
  0xec   : > { %v4694_v57 = vsel %vm650_vm1, %v1218_v8, %v1220_v6  ;;  %v1227_v21 = vrot.slane %v4429_v7, 2  ;;  %v4700_v62 = vsel %vm650_vm1, %v1222_v37, %v1223_v10  ;;  %v1230_v25 = vrot.slane %v4443_v39, 2 }
  0xed   : > { %v1232_v16 = vrot.slane %v4450_v53, 2  ;;  %v1233_v52 = vrot.slane %v4457_v51, 2  ;;  %v4706_v36 = vsel %vm650_vm1, %v1223_v10, %v1225_v3  ;;  %v1235_v63 = vrot.slane %v4464_v11, 2 }
  0xee   : > { %v4709_v8 = vsel %vm650_vm1, %v1227_v21, %v1228_v38  ;;  %v1231_v13 = vsel %vm650_vm1, %v1228_v38, %v1230_v25  ;;  %v1238_v39 = vrot.slane %v4478_v56, 2  ;;  %v1240_v53 = vrot.slane %v4485_v20, 2 }
  0xef   : > { %v1234_v44 = vsel %vm650_vm1, %v1232_v16, %v1233_v52  ;;  %v1236_v7 = vsel %vm650_vm1, %v1233_v52, %v1235_v63  ;;  %v1242_v51 = vrot.slane %v4492_v47, 2  ;;  %v1245_v6 = vrot.slane %v4506_v18, 2 }
  0xf0   : > { %v1239_v11 = vsel %vm650_vm1, %v1237_v61, %v1238_v39  ;;  %v1241_v31 = vsel %vm650_vm1, %v1238_v39, %v1240_v53  ;;  %v1247_v37 = vrot.slane %v4513_v48, 2  ;;  %v1248_v10 = vrot.slane %v4520_v35, 2 }
  0xf1   : > { %v1244_v56 = vsel %vm650_vm1, %v1242_v51, %v1243_v58  ;;  %v1246_v20 = vsel %vm650_vm1, %v1243_v58, %v1245_v6  ;;  %v1250_v3 = vrot.slane %v4527_v5, 2  ;;  %v1252_v47 = vrot.slane %v4534_v12, 2 }
  0xf2   : > { %v1249_v34 = vsel %vm650_vm1, %v1247_v37, %v1248_v10  ;;  %v1253_v18 = vrot.slane %v4541_v49, 2  ;;  %v1255_v21 = vrot.slane %v4548_v14, 2  ;;  %v1257_v38 = vrot.slane %v4555_v29, 2 }
  0xf3   : > { %v1251_v48 = vsel %vm650_vm1, %v1248_v10, %v1250_v3  ;;  %v1258_v35 = vrot.slane %v4562_v46, 2  ;;  %v1260_v25 = vrot.slane %v4569_v4, 2  ;;  %v1262_v16 = vrot.slane %v4576_v0, 2 }
  0xf4   : > { %v1254_v5 = vsel %vm650_vm1, %v1252_v47, %v1253_v18  ;;  %v1256_v12 = vsel %vm650_vm1, %v1253_v18, %v1255_v21  ;;  %v1263_v52 = vrot.slane %v4583_v40, 2  ;;  %v1265_v49 = vrot.slane %v4590_v24, 2  ;;  %v6650_v47 = vld [vmem:[#allocation14_spill] sm:$0xff] }
  0xf5   : > { %v1259_v14 = vsel %vm650_vm1, %v1257_v38, %v1258_v35  ;;  %v1261_v29 = vsel %vm650_vm1, %v1258_v35, %v1260_v25  ;;  %v1267_v63 = vrot.slane %v4597_v17, 2  ;;  %v1268_v46 = vrot.slane %v4604_v41, 2  ;;  %v6655_v38 = vld [vmem:[#allocation21_spill] sm:$0xff]  ;;  %v6656_v35 = vld [vmem:[#allocation22_spill] sm:$0xff] }
  0xf6   : > { %v1264_v4 = vsel %vm650_vm1, %v1262_v16, %v1263_v52  ;;  %v1266_v0 = vsel %vm650_vm1, %v1263_v52, %v1265_v49  ;;  %v1270_v61 = vrot.slane %v4611_v59, 2  ;;  %v1272_v39 = vrot.slane %v4618_v15, 2 }
  0xf7   : > { %v1269_v40 = vsel %vm650_vm1, %v1267_v63, %v1268_v46  ;;  %v1273_v24 = vrot.slane %v4625_v54, 2  ;;  %v1275_v53 = vrot.slane %v4632_v32, 2  ;;  %v1277_v51 = vrot.slane %v4639_v28, 2 }
  0xf8   : > { %v1271_v17 = vsel %vm650_vm1, %v1268_v46, %v1270_v61  ;;  %v1278_v41 = vrot.slane %v4646_v55, 2  ;;  %v1280_v58 = vrot.slane %v4653_v42, 2  ;;  %v1282_v6 = vrot.slane %v4657_v27, 2 }
  0xf9   : > { %v1274_v59 = vsel %vm650_vm1, %v1272_v39, %v1273_v24  ;;  %v1276_v15 = vsel %vm650_vm1, %v1273_v24, %v1275_v53  ;;  %v1283_v37 = vrot.slane %v4661_v45, 2  ;;  %v1285_v54 = vrot.slane %v4665_v60, 2 }
  0xfa   : > { %v1279_v32 = vsel %vm650_vm1, %v1277_v51, %v1278_v41  ;;  %v1281_v28 = vsel %vm650_vm1, %v1278_v41, %v1280_v58  ;;  %v4765_v10 = vadd.f32 %v4676_v33, %v4229_v2  ;;  %v4769_v42 = vadd.f32 %v4679_v30, %v4233_v9  ;;  %v6648_v33 = vld [vmem:[#allocation28_spill] sm:$0xff]  ;;  %v6649_v30 = vld [vmem:[#allocation29_spill] sm:$0xff] }
  0xfb   : > { %v1284_v55 = vsel %vm650_vm1, %v1282_v6, %v1283_v37  ;;  %v1286_v27 = vsel %vm650_vm1, %v1283_v37, %v1285_v54  ;;  %v4775_v45 = vadd.f32 %v4684_v50, %v4239_v22  ;;  %v4779_v60 = vadd.f32 %v4687_v1, %v4243_v19  ;;  %v6651_v50 = vld [vmem:[#allocation19_spill] sm:$0xff] }
  0xfc   : > { %v4783_v2 = vadd.f32 %v4690_v26, %v4247_v43  ;;  %v4787_v9 = vadd.f32 %v4694_v57, %v6648_v33  ;;  %v4791_v3 = vadd.f32 %v4700_v62, %v6649_v30  ;;  %v4795_v22 = vadd.f32 %v4706_v36, %v6650_v47  ;;  %v6652_v1 = vld [vmem:[#allocation15_spill] sm:$0xff]  ;;  %v6653_v43 = vld [vmem:[#allocation16_spill] sm:$0xff] }
  0xfd   : > { %v4799_v19 = vadd.f32 %v4709_v8, %v6651_v50  ;;  %v4802_v18 = vadd.f32 %v1231_v13, %v6652_v1  ;;  %v4805_v26 = vadd.f32 %v1234_v44, %v6653_v43  ;;  %v6654_v57 = vld [vmem:[#allocation20_spill] sm:$0xff]  ;;  %v4811_v62 = vadd.f32 %v1239_v11, %v6655_v38  ;;  %v6657_v36 = vld [vmem:[#allocation23_spill] sm:$0xff]  ;;  %v6659_v13 = vld [vmem:[#allocation25_spill] sm:$0xff] }
  0xfe   : > { %v4808_v21 = vadd.f32 %v1236_v7, %v6654_v57  ;;  %v4814_v25 = vadd.f32 %v1241_v31, %v6656_v35  ;;  %v4817_v16 = vadd.f32 %v1244_v56, %v6657_v36  ;;  %v6658_v8 = vld [vmem:[#allocation24_spill] sm:$0xff]  ;;  %v4823_v49 = vadd.f32 %v1249_v34, %v6659_v13  ;;  %v6660_v44 = vld [vmem:[#allocation26_spill] sm:$0xff]  ;;  %v6661_v7 = vld [vmem:[#allocation27_spill] sm:$0xff] }
  0xff   : > { %v4820_v52 = vadd.f32 %v1246_v20, %v6658_v8  ;;  %v4826_v63 = vadd.f32 %v1251_v48, %v6660_v44  ;;  %v4829_v46 = vadd.f32 %v1254_v5, %v6661_v7  ;;  %v6662_v11 = vld [vmem:[#allocation30_spill] sm:$0xff]  ;;  %v6663_v31 = vld [vmem:[#allocation31_spill] sm:$0xff]  ;;  %v6664_v56 = vld [vmem:[#allocation32_spill] sm:$0xff] }
 0x100   : > { %v4832_v61 = vadd.f32 %v1256_v12, %v6662_v11  ;;  %v4835_v39 = vadd.f32 %v1259_v14, %v6663_v31  ;;  %v4838_v24 = vadd.f32 %v1261_v29, %v6664_v56  ;;  %v6665_v20 = vld [vmem:[#allocation35_spill] sm:$0xff]  ;;  %v6666_v34 = vld [vmem:[#allocation36_spill] sm:$0xff]  ;;  %v6667_v48 = vld [vmem:[#allocation37_spill] sm:$0xff] }
 0x101   : > { %v4841_v53 = vadd.f32 %v1264_v4, %v6665_v20  ;;  %v4844_v51 = vadd.f32 %v1266_v0, %v6666_v34  ;;  %v4847_v41 = vadd.f32 %v1269_v40, %v6667_v48  ;;  %v6669_v5 = vld [vmem:[#allocation44_spill] sm:$0xff]  ;;  %v6673_v14 = vld [vmem:[#allocation41_spill] sm:$0xff]  ;;  %v6679_v0 = vld [vmem:[#allocation46_spill] sm:$0xff] }
 0x102   : > { %v4850_v58 = vadd.f32 %v1271_v17, %v6669_v5  ;;  %v6671_v12 = vld [vmem:[#allocation40_spill] sm:$0xff]  ;;  %v4856_v37 = vadd.f32 %v1276_v15, %v6673_v14  ;;  %v6675_v29 = vld [vmem:[#allocation49_spill] sm:$0xff]  ;;  %v4865_v30 = vadd.f32 %v1284_v55, %v6679_v0  ;;  %v6681_v40 = vld [vmem:[#allocation58_spill] sm:$0xff] }
 0x103   : > { %6668 = vst [vmem:[#allocation17_spill] sm:$0xff] %v4847_v41  ;;  %v4853_v6 = vadd.f32 %v1274_v59, %v6671_v12  ;;  %v4859_v54 = vadd.f32 %v1279_v32, %v6675_v29  ;;  %v6677_v4 = vld [vmem:[#allocation45_spill] sm:$0xff]  ;;  %v4868_v47 = vadd.f32 %v1286_v27, %v6681_v40  ;;  %v6683_v17 = vld [vmem:[#allocation50_spill] sm:$0xff]  ;;  %v6685_v59 = vld [vmem:[#allocation55_spill] sm:$0xff] }
 0x104   : > { %6670 = vst [vmem:[#allocation12_spill] sm:$0xff] %v4850_v58  ;;  %6674 = vst [vmem:[#allocation10_spill] sm:$0xff] %v4856_v37  ;;  %v4862_v33 = vadd.f32 %v1281_v28, %v6677_v4  ;;  %v6684_v50 = vld [vmem:[#allocation54_spill] sm:$0xff]  ;;  %v1356_v15 = vmul.f32 %v6685_v59, %v6683_v17  ;;  %v6686_v43 = vld [vmem:[#allocation59_spill] sm:$0xff] }
 0x105   : > { %6672 = vst [vmem:[#allocation13_spill] sm:$0xff] %v4853_v6  ;;  %6676 = vst [vmem:[#allocation88_spill] sm:$0xff] %v4859_v54  ;;  %v1355_v1 = vmul.f32 %v6684_v50, %v6683_v17  ;;  %v1357_v32 = vmul.f32 %v6686_v43, %v6683_v17  ;;  %v6687_v57 = vld [vmem:[#allocation60_spill] sm:$0xff]  ;;  %v6689_v35 = vld [vmem:[#allocation65_spill] sm:$0xff] }
 0x106   : > { %6678 = vst [vmem:[#allocation8_spill] sm:$0xff] %v4862_v33  ;;  %6680 = vst [vmem:[#allocation9_spill] sm:$0xff] %v4865_v30  ;;  %v1358_v28 = vmul.f32 %v6687_v57, %v6683_v17  ;;  %v6688_v38 = vld [vmem:[#allocation64_spill] sm:$0xff]  ;;  %v1360_v27 = vmul.f32 %v6689_v35, %v6683_v17  ;;  %v6690_v36 = vld [vmem:[#allocation69_spill] sm:$0xff] }
 0x107   : > { %6682 = vst [vmem:[#allocation28_spill] sm:$0xff] %v4868_v47  ;;  %v1359_v55 = vmul.f32 %v6688_v38, %v6683_v17  ;;  %v1361_v8 = vmul.f32 %v6690_v36, %v6683_v17  ;;  %v6691_v13 = vld [vmem:[#allocation70_spill] sm:$0xff]  ;;  %v6693_v31 = vld [vmem:[#allocation75_spill] sm:$0xff]  ;;  %v6695_v48 = vld [vmem:[#allocation80_spill] sm:$0xff] }
 0x108   : > { %v1362_v44 = vmul.f32 %v6691_v13, %v6683_v17  ;;  %v6692_v7 = vld [vmem:[#allocation74_spill] sm:$0xff]  ;;  %v1364_v56 = vmul.f32 %v6693_v31, %v6683_v17  ;;  %v6694_v20 = vld [vmem:[#allocation79_spill] sm:$0xff]  ;;  %v1366_v5 = vmul.f32 %v6695_v48, %v6683_v17  ;;  %v6701_v13 = vld [vmem:[#allocation52_spill] sm:$0xff] }
 0x109   : > { %v1363_v11 = vmul.f32 %v6692_v7, %v6683_v17  ;;  %v1365_v34 = vmul.f32 %v6694_v20, %v6683_v17  ;;  %v6696_v12 = vld [vmem:[#allocation38_spill] sm:$0xff]  ;;  %v6697_v29 = vld [vmem:[#allocation39_spill] sm:$0xff]  ;;  %v1370_v7 = vmul.f32 %v6699_v23, %v6683_v17  ;;  %v1371_v20 = vmul.f32 %v6701_v13, %v6683_v17  ;;  %v6702_v36 = vld [vmem:[#allocation53_spill] sm:$0xff] }
 0x10a   : > { %v1367_v14 = vmul.f32 %v6696_v12, %v6683_v17  ;;  %v1368_v4 = vmul.f32 %v6697_v29, %v6683_v17  ;;  %v6698_v0 = vld [vmem:[#allocation43_spill] sm:$0xff]  ;;  %v1372_v48 = vmul.f32 %v6702_v36, %v6683_v17  ;;  %v6703_v35 = vld [vmem:[#allocation57_spill] sm:$0xff]  ;;  %v6705_v57 = vld [vmem:[#allocation66_spill] sm:$0xff] }
 0x10b   : > { %v1369_v40 = vmul.f32 %v6698_v0, %v6683_v17  ;;  %v4903_v31 = vld [vmem:[%s2763_s5 + $0x198] sm:$0xff]  ;;  %v1373_v12 = vmul.f32 %v6703_v35, %v6683_v17  ;;  %v6704_v38 = vld [vmem:[#allocation61_spill] sm:$0xff]  ;;  %v1375_v0 = vmul.f32 %v6705_v57, %v6683_v17  ;;  %v6707_v59 = vld [vmem:[#allocation72_spill] sm:$0xff] }
 0x10c   : > { %6700 = vst [vmem:[#allocation29_spill] sm:$0xff] %v4903_v31  ;;  %v1374_v29 = vmul.f32 %v6704_v38, %v6683_v17  ;;  %v6706_v43 = vld [vmem:[#allocation67_spill] sm:$0xff]  ;;  %v1377_v50 = vmul.f32 %v6707_v59, %v6683_v17  ;;  %v6708_v13 = vld [vmem:[#allocation76_spill] sm:$0xff]  ;;  %v6710_v36 = vld [vmem:[#allocation81_spill] sm:$0xff]  ;;  %v1385_v41 = vmul.f32 %v6683_v17, %v4903_v31  ;;  %v4956_v31 = vadd.f32 %v1360_v27, %v4787_v9 }
 0x10d   : > { %v1376_v23 = vmul.f32 %v6706_v43, %v6683_v17  ;;  %v1378_v47 = vmul.f32 %v6708_v13, %v6683_v17  ;;  %v4922_v30 = vld [vmem:[%s2763_s5 + $0x1a0] sm:$0xff]  ;;  %v1379_v35 = vmul.f32 %v6710_v36, %v6683_v17  ;;  %v6711_v33 = vld [vmem:[#allocation82_spill] sm:$0xff]  ;;  %v6712_v54 = vld [vmem:[#allocation85_spill] sm:$0xff]  ;;  %v4977_v9 = vadd.f32 %v1367_v14, %v4811_v62 }
 0x10e   : > { %6709 = vst [vmem:[#allocation14_spill] sm:$0xff] %v4922_v30  ;;  %v1380_v38 = vmul.f32 %v6711_v33, %v6683_v17  ;;  %v1381_v57 = vmul.f32 %v6712_v54, %v6683_v17  ;;  %v6713_v37 = vld [vmem:[#allocation18_spill] sm:$0xff]  ;;  %v6714_v6 = vld [vmem:[#allocation33_spill] sm:$0xff]  ;;  %v1386_v36 = vmul.f32 %v6683_v17, %v4922_v30  ;;  %v4941_v33 = vadd.f32 %v1355_v1, %v4765_v10 }
 0x10f   : > { %v1382_v43 = vmul.f32 %v6713_v37, %v6683_v17  ;;  %v1383_v59 = vmul.f32 %v6683_v17, %v6714_v6  ;;  %v6715_v58 = vld [vmem:[#allocation34_spill] sm:$0xff]  ;;  %v4944_v54 = vadd.f32 %v1356_v15, %v4769_v42  ;;  %v4947_v37 = vadd.f32 %v1357_v32, %v4775_v45  ;;  %6720 = vst [vmem:[#allocation21_spill] sm:$0xff] %v4956_v31 }
 0x110   : > { %v1384_v13 = vmul.f32 %v6683_v17, %v6715_v58  ;;  %v4950_v6 = vadd.f32 %v1358_v28, %v4779_v60  ;;  %v4953_v58 = vadd.f32 %v1359_v55, %v4783_v2  ;;  %v4959_v17 = vadd.f32 %v1361_v8, %v4791_v3  ;;  %6727 = vst [vmem:[#allocation30_spill] sm:$0xff] %v4977_v9  ;;  %v6753_v55 = vld [vmem:[#allocation28_spill] sm:$0xff]  ;;  %v6756_v27 = vld [vmem:[#allocation54_spill] sm:$0xff] }
 0x111   : > { %6716 = vst [vmem:[#allocation19_spill] sm:$0xff] %v4944_v54  ;;  %6717 = vst [vmem:[#allocation15_spill] sm:$0xff] %v4947_v37  ;;  %v4962_v10 = vadd.f32 %v1362_v44, %v4795_v22  ;;  %v4965_v42 = vadd.f32 %v1363_v11, %v4799_v19  ;;  %v4968_v45 = vadd.f32 %v1364_v56, %v4802_v18  ;;  %v6799_v9 = vld [vmem:[#allocation34_spill] sm:$0xff] }
 0x112   : > { %6718 = vst [vmem:[#allocation16_spill] sm:$0xff] %v4950_v6  ;;  %6719 = vst [vmem:[#allocation20_spill] sm:$0xff] %v4953_v58  ;;  %v4971_v60 = vadd.f32 %v1365_v34, %v4805_v26  ;;  %v4974_v2 = vadd.f32 %v1366_v5, %v4808_v21  ;;  %v4980_v3 = vadd.f32 %v1368_v4, %v4814_v25 }
 0x113   : > { %6721 = vst [vmem:[#allocation22_spill] sm:$0xff] %v4959_v17  ;;  %6722 = vst [vmem:[#allocation23_spill] sm:$0xff] %v4962_v10  ;;  %v4983_v22 = vadd.f32 %v1369_v40, %v4817_v16  ;;  %v4986_v19 = vadd.f32 %v1370_v7, %v4820_v52  ;;  %v4989_v18 = vadd.f32 %v1371_v20, %v4823_v49 }
 0x114   : > { %6723 = vst [vmem:[#allocation24_spill] sm:$0xff] %v4965_v42  ;;  %6724 = vst [vmem:[#allocation25_spill] sm:$0xff] %v4968_v45  ;;  %v4992_v26 = vadd.f32 %v1372_v48, %v4826_v63  ;;  %v4995_v21 = vadd.f32 %v1373_v12, %v4829_v46  ;;  %v4998_v62 = vadd.f32 %v1374_v29, %v4832_v61  ;;  %v6739_v63 = vld [vmem:[#allocation17_spill] sm:$0xff]  ;;  %v6741_v46 = vld [vmem:[#allocation12_spill] sm:$0xff] }
 0x115   : > { %6725 = vst [vmem:[#allocation26_spill] sm:$0xff] %v4971_v60  ;;  %6726 = vst [vmem:[#allocation27_spill] sm:$0xff] %v4974_v2  ;;  %v5001_v25 = vadd.f32 %v1375_v0, %v4835_v39  ;;  %v5004_v16 = vadd.f32 %v1376_v23, %v4838_v24  ;;  %v5007_v52 = vadd.f32 %v1377_v50, %v4841_v53  ;;  %v6743_v61 = vld [vmem:[#allocation13_spill] sm:$0xff]  ;;  %v6745_v39 = vld [vmem:[#allocation10_spill] sm:$0xff] }
 0x116   : > { %6728 = vst [vmem:[#allocation31_spill] sm:$0xff] %v4980_v3  ;;  %6729 = vst [vmem:[#allocation32_spill] sm:$0xff] %v4983_v22  ;;  %v5010_v49 = vadd.f32 %v1378_v47, %v4844_v51  ;;  %v5013_v1 = vadd.f32 %v1379_v35, %v6739_v63  ;;  %v5016_v15 = vadd.f32 %v1380_v38, %v6741_v46  ;;  %v6747_v23 = vld [vmem:[#allocation88_spill] sm:$0xff]  ;;  %v6751_v51 = vld [vmem:[#allocation9_spill] sm:$0xff] }
 0x117   : > { %6730 = vst [vmem:[#allocation35_spill] sm:$0xff] %v4986_v19  ;;  %6731 = vst [vmem:[#allocation36_spill] sm:$0xff] %v4989_v18  ;;  %v5019_v32 = vadd.f32 %v1381_v57, %v6743_v61  ;;  %v5022_v28 = vadd.f32 %v1382_v43, %v6745_v39  ;;  %v5025_v24 = vadd.f32 %v1383_v59, %v6747_v23  ;;  %v6749_v53 = vld [vmem:[#allocation8_spill] sm:$0xff]  ;;  %v6755_v38 = vld [vmem:[#allocation51_spill] sm:$0xff] }
 0x118   : > { %6732 = vst [vmem:[#allocation37_spill] sm:$0xff] %v4992_v26  ;;  %6733 = vst [vmem:[#allocation44_spill] sm:$0xff] %v4995_v21  ;;  %v5028_v50 = vadd.f32 %v1384_v13, %v6749_v53  ;;  %v5031_v47 = vadd.f32 %v1385_v41, %v6751_v51  ;;  %v5034_v35 = vadd.f32 %v1386_v36, %v6753_v55  ;;  %v6757_v57 = vld [vmem:[#allocation55_spill] sm:$0xff]  ;;  %v6758_v43 = vld [vmem:[#allocation68_spill] sm:$0xff] }
 0x119   : > { %6734 = vst [vmem:[#allocation40_spill] sm:$0xff] %v4998_v62  ;;  %6735 = vst [vmem:[#allocation41_spill] sm:$0xff] %v5001_v25  ;;  %v1423_v8 = vmul.f32 %v6756_v27, %v6755_v38  ;;  %v1424_v44 = vmul.f32 %v6757_v57, %v6755_v38  ;;  %v1425_v7 = vmul.f32 %v6758_v43, %v6755_v38  ;;  %v6759_v59 = vld [vmem:[#allocation59_spill] sm:$0xff]  ;;  %v6760_v13 = vld [vmem:[#allocation60_spill] sm:$0xff] }
 0x11a   : > { %6736 = vst [vmem:[#allocation49_spill] sm:$0xff] %v5004_v16  ;;  %6737 = vst [vmem:[#allocation45_spill] sm:$0xff] %v5007_v52  ;;  %v1426_v11 = vmul.f32 %v6759_v59, %v6755_v38  ;;  %v1427_v56 = vmul.f32 %v6760_v13, %v6755_v38  ;;  %v6761_v41 = vld [vmem:[#allocation73_spill] sm:$0xff]  ;;  %v6762_v36 = vld [vmem:[#allocation64_spill] sm:$0xff] }
 0x11b   : > { %6738 = vst [vmem:[#allocation46_spill] sm:$0xff] %v5010_v49  ;;  %6740 = vst [vmem:[#allocation58_spill] sm:$0xff] %v5013_v1  ;;  %v1428_v20 = vmul.f32 %v6761_v41, %v6755_v38  ;;  %v1429_v34 = vmul.f32 %v6762_v36, %v6755_v38  ;;  %v6763_v48 = vld [vmem:[#allocation65_spill] sm:$0xff]  ;;  %v6764_v12 = vld [vmem:[#allocation78_spill] sm:$0xff]  ;;  %v1519_v45 = vrot.slane %v1423_v8, 1  ;;  %v1520_v42 = vrot.slane %v1424_v44, 1 }
 0x11c   : > { %6742 = vst [vmem:[#allocation50_spill] sm:$0xff] %v5016_v15  ;;  %6744 = vst [vmem:[#allocation17_spill] sm:$0xff] %v5019_v32  ;;  %v1430_v5 = vmul.f32 %v6763_v48, %v6755_v38  ;;  %v1431_v14 = vmul.f32 %v6764_v12, %v6755_v38  ;;  %v6765_v29 = vld [vmem:[#allocation69_spill] sm:$0xff]  ;;  %v6766_v0 = vld [vmem:[#allocation70_spill] sm:$0xff]  ;;  %v1524_v10 = vrot.slane %v1426_v11, 1  ;;  %v1525_v17 = vrot.slane %v1427_v56, 1 }
 0x11d   : > { %6746 = vst [vmem:[#allocation12_spill] sm:$0xff] %v5022_v28  ;;  %6748 = vst [vmem:[#allocation13_spill] sm:$0xff] %v5025_v24  ;;  %v1432_v4 = vmul.f32 %v6765_v29, %v6755_v38  ;;  %v5058_v40 = vmul.f32 %v6766_v0, %v6755_v38  ;;  %v6767_v63 = vld [vmem:[#allocation83_spill] sm:$0xff]  ;;  %v6768_v61 = vld [vmem:[#allocation74_spill] sm:$0xff]  ;;  %v1527_v31 = vrot.slane %v1428_v20, 1  ;;  %v5212_v6 = vsel %vm405_vm0, %v1519_v45, %v1520_v42 }
 0x11e   : > { %6750 = vst [vmem:[#allocation10_spill] sm:$0xff] %v5028_v50  ;;  %6752 = vst [vmem:[#allocation88_spill] sm:$0xff] %v5031_v47  ;;  %v5062_v46 = vmul.f32 %v6767_v63, %v6755_v38  ;;  %v5066_v39 = vmul.f32 %v6768_v61, %v6755_v38  ;;  %v6769_v23 = vld [vmem:[#allocation75_spill] sm:$0xff]  ;;  %v6770_v51 = vld [vmem:[#allocation86_spill] sm:$0xff]  ;;  %v1530_v58 = vrot.slane %v1430_v5, 1  ;;  %v5218_v54 = vsel %vm405_vm0, %v1524_v10, %v1525_v17 }
 0x11f   : > { %6754 = vst [vmem:[#allocation8_spill] sm:$0xff] %v5034_v35  ;;  %v5070_v53 = vmul.f32 %v6769_v23, %v6755_v38  ;;  %v5074_v55 = vmul.f32 %v6770_v51, %v6755_v38  ;;  %v6771_v29 = vld [vmem:[#allocation79_spill] sm:$0xff]  ;;  %v6772_v12 = vld [vmem:[#allocation80_spill] sm:$0xff]  ;;  %v6774_v23 = vld [vmem:[#allocation38_spill] sm:$0xff]  ;;  %v1534_v37 = vrot.slane %v1432_v4, 1  ;;  %v1535_v44 = vrot.slane %v5058_v40, 1 }
 0x120   : > { %v5078_v0 = vmul.f32 %v6771_v29, %v6755_v38  ;;  %v5082_v63 = vmul.f32 %v6772_v12, %v6755_v38  ;;  %v6773_v48 = vld [vmem:[#allocation87_spill] sm:$0xff]  ;;  %v5090_v36 = vmul.f32 %v6774_v23, %v6755_v38  ;;  %v6776_v29 = vld [vmem:[#allocation42_spill] sm:$0xff]  ;;  %v6779_v57 = vld [vmem:[#allocation48_spill] sm:$0xff]  ;;  %v1537_v45 = vrot.slane %v5062_v46, 1 }
 0x121   : > { %v5086_v61 = vmul.f32 %v6773_v48, %v6755_v38  ;;  %v6775_v51 = vld [vmem:[#allocation39_spill] sm:$0xff]  ;;  %v5098_v13 = vmul.f32 %v6776_v29, %v6755_v38  ;;  %v5110_v23 = vmul.f32 %v6779_v57, %v6755_v38  ;;  %v6780_v27 = vld [vmem:[#allocation52_spill] sm:$0xff]  ;;  %v6781_v35 = vld [vmem:[#allocation53_spill] sm:$0xff]  ;;  %v1540_v11 = vrot.slane %v5070_v53, 1 }
 0x122   : > { %v5094_v41 = vmul.f32 %v6775_v51, %v6755_v38  ;;  %v6777_v12 = vld [vmem:[#allocation43_spill] sm:$0xff]  ;;  %v5114_v51 = vmul.f32 %v6780_v27, %v6755_v38  ;;  %v5118_v29 = vmul.f32 %v6781_v35, %v6755_v38  ;;  %v6782_v47 = vld [vmem:[#allocation56_spill] sm:$0xff]  ;;  %v6783_v50 = vld [vmem:[#allocation57_spill] sm:$0xff]  ;;  %v5234_v10 = vsel %vm405_vm0, %v1534_v37, %v1535_v44 }
 0x123   : > { %v5102_v59 = vmul.f32 %v6777_v12, %v6755_v38  ;;  %v6778_v43 = vld [vmem:[#allocation47_spill] sm:$0xff]  ;;  %v5122_v12 = vmul.f32 %v6782_v47, %v6755_v38  ;;  %v6784_v24 = vld [vmem:[#allocation61_spill] sm:$0xff]  ;;  %v6785_v28 = vld [vmem:[#allocation62_spill] sm:$0xff]  ;;  %v1545_v56 = vrot.slane %v5082_v63, 1  ;;  %v5240_v20 = vsel %vm405_vm0, %v1535_v44, %v1537_v45 }
 0x124   : > { %v5106_v48 = vmul.f32 %v6778_v43, %v6755_v38  ;;  %v5126_v43 = vmul.f32 %v6783_v50, %v6755_v38  ;;  %v5130_v57 = vmul.f32 %v6784_v24, %v6755_v38  ;;  %v5134_v27 = vmul.f32 %v6785_v28, %v6755_v38  ;;  %v6786_v32 = vld [vmem:[#allocation66_spill] sm:$0xff]  ;;  %v6787_v15 = vld [vmem:[#allocation67_spill] sm:$0xff]  ;;  %v5145_v1 = vld [vmem:[%s2763_s5 + $0x1a8] sm:$0x3] }
 0x125   : > { %v5138_v35 = vmul.f32 %v6786_v32, %v6755_v38  ;;  %v5142_v47 = vmul.f32 %v6787_v15, %v6755_v38  ;;  %v6788_v50 = vld [vmem:[#allocation71_spill] sm:$0xff]  ;;  %v6789_v24 = vld [vmem:[#allocation72_spill] sm:$0xff]  ;;  %v6791_v32 = vld [vmem:[#allocation77_spill] sm:$0xff]  ;;  %v1552_v4 = vrot.slane %v5098_v13, 1  ;;  %v1554_v40 = vrot.slane %v5102_v59, 1 }
 0x126   : > { %v5149_v49 = vmul.f32 %v6788_v50, %v6755_v38  ;;  %v5153_v52 = vmul.f32 %v6789_v24, %v6755_v38  ;;  %v6790_v28 = vld [vmem:[#allocation76_spill] sm:$0xff]  ;;  %v5161_v25 = vmul.f32 %v6791_v32, %v6755_v38  ;;  %v6792_v15 = vld [vmem:[#allocation81_spill] sm:$0xff]  ;;  %v6793_v21 = vld [vmem:[#allocation82_spill] sm:$0xff]  ;;  %v1555_v63 = vrot.slane %v5106_v48, 1 }
 0x127   : > { %v5157_v16 = vmul.f32 %v6790_v28, %v6755_v38  ;;  %v5165_v62 = vmul.f32 %v6792_v15, %v6755_v38  ;;  %v5169_v50 = vmul.f32 %v6793_v21, %v6755_v38  ;;  %v6794_v26 = vld [vmem:[#allocation84_spill] sm:$0xff]  ;;  %v6795_v18 = vld [vmem:[#allocation85_spill] sm:$0xff]  ;;  %v6796_v19 = vld [vmem:[#allocation18_spill] sm:$0xff]  ;;  %v1557_v46 = vrot.slane %v5110_v23, 1 }
 0x128   : > { %v5173_v24 = vmul.f32 %v6794_v26, %v6755_v38  ;;  %v5177_v28 = vmul.f32 %v6795_v18, %v6755_v38  ;;  %v5181_v32 = vmul.f32 %v6796_v19, %v6755_v38  ;;  %v6797_v22 = vld [vmem:[#allocation11_spill] sm:$0xff]  ;;  %v6798_v3 = vld [vmem:[#allocation33_spill] sm:$0xff]  ;;  %v5193_v26 = vmul.f32 %v6755_v38, %v6799_v9 }
 0x129   : > { %v5185_v15 = vmul.f32 %v6797_v22, %v6755_v38  ;;  %v5189_v21 = vmul.f32 %v6755_v38, %v6798_v3  ;;  %v6800_v2 = vld [vmem:[#allocation89_spill] sm:$0xff]  ;;  %v5205_v22 = vmul.f32 %v6755_v38, %v4922_v30  ;;  %v5209_v3 = vmul.f32 %v6755_v38, %v5145_v1 }
 0x12a   : > { %v5197_v18 = vmul.f32 %v6755_v38, %v6800_v2  ;;  %v6801_v60 = vld [vmem:[#allocation29_spill] sm:$0xff]  ;;  %v1522_v9 = vrot.slane %v1425_v7, 1  ;;  %v1529_v2 = vrot.slane %v1429_v34, 1  ;;  %v1532_v30 = vrot.slane %v1431_v14, 1 }
 0x12b   : > { %v5201_v19 = vmul.f32 %v6755_v38, %v6801_v60  ;;  %v5221_v38 = vsel %vm405_vm0, %v1525_v17, %v1527_v31  ;;  %v1542_v31 = vrot.slane %v5074_v55, 1  ;;  %v1544_v17 = vrot.slane %v5078_v0, 1 }
 0x12c   : > { %v5215_v60 = vsel %vm405_vm0, %v1520_v42, %v1522_v9  ;;  %v5224_v8 = vsel %vm405_vm0, %v1529_v2, %v1530_v58  ;;  %v5228_v7 = vsel %vm405_vm0, %v1530_v58, %v1532_v30  ;;  %v1539_v42 = vrot.slane %v5066_v39, 1 }
 0x12d   : > { %v1547_v30 = vrot.slane %v5086_v61, 1  ;;  %v1549_v34 = vrot.slane %v5090_v36, 1  ;;  %v1543_v5 = vsel %vm405_vm0, %v1540_v11, %v1542_v31  ;;  %v1546_v37 = vsel %vm405_vm0, %v1544_v17, %v1545_v56 }
 0x12e   : > { %v5243_v58 = vsel %vm405_vm0, %v1539_v42, %v1540_v11  ;;  %v1550_v14 = vrot.slane %v5094_v41, 1  ;;  %v1559_v39 = vrot.slane %v5114_v51, 1  ;;  %v1560_v53 = vrot.slane %v5118_v29, 1 }
 0x12f   : > { %v1548_v0 = vsel %vm405_vm0, %v1545_v56, %v1547_v30  ;;  %v1556_v41 = vsel %vm405_vm0, %v1554_v40, %v1555_v63  ;;  %v1558_v13 = vsel %vm405_vm0, %v1555_v63, %v1557_v46  ;;  %v1562_v55 = vrot.slane %v5122_v12, 1  ;;  %v6803_v46 = vld [vmem:[#allocation15_spill] sm:$0xff] }
 0x130   : > { %v1551_v61 = vsel %vm405_vm0, %v1549_v34, %v1550_v14  ;;  %v1553_v36 = vsel %vm405_vm0, %v1550_v14, %v1552_v4  ;;  %v1564_v59 = vrot.slane %v5126_v43, 1  ;;  %v1561_v48 = vsel %vm405_vm0, %v1559_v39, %v1560_v53 }
 0x131   : > { %v1565_v23 = vrot.slane %v5130_v57, 1  ;;  %v1567_v9 = vrot.slane %v5134_v27, 1  ;;  %v1569_v2 = vrot.slane %v5138_v35, 1  ;;  %v1563_v51 = vsel %vm405_vm0, %v1560_v53, %v1562_v55  ;;  %v6807_v53 = vld [vmem:[#allocation20_spill] sm:$0xff]  ;;  %v6811_v55 = vld [vmem:[#allocation22_spill] sm:$0xff] }
 0x132   : > { %v1570_v29 = vrot.slane %v5142_v47, 1  ;;  %v1572_v44 = vrot.slane %v5149_v49, 1  ;;  %v1574_v45 = vrot.slane %v5153_v52, 1  ;;  %v1575_v42 = vrot.slane %v5157_v16, 1 }
 0x133   : > { %v1566_v12 = vsel %vm405_vm0, %v1564_v59, %v1565_v23  ;;  %v1568_v43 = vsel %vm405_vm0, %v1565_v23, %v1567_v9  ;;  %v1577_v57 = vrot.slane %v5161_v25, 1  ;;  %v1579_v11 = vrot.slane %v5165_v62, 1  ;;  %v6813_v23 = vld [vmem:[#allocation23_spill] sm:$0xff]  ;;  %v6815_v9 = vld [vmem:[#allocation24_spill] sm:$0xff] }
 0x134   : > { %v1571_v27 = vsel %vm405_vm0, %v1569_v2, %v1570_v29  ;;  %v1573_v35 = vsel %vm405_vm0, %v1570_v29, %v1572_v44  ;;  %v1580_v47 = vrot.slane %v5169_v50, 1  ;;  %v1576_v49 = vsel %vm405_vm0, %v1574_v45, %v1575_v42  ;;  %v6817_v2 = vld [vmem:[#allocation25_spill] sm:$0xff] }
 0x135   : > { %v1578_v52 = vsel %vm405_vm0, %v1575_v42, %v1577_v57  ;;  %v1582_v31 = vrot.slane %v5173_v24, 1  ;;  %v1584_v17 = vrot.slane %v5177_v28, 1  ;;  %v1585_v25 = vrot.slane %v5181_v32, 1  ;;  %v6823_v42 = vld [vmem:[#allocation30_spill] sm:$0xff]  ;;  %v6825_v57 = vld [vmem:[#allocation31_spill] sm:$0xff] }
 0x136   : > { %v1581_v16 = vsel %vm405_vm0, %v1579_v11, %v1580_v47  ;;  %v1587_v56 = vrot.slane %v5185_v15, 1  ;;  %v1589_v30 = vrot.slane %v5189_v21, 1  ;;  %v1590_v50 = vrot.slane %v5193_v26, 1  ;;  %v6802_v26 = vld [vmem:[#allocation19_spill] sm:$0xff] }
 0x137   : > { %v1583_v62 = vsel %vm405_vm0, %v1580_v47, %v1582_v31  ;;  %v1592_v34 = vrot.slane %v5197_v18, 1  ;;  %v1594_v14 = vrot.slane %v5201_v19, 1  ;;  %v1586_v24 = vsel %vm405_vm0, %v1584_v17, %v1585_v25 }
 0x138   : > { %v1588_v28 = vsel %vm405_vm0, %v1585_v25, %v1587_v56  ;;  %v1595_v4 = vrot.slane %v5205_v22, 1  ;;  %v1597_v32 = vrot.slane %v5209_v3, 1  ;;  %v1591_v15 = vsel %vm405_vm0, %v1589_v30, %v1590_v50  ;;  %v6805_v3 = vld [vmem:[#allocation16_spill] sm:$0xff] }
 0x139   : > { %v1593_v21 = vsel %vm405_vm0, %v1590_v50, %v1592_v34  ;;  %v5299_v40 = vadd.f32 %v5212_v6, %v4941_v33  ;;  %v5303_v18 = vadd.f32 %v5215_v60, %v6802_v26  ;;  %v5309_v22 = vadd.f32 %v5218_v54, %v6803_v46  ;;  %v6809_v33 = vld [vmem:[#allocation21_spill] sm:$0xff] }
 0x13a   : > { %v1596_v19 = vsel %vm405_vm0, %v1594_v14, %v1595_v4  ;;  %v1598_v63 = vsel %vm405_vm0, %v1595_v4, %v1597_v32  ;;  %v5313_v39 = vadd.f32 %v5221_v38, %v6805_v3  ;;  %v5317_v6 = vadd.f32 %v5224_v8, %v6807_v53  ;;  %v6819_v8 = vld [vmem:[#allocation26_spill] sm:$0xff] }
 0x13b   : > { %6804 = vst [vmem:[#allocation9_spill] sm:$0xff] %v5309_v22  ;;  %v5321_v60 = vadd.f32 %v5228_v7, %v6809_v33  ;;  %v5325_v59 = vadd.f32 %v5234_v10, %v6811_v55  ;;  %v5329_v54 = vadd.f32 %v5240_v20, %v6813_v23  ;;  %v5333_v38 = vadd.f32 %v5243_v58, %v6815_v9  ;;  %v6821_v7 = vld [vmem:[#allocation27_spill] sm:$0xff]  ;;  %v6827_v20 = vld [vmem:[#allocation32_spill] sm:$0xff]  ;;  %v6864_v9 = vld [vmem:[#allocation54_spill] sm:$0xff] }
 0x13c   : > { %6806 = vst [vmem:[#allocation28_spill] sm:$0xff] %v5313_v39  ;;  %6808 = vst [vmem:[#allocation51_spill] sm:$0xff] %v5317_v6  ;;  %v5336_v29 = vadd.f32 %v1543_v5, %v6817_v2  ;;  %v5339_v44 = vadd.f32 %v1546_v37, %v6819_v8  ;;  %v5342_v45 = vadd.f32 %v1548_v0, %v6821_v7  ;;  %v6829_v58 = vld [vmem:[#allocation35_spill] sm:$0xff]  ;;  %v6831_v5 = vld [vmem:[#allocation36_spill] sm:$0xff] }
 0x13d   : > { %6810 = vst [vmem:[#allocation33_spill] sm:$0xff] %v5321_v60  ;;  %6812 = vst [vmem:[#allocation34_spill] sm:$0xff] %v5325_v59  ;;  %v5345_v10 = vadd.f32 %v1551_v61, %v6823_v42  ;;  %v5348_v11 = vadd.f32 %v1553_v36, %v6825_v57  ;;  %v5351_v47 = vadd.f32 %v1556_v41, %v6827_v20  ;;  %v6833_v37 = vld [vmem:[#allocation37_spill] sm:$0xff]  ;;  %v6835_v0 = vld [vmem:[#allocation44_spill] sm:$0xff] }
 0x13e   : > { %6814 = vst [vmem:[#allocation89_spill] sm:$0xff] %v5329_v54  ;;  %6816 = vst [vmem:[#allocation19_spill] sm:$0xff] %v5333_v38  ;;  %v5354_v31 = vadd.f32 %v1558_v13, %v6829_v58  ;;  %v5357_v17 = vadd.f32 %v1561_v48, %v6831_v5  ;;  %v5360_v25 = vadd.f32 %v1563_v51, %v6833_v37  ;;  %v6837_v61 = vld [vmem:[#allocation40_spill] sm:$0xff]  ;;  %v6839_v36 = vld [vmem:[#allocation41_spill] sm:$0xff] }
 0x13f   : > { %6818 = vst [vmem:[#allocation15_spill] sm:$0xff] %v5336_v29  ;;  %6820 = vst [vmem:[#allocation16_spill] sm:$0xff] %v5339_v44  ;;  %v5363_v56 = vadd.f32 %v1566_v12, %v6835_v0  ;;  %v5366_v30 = vadd.f32 %v1568_v43, %v6837_v61  ;;  %v5369_v50 = vadd.f32 %v1571_v27, %v6839_v36  ;;  %v6841_v41 = vld [vmem:[#allocation49_spill] sm:$0xff]  ;;  %v6845_v48 = vld [vmem:[#allocation46_spill] sm:$0xff] }
 0x140   : > { %6822 = vst [vmem:[#allocation20_spill] sm:$0xff] %v5342_v45  ;;  %6824 = vst [vmem:[#allocation21_spill] sm:$0xff] %v5345_v10  ;;  %v5372_v34 = vadd.f32 %v1573_v35, %v6841_v41  ;;  %v6843_v13 = vld [vmem:[#allocation45_spill] sm:$0xff]  ;;  %v5378_v4 = vadd.f32 %v1578_v52, %v6845_v48  ;;  %v6847_v51 = vld [vmem:[#allocation58_spill] sm:$0xff] }
 0x141   : > { %6826 = vst [vmem:[#allocation22_spill] sm:$0xff] %v5348_v11  ;;  %6828 = vst [vmem:[#allocation23_spill] sm:$0xff] %v5351_v47  ;;  %v5375_v14 = vadd.f32 %v1576_v49, %v6843_v13  ;;  %v5381_v32 = vadd.f32 %v1581_v16, %v6847_v51  ;;  %v6849_v12 = vld [vmem:[#allocation50_spill] sm:$0xff]  ;;  %v6851_v43 = vld [vmem:[#allocation17_spill] sm:$0xff] }
 0x142   : > { %6830 = vst [vmem:[#allocation24_spill] sm:$0xff] %v5354_v31  ;;  %6832 = vst [vmem:[#allocation25_spill] sm:$0xff] %v5357_v17  ;;  %v5384_v26 = vadd.f32 %v1583_v62, %v6849_v12  ;;  %v5387_v46 = vadd.f32 %v1586_v24, %v6851_v43  ;;  %v6853_v27 = vld [vmem:[#allocation12_spill] sm:$0xff]  ;;  %v6855_v35 = vld [vmem:[#allocation13_spill] sm:$0xff] }
 0x143   : > { %6834 = vst [vmem:[#allocation26_spill] sm:$0xff] %v5360_v25  ;;  %6836 = vst [vmem:[#allocation27_spill] sm:$0xff] %v5363_v56  ;;  %v5390_v3 = vadd.f32 %v1588_v28, %v6853_v27  ;;  %v5393_v53 = vadd.f32 %v1591_v15, %v6855_v35  ;;  %v6857_v49 = vld [vmem:[#allocation10_spill] sm:$0xff]  ;;  %v6859_v52 = vld [vmem:[#allocation88_spill] sm:$0xff] }
 0x144   : > { %6838 = vst [vmem:[#allocation30_spill] sm:$0xff] %v5366_v30  ;;  %6840 = vst [vmem:[#allocation31_spill] sm:$0xff] %v5369_v50  ;;  %v5396_v33 = vadd.f32 %v1593_v21, %v6857_v49  ;;  %v5399_v55 = vadd.f32 %v1596_v19, %v6859_v52  ;;  %v6861_v16 = vld [vmem:[#allocation8_spill] sm:$0xff]  ;;  %v6863_v62 = vld [vmem:[#allocation63_spill] sm:$0xff] }
 0x145   : > { %6842 = vst [vmem:[#allocation32_spill] sm:$0xff] %v5372_v34  ;;  %6844 = vst [vmem:[#allocation35_spill] sm:$0xff] %v5375_v14  ;;  %v5402_v23 = vadd.f32 %v1598_v63, %v6861_v16  ;;  %v1667_v2 = vmul.f32 %v6864_v9, %v6863_v62  ;;  %v6865_v24 = vld [vmem:[#allocation55_spill] sm:$0xff]  ;;  %v6866_v28 = vld [vmem:[#allocation68_spill] sm:$0xff] }
 0x146   : > { %6846 = vst [vmem:[#allocation36_spill] sm:$0xff] %v5378_v4  ;;  %6848 = vst [vmem:[#allocation37_spill] sm:$0xff] %v5381_v32  ;;  %v1668_v8 = vmul.f32 %v6865_v24, %v6863_v62  ;;  %v1669_v7 = vmul.f32 %v6866_v28, %v6863_v62  ;;  %v6867_v15 = vld [vmem:[#allocation59_spill] sm:$0xff]  ;;  %v6868_v21 = vld [vmem:[#allocation60_spill] sm:$0xff] }
 0x147   : > { %6850 = vst [vmem:[#allocation44_spill] sm:$0xff] %v5384_v26  ;;  %6852 = vst [vmem:[#allocation40_spill] sm:$0xff] %v5387_v46  ;;  %v1670_v42 = vmul.f32 %v6867_v15, %v6863_v62  ;;  %v1671_v57 = vmul.f32 %v6868_v21, %v6863_v62  ;;  %v6869_v19 = vld [vmem:[#allocation73_spill] sm:$0xff]  ;;  %v6870_v63 = vld [vmem:[#allocation64_spill] sm:$0xff]  ;;  %v1763_v29 = vrot.slane %v1667_v2, 2 }
 0x148   : > { %6854 = vst [vmem:[#allocation41_spill] sm:$0xff] %v5390_v3  ;;  %6856 = vst [vmem:[#allocation49_spill] sm:$0xff] %v5393_v53  ;;  %v1672_v20 = vmul.f32 %v6869_v19, %v6863_v62  ;;  %v1673_v58 = vmul.f32 %v6870_v63, %v6863_v62  ;;  %v6871_v5 = vld [vmem:[#allocation65_spill] sm:$0xff]  ;;  %v6872_v0 = vld [vmem:[#allocation78_spill] sm:$0xff]  ;;  %v1764_v38 = vrot.slane %v1668_v8, 2 }
 0x149   : > { %6858 = vst [vmem:[#allocation45_spill] sm:$0xff] %v5396_v33  ;;  %6860 = vst [vmem:[#allocation46_spill] sm:$0xff] %v5399_v55  ;;  %v1674_v37 = vmul.f32 %v6871_v5, %v6863_v62  ;;  %v1675_v61 = vmul.f32 %v6872_v0, %v6863_v62  ;;  %v6873_v36 = vld [vmem:[#allocation69_spill] sm:$0xff]  ;;  %v6874_v13 = vld [vmem:[#allocation70_spill] sm:$0xff]  ;;  %v1768_v54 = vrot.slane %v1670_v42, 2  ;;  %v1769_v59 = vrot.slane %v1671_v57, 2 }
 0x14a   : > { %6862 = vst [vmem:[#allocation58_spill] sm:$0xff] %v5402_v23  ;;  %v5424_v41 = vmul.f32 %v6873_v36, %v6863_v62  ;;  %v5428_v48 = vmul.f32 %v6874_v13, %v6863_v62  ;;  %v6875_v51 = vld [vmem:[#allocation83_spill] sm:$0xff]  ;;  %v6876_v43 = vld [vmem:[#allocation74_spill] sm:$0xff]  ;;  %v6880_v28 = vld [vmem:[#allocation80_spill] sm:$0xff]  ;;  %v1771_v60 = vrot.slane %v1672_v20, 2  ;;  %v5579_v39 = vsel %vm650_vm1, %v1763_v29, %v1764_v38 }
 0x14b   : > { %v5432_v12 = vmul.f32 %v6875_v51, %v6863_v62  ;;  %v5436_v27 = vmul.f32 %v6876_v43, %v6863_v62  ;;  %v6877_v35 = vld [vmem:[#allocation75_spill] sm:$0xff]  ;;  %v6878_v52 = vld [vmem:[#allocation86_spill] sm:$0xff]  ;;  %v5452_v15 = vmul.f32 %v6880_v28, %v6863_v62  ;;  %v6887_v28 = vld [vmem:[#allocation48_spill] sm:$0xff]  ;;  %v1774_v6 = vrot.slane %v1674_v37, 2 }
 0x14c   : > { %v5440_v49 = vmul.f32 %v6877_v35, %v6863_v62  ;;  %v5444_v16 = vmul.f32 %v6878_v52, %v6863_v62  ;;  %v6879_v9 = vld [vmem:[#allocation79_spill] sm:$0xff]  ;;  %v6882_v63 = vld [vmem:[#allocation38_spill] sm:$0xff]  ;;  %v6889_v23 = vld [vmem:[#allocation53_spill] sm:$0xff]  ;;  %v1778_v22 = vrot.slane %v5424_v41, 2  ;;  %v1779_v8 = vrot.slane %v5428_v48, 2 }
 0x14d   : > { %v5448_v24 = vmul.f32 %v6879_v9, %v6863_v62  ;;  %v6881_v21 = vld [vmem:[#allocation87_spill] sm:$0xff]  ;;  %v5460_v5 = vmul.f32 %v6882_v63, %v6863_v62  ;;  %v6884_v13 = vld [vmem:[#allocation42_spill] sm:$0xff]  ;;  %v6888_v63 = vld [vmem:[#allocation52_spill] sm:$0xff]  ;;  %v1789_v57 = vrot.slane %v5452_v15, 2 }
 0x14e   : > { %v5456_v19 = vmul.f32 %v6881_v21, %v6863_v62  ;;  %v6883_v0 = vld [vmem:[#allocation39_spill] sm:$0xff]  ;;  %v5468_v51 = vmul.f32 %v6884_v13, %v6863_v62  ;;  %v5480_v21 = vmul.f32 %v6887_v28, %v6863_v62  ;;  %v5488_v13 = vmul.f32 %v6889_v23, %v6863_v62  ;;  %v6890_v55 = vld [vmem:[#allocation56_spill] sm:$0xff]  ;;  %v6891_v33 = vld [vmem:[#allocation57_spill] sm:$0xff] }
 0x14f   : > { %v5464_v36 = vmul.f32 %v6883_v0, %v6863_v62  ;;  %v6885_v43 = vld [vmem:[#allocation43_spill] sm:$0xff]  ;;  %v5484_v0 = vmul.f32 %v6888_v63, %v6863_v62  ;;  %v6892_v28 = vld [vmem:[#allocation61_spill] sm:$0xff]  ;;  %v6893_v63 = vld [vmem:[#allocation62_spill] sm:$0xff]  ;;  %v1784_v42 = vrot.slane %v5440_v49, 2  ;;  %v1793_v37 = vrot.slane %v5460_v5, 2 }
 0x150   : > { %v5472_v35 = vmul.f32 %v6885_v43, %v6863_v62  ;;  %v6886_v52 = vld [vmem:[#allocation47_spill] sm:$0xff]  ;;  %v5492_v43 = vmul.f32 %v6890_v55, %v6863_v62  ;;  %v5500_v53 = vmul.f32 %v6892_v28, %v6863_v62  ;;  %v5504_v3 = vmul.f32 %v6893_v63, %v6863_v62  ;;  %v6894_v23 = vld [vmem:[#allocation66_spill] sm:$0xff]  ;;  %v6897_v28 = vld [vmem:[#allocation72_spill] sm:$0xff] }
 0x151   : > { %v5476_v9 = vmul.f32 %v6886_v52, %v6863_v62  ;;  %v5496_v52 = vmul.f32 %v6891_v33, %v6863_v62  ;;  %v5508_v46 = vmul.f32 %v6894_v23, %v6863_v62  ;;  %v6895_v55 = vld [vmem:[#allocation67_spill] sm:$0xff]  ;;  %v5520_v4 = vmul.f32 %v6897_v28, %v6863_v62  ;;  %v6898_v63 = vld [vmem:[#allocation76_spill] sm:$0xff]  ;;  %v6899_v23 = vld [vmem:[#allocation77_spill] sm:$0xff] }
 0x152   : > { %v5512_v26 = vmul.f32 %v6895_v55, %v6863_v62  ;;  %v6896_v33 = vld [vmem:[#allocation71_spill] sm:$0xff]  ;;  %v5524_v14 = vmul.f32 %v6898_v63, %v6863_v62  ;;  %v5528_v34 = vmul.f32 %v6899_v23, %v6863_v62  ;;  %v6900_v50 = vld [vmem:[#allocation81_spill] sm:$0xff]  ;;  %v6901_v30 = vld [vmem:[#allocation82_spill] sm:$0xff]  ;;  %v1794_v41 = vrot.slane %v5464_v36, 2 }
 0x153   : > { %v5516_v32 = vmul.f32 %v6896_v33, %v6863_v62  ;;  %v5532_v55 = vmul.f32 %v6900_v50, %v6863_v62  ;;  %v5536_v33 = vmul.f32 %v6901_v30, %v6863_v62  ;;  %v6902_v56 = vld [vmem:[#allocation84_spill] sm:$0xff]  ;;  %v6903_v25 = vld [vmem:[#allocation85_spill] sm:$0xff]  ;;  %v6904_v17 = vld [vmem:[#allocation18_spill] sm:$0xff]  ;;  %v1796_v48 = vrot.slane %v5468_v51, 2 }
 0x154   : > { %v5540_v28 = vmul.f32 %v6902_v56, %v6863_v62  ;;  %v5544_v63 = vmul.f32 %v6903_v25, %v6863_v62  ;;  %v5548_v23 = vmul.f32 %v6904_v17, %v6863_v62  ;;  %v6905_v31 = vld [vmem:[#allocation11_spill] sm:$0xff]  ;;  %v2570_v11 = vld [vmem:[%s2763_s5 + $0x188] sm:$0xff]  ;;  %v2571_v10 = vld [vmem:[%s2763_s5 + $0x190] sm:$0x3]  ;;  %v1799_v49 = vrot.slane %v5476_v9, 2 }
 0x155   : > { %v5552_v50 = vmul.f32 %v6905_v31, %v6863_v62  ;;  %v2569_v47 = vld [vmem:[%s2763_s5 + $0x180] sm:$0xff]  ;;  %v5560_v56 = vmul.f32 %v2570_v11, %v6863_v62  ;;  %v5564_v25 = vmul.f32 %v2571_v10, %v6863_v62  ;;  %v6906_v45 = vld [vmem:[#allocation29_spill] sm:$0xff]  ;;  %v6907_v44 = vld [vmem:[#allocation14_spill] sm:$0xff]  ;;  %v1766_v11 = vrot.slane %v1669_v7, 2 }
 0x156   : > { %v5556_v30 = vmul.f32 %v2569_v47, %v6863_v62  ;;  %v5568_v17 = vmul.f32 %v6863_v62, %v6906_v45  ;;  %v5572_v31 = vmul.f32 %v6863_v62, %v6907_v44  ;;  %v5576_v47 = vmul.f32 %v6863_v62, %v5145_v1 }
 0x157   : > { %v1773_v10 = vrot.slane %v1673_v58, 2  ;;  %v5582_v45 = vsel %vm650_vm1, %v1764_v38, %v1766_v11  ;;  %v1776_v44 = vrot.slane %v1675_v61, 2  ;;  %v5586_v1 = vsel %vm650_vm1, %v1768_v54, %v1769_v59 }
 0x158   : > { %v5589_v62 = vsel %vm650_vm1, %v1769_v59, %v1771_v60  ;;  %v1781_v38 = vrot.slane %v5432_v12, 2  ;;  %v1783_v7 = vrot.slane %v5436_v27, 2  ;;  %v5602_v54 = vsel %vm650_vm1, %v1778_v22, %v1779_v8 }
 0x159   : > { %v5592_v2 = vsel %vm650_vm1, %v1773_v10, %v1774_v6  ;;  %v5596_v29 = vsel %vm650_vm1, %v1774_v6, %v1776_v44  ;;  %v1786_v60 = vrot.slane %v5444_v16, 2  ;;  %v1788_v59 = vrot.slane %v5448_v24, 2 }
 0x15a   : > { %v5608_v20 = vsel %vm650_vm1, %v1779_v8, %v1781_v38  ;;  %v5611_v6 = vsel %vm650_vm1, %v1783_v7, %v1784_v42  ;;  %v1791_v58 = vrot.slane %v5456_v19, 2  ;;  %v1798_v27 = vrot.slane %v5472_v35, 2 }
 0x15b   : > { %v5616_v61 = vsel %vm650_vm1, %v1784_v42, %v1786_v60  ;;  %v5619_v22 = vsel %vm650_vm1, %v1788_v59, %v1789_v57  ;;  %v1801_v16 = vrot.slane %v5480_v21, 2  ;;  %v1795_v24 = vsel %vm650_vm1, %v1793_v37, %v1794_v41 }
 0x15c   : > { %v1792_v12 = vsel %vm650_vm1, %v1789_v57, %v1791_v58  ;;  %v1797_v15 = vsel %vm650_vm1, %v1794_v41, %v1796_v48  ;;  %v1803_v19 = vrot.slane %v5484_v0, 2  ;;  %v1804_v5 = vrot.slane %v5488_v13, 2 }
 0x15d   : > { %v1800_v36 = vsel %vm650_vm1, %v1798_v27, %v1799_v49  ;;  %v1802_v51 = vsel %vm650_vm1, %v1799_v49, %v1801_v16  ;;  %v1806_v11 = vrot.slane %v5492_v43, 2  ;;  %v1808_v35 = vrot.slane %v5496_v52, 2  ;;  %v6908_v49 = vld [vmem:[#allocation9_spill] sm:$0xff] }
 0x15e   : > { %v1805_v9 = vsel %vm650_vm1, %v1803_v19, %v1804_v5  ;;  %v1809_v21 = vrot.slane %v5500_v53, 2  ;;  %v1811_v10 = vrot.slane %v5504_v3, 2  ;;  %v1813_v44 = vrot.slane %v5508_v46, 2  ;;  %v6910_v19 = vld [vmem:[#allocation51_spill] sm:$0xff] }
 0x15f   : > { %v1807_v0 = vsel %vm650_vm1, %v1804_v5, %v1806_v11  ;;  %v1814_v13 = vrot.slane %v5512_v26, 2  ;;  %v1816_v8 = vrot.slane %v5516_v32, 2  ;;  %v1818_v38 = vrot.slane %v5520_v4, 2  ;;  %v6913_v11 = vld [vmem:[#allocation89_spill] sm:$0xff] }
 0x160   : > { %v1810_v43 = vsel %vm650_vm1, %v1808_v35, %v1809_v21  ;;  %v1812_v52 = vsel %vm650_vm1, %v1809_v21, %v1811_v10  ;;  %v1819_v7 = vrot.slane %v5524_v14, 2  ;;  %v1821_v53 = vrot.slane %v5528_v34, 2  ;;  %v6914_v35 = vld [vmem:[#allocation19_spill] sm:$0xff]  ;;  %v6916_v10 = vld [vmem:[#allocation16_spill] sm:$0xff] }
 0x161   : > { %v1815_v3 = vsel %vm650_vm1, %v1813_v44, %v1814_v13  ;;  %v1817_v46 = vsel %vm650_vm1, %v1814_v13, %v1816_v8  ;;  %v1823_v42 = vrot.slane %v5532_v55, 2  ;;  %v1824_v26 = vrot.slane %v5536_v33, 2  ;;  %v6915_v21 = vld [vmem:[#allocation15_spill] sm:$0xff]  ;;  %v6917_v44 = vld [vmem:[#allocation20_spill] sm:$0xff] }
 0x162   : > { %v1820_v32 = vsel %vm650_vm1, %v1818_v38, %v1819_v7  ;;  %v1822_v4 = vsel %vm650_vm1, %v1819_v7, %v1821_v53  ;;  %v1826_v60 = vrot.slane %v5540_v28, 2  ;;  %v1828_v59 = vrot.slane %v5544_v63, 2  ;;  %v6920_v7 = vld [vmem:[#allocation23_spill] sm:$0xff]  ;;  %v6921_v53 = vld [vmem:[#allocation24_spill] sm:$0xff] }
 0x163   : > { %v1825_v14 = vsel %vm650_vm1, %v1823_v42, %v1824_v26  ;;  %v1829_v34 = vrot.slane %v5548_v23, 2  ;;  %v1831_v57 = vrot.slane %v5552_v50, 2  ;;  %v1833_v58 = vrot.slane %v5556_v30, 2 }
 0x164   : > { %v1827_v55 = vsel %vm650_vm1, %v1824_v26, %v1826_v60  ;;  %v1834_v33 = vrot.slane %v5560_v56, 2  ;;  %v1836_v37 = vrot.slane %v5564_v25, 2  ;;  %v1838_v41 = vrot.slane %v5568_v17, 2 }
 0x165   : > { %v1830_v28 = vsel %vm650_vm1, %v1828_v59, %v1829_v34  ;;  %v1832_v63 = vsel %vm650_vm1, %v1829_v34, %v1831_v57  ;;  %v1839_v23 = vrot.slane %v5572_v31, 2  ;;  %v1841_v50 = vrot.slane %v5576_v47, 2  ;;  %v6909_v47 = vld [vmem:[#allocation28_spill] sm:$0xff]  ;;  %v6925_v59 = vld [vmem:[#allocation30_spill] sm:$0xff]  ;;  %v6926_v34 = vld [vmem:[#allocation31_spill] sm:$0xff] }
 0x166   : > { %v1835_v30 = vsel %vm650_vm1, %v1833_v58, %v1834_v33  ;;  %v1837_v48 = vsel %vm650_vm1, %v1834_v33, %v1836_v37  ;;  %v5674_v56 = vadd.f32 %v5579_v39, %v5299_v40  ;;  %v5678_v25 = vadd.f32 %v5582_v45, %v5303_v18  ;;  %v6911_v39 = vld [vmem:[#allocation33_spill] sm:$0xff]  ;;  %v6912_v45 = vld [vmem:[#allocation34_spill] sm:$0xff]  ;;  %v6927_v57 = vld [vmem:[#allocation32_spill] sm:$0xff] }
 0x167   : > { %v1840_v17 = vsel %vm650_vm1, %v1838_v41, %v1839_v23  ;;  %v1842_v27 = vsel %vm650_vm1, %v1839_v23, %v1841_v50  ;;  %v5684_v31 = vadd.f32 %v5586_v1, %v6908_v49  ;;  %v5688_v16 = vadd.f32 %v5589_v62, %v6909_v47  ;;  %v6928_v58 = vld [vmem:[#allocation35_spill] sm:$0xff]  ;;  %v6929_v33 = vld [vmem:[#allocation36_spill] sm:$0xff] }
 0x168   : > { %v5693_v40 = vadd.f32 %v5592_v2, %v6910_v19  ;;  %v5697_v18 = vadd.f32 %v5596_v29, %v6911_v39  ;;  %v5701_v5 = vadd.f32 %v5602_v54, %v6912_v45  ;;  %v5705_v1 = vadd.f32 %v5608_v20, %v6913_v11  ;;  %v6918_v54 = vld [vmem:[#allocation21_spill] sm:$0xff]  ;;  %v6919_v20 = vld [vmem:[#allocation22_spill] sm:$0xff] }
 0x169   : > { %v5709_v62 = vadd.f32 %v5611_v6, %v6914_v35  ;;  %v5713_v2 = vadd.f32 %v5616_v61, %v6915_v21  ;;  %v5717_v29 = vadd.f32 %v5619_v22, %v6916_v10  ;;  %v5720_v13 = vadd.f32 %v1792_v12, %v6917_v44  ;;  %v6922_v61 = vld [vmem:[#allocation25_spill] sm:$0xff]  ;;  %v6923_v22 = vld [vmem:[#allocation26_spill] sm:$0xff]  ;;  %v6924_v12 = vld [vmem:[#allocation27_spill] sm:$0xff] }
 0x16a   : > { %v5723_v8 = vadd.f32 %v1795_v24, %v6918_v54  ;;  %v5726_v38 = vadd.f32 %v1797_v15, %v6919_v20  ;;  %v5729_v6 = vadd.f32 %v1800_v36, %v6920_v7  ;;  %v5732_v42 = vadd.f32 %v1802_v51, %v6921_v53 }
 0x16b   : > { %v5735_v26 = vadd.f32 %v1805_v9, %v6922_v61  ;;  %v5738_v60 = vadd.f32 %v1807_v0, %v6923_v22  ;;  %v5741_v24 = vadd.f32 %v1810_v43, %v6924_v12  ;;  %v5744_v15 = vadd.f32 %v1812_v52, %v6925_v59  ;;  %v6930_v0 = vld [vmem:[#allocation37_spill] sm:$0xff]  ;;  %v6931_v43 = vld [vmem:[#allocation44_spill] sm:$0xff] }
 0x16c   : > { %v5747_v36 = vadd.f32 %v1815_v3, %v6926_v34  ;;  %v5750_v51 = vadd.f32 %v1817_v46, %v6927_v57  ;;  %v5753_v9 = vadd.f32 %v1820_v32, %v6928_v58  ;;  %v5756_v37 = vadd.f32 %v1822_v4, %v6929_v33  ;;  %v6932_v52 = vld [vmem:[#allocation40_spill] sm:$0xff]  ;;  %v6933_v3 = vld [vmem:[#allocation41_spill] sm:$0xff]  ;;  %v6936_v4 = vld [vmem:[#allocation46_spill] sm:$0xff] }
 0x16d   : > { %v5759_v41 = vadd.f32 %v1825_v14, %v6930_v0  ;;  %v5762_v23 = vadd.f32 %v1827_v55, %v6931_v43  ;;  %v5765_v50 = vadd.f32 %v1830_v28, %v6932_v52  ;;  %v5768_v49 = vadd.f32 %v1832_v63, %v6933_v3  ;;  %v6934_v46 = vld [vmem:[#allocation49_spill] sm:$0xff]  ;;  %v6937_v14 = vld [vmem:[#allocation58_spill] sm:$0xff] }
 0x16e   : > { %v5771_v47 = vadd.f32 %v1835_v30, %v6934_v46  ;;  %v6935_v32 = vld [vmem:[#allocation45_spill] sm:$0xff]  ;;  %v5777_v39 = vadd.f32 %v1840_v17, %v6936_v4  ;;  %v5780_v45 = vadd.f32 %v1842_v27, %v6937_v14  ;;  %v2384_v55 = vpack.c.bf16 %v5678_v25, %v5674_v56 }
 0x16f   : > { %v5774_v19 = vadd.f32 %v1837_v48, %v6935_v32  ;;  %v2389_v28 = vpack.c.bf16 %v5688_v16, %v5684_v31  ;;  %v2394_v63 = vpack.c.bf16 %v5697_v18, %v5693_v40  ;;  %v2399_v30 = vpack.c.bf16 %v5705_v1, %v5701_v5 }
 0x170   : > { %v2404_v48 = vpack.c.bf16 %v5713_v2, %v5709_v62  ;;  %v2409_v17 = vpack.c.bf16 %v5720_v13, %v5717_v29  ;;  %v2414_v27 = vpack.c.bf16 %v5726_v38, %v5723_v8  ;;  %v2419_v11 = vpack.c.bf16 %v5732_v42, %v5729_v6  ;;  %2385 = vst [vmem:[%s5785_s19] sm:$0xff] %v2384_v55  }
 0x171   : > { %2461 = vst [vmem:[%s5785_s19 + $0x8] sm:$0xff] %v2389_v28   ;;  %2462 = vst [vmem:[%s5785_s19 + $0x10] sm:$0xff] %v2394_v63   ;;  %v2424_v35 = vpack.c.bf16 %v5738_v60, %v5735_v26  ;;  %v2429_v21 = vpack.c.bf16 %v5744_v15, %v5741_v24  ;;  %v2434_v10 = vpack.c.bf16 %v5750_v51, %v5747_v36 }
 0x172   : > { %2463 = vst [vmem:[%s5785_s19 + $0x18] sm:$0xff] %v2399_v30   ;;  %v2439_v44 = vpack.c.bf16 %v5756_v37, %v5753_v9  ;;  %2464 = vst [vmem:[%s5785_s19 + $0x20] sm:$0xff] %v2404_v48   ;;  %v2444_v54 = vpack.c.bf16 %v5762_v23, %v5759_v41  ;;  %v2449_v20 = vpack.c.bf16 %v5768_v49, %v5765_v50 }
 0x173   : > { %2465 = vst [vmem:[%s5785_s19 + $0x28] sm:$0xff] %v2409_v17   ;;  %2466 = vst [vmem:[%s5785_s19 + $0x30] sm:$0xff] %v2414_v27   ;;  %v2454_v7 = vpack.c.bf16 %v5774_v19, %v5771_v47  ;;  %v2459_v53 = vpack.c.bf16 %v5780_v45, %v5777_v39  ;;  %v2067_v61 = vadd.f32 %v5678_v25, %v5674_v56 }
 0x174   : > { %2467 = vst [vmem:[%s5785_s19 + $0x38] sm:$0xff] %v2419_v11   ;;  %2468 = vst [vmem:[%s5785_s19 + $0x40] sm:$0xff] %v2424_v35  }
 0x175   : > { %2469 = vst [vmem:[%s5785_s19 + $0x48] sm:$0xff] %v2429_v21   ;;  %2470 = vst [vmem:[%s5785_s19 + $0x50] sm:$0xff] %v2434_v10   ;;  %v2068_v22 = vadd.f32 %v2067_v61, %v5684_v31 }
 0x176   : > { %2471 = vst [vmem:[%s5785_s19 + $0x58] sm:$0xff] %v2439_v44   ;;  %2472 = vst [vmem:[%s5785_s19 + $0x60] sm:$0xff] %v2444_v54  }
 0x177   : > { %2473 = vst [vmem:[%s5785_s19 + $0x68] sm:$0xff] %v2449_v20   ;;  %2474 = vst [vmem:[%s5785_s19 + $0x70] sm:$0xff] %v2454_v7  }
 0x178   : > { %2475 = vst [vmem:[%s5785_s19 + $0x78] sm:$0xff] %v2459_v53  }
 0x179   : > { %2585 = shalt.err (!%p2582_p3)
}
 0x17a   : > { %s2586_s5 = scalar_lea.hbm %s5819_s26, 2048  ;;  %s2590_s8 = scalar_lea.hbm %s6013_s2, 4096 }
 0x17b   : > { %p2587_p4 = scmp.ne.s32.totalorder %s5819_s26, %s2586_s5  ;;  %p2591_p9 = scmp.lt.u32.totalorder %s5819_s26, %s6013_s2 }
 0x17c   : > { %p2592_p10 = scmp.lt.u32.totalorder %s2590_s8, %s2586_s5  ;;  %p2594_p12 = scmp.lt.u32.totalorder %s2586_s5, %s5819_s26 }
 0x17d   : > { %p2588_p7 = pnand %p2587_p4, %p2730_p5 }
 0x17e   : > { %p2593_p11 = por %p2592_p10, %p2591_p9 }
 0x17f   : > { %p2589_p8 = pneg %p2588_p7 }
 0x180   : > { %p2595_p13 = por %p2594_p12, %p2593_p11 }
 0x182   : > { %p2596_p0 = pnand %p2595_p13, %p2589_p8 }
 0x184   : > { %2599 = shalt.err (!%p2596_p0)
}
 0x185   : > { %s2669_s17 = smov 64   ;;  %s2670_s19 = smov 4   ;;  %v2069_v12 = vadd.f32 %v2068_v22, %v5688_v16  ;;  %v2104_v59 = vmul.f32 %v5674_v56, %v5674_v56  ;;  %v2105_v34 = vmul.f32 %v5678_v25, %v5678_v25  ;;  %v2106_v58 = vmul.f32 %v5684_v31, %v5684_v31 }
 0x186   : > { %2477 = dma.vmem_to_hbm [thread:$0]  (%p2730_p5), %s5821_s20, 2048, %s5819_s26, %s2177_s27, %s2669_s17, %s2669_s17, %s2670_s19   ;;  %v2107_v0 = vmul.f32 %v5688_v16, %v5688_v16  ;;  %v2108_v3 = vmul.f32 %v5693_v40, %v5693_v40  ;;  %v2109_v25 = vmul.f32 %v5697_v18, %v5697_v18  ;;  %v2110_v4 = vmul.f32 %v5701_v5, %v5701_v5 }
 0x187   : > { %v2070_v57 = vadd.f32 %v2069_v12, %v5693_v40  ;;  %v2136_v43 = vadd.f32 %v2105_v34, %v2104_v59  ;;  %v2111_v55 = vmul.f32 %v5705_v1, %v5705_v1  ;;  %v2112_v63 = vmul.f32 %v5709_v62, %v5709_v62  ;;  %s2307_s20 = sshll.u32 %s5664_s10, 1  ;;  %s2345_s24 = sshll.u32 %s2713_s16, 5 }
 0x188   : > { %v2113_v48 = vmul.f32 %v5713_v2, %v5713_v2  ;;  %v2114_v27 = vmul.f32 %v5717_v29, %v5717_v29  ;;  %v2115_v35 = vmul.f32 %v5720_v13, %v5720_v13  ;;  %v2116_v10 = vmul.f32 %v5723_v8, %v5723_v8  ;;  %s174_s25 = scalar_lea.vmem [#allocation4], %s2307_s20  ;;  %s5968_s29 = scalar_lea.hbm %s6014_s3, %s2345_s24 }
 0x189   : > { %v2071_v33 = vadd.f32 %v2070_v57, %v5697_v18  ;;  %v2137_v56 = vadd.f32 %v2136_v43, %v2106_v58  ;;  %v2117_v54 = vmul.f32 %v5726_v38, %v5726_v38  ;;  %v2118_v7 = vmul.f32 %v5729_v6, %v5729_v6  ;;  %s2211_s26 = sshll.u32 %s174_s25, 4  ;;  %s2182_s30 = scalar_lea.sflag [#allocation5], %s5664_s10  ;;  %s5970_s26 = int_to_ptr.vmem [resolvable:$true] %s2211_s26 }
 0x18a   : > { %v2119_v61 = vmul.f32 %v5732_v42, %v5732_v42  ;;  %v2120_v12 = vmul.f32 %v5735_v26, %v5735_v26  ;;  %v2121_v34 = vmul.f32 %v5738_v60, %v5738_v60  ;;  %v2122_v58 = vmul.f32 %v5741_v24, %v5741_v24  ;;  %s2600_s4 = scalar_lea.vmem %s5970_s26, 32  ;;  %s2671_s16 = smov [#allocation4]  }
 0x18b   : > { %v2072_v52 = vadd.f32 %v2071_v33, %v5701_v5  ;;  %v2138_v32 = vadd.f32 %v2137_v56, %v2107_v0  ;;  %v2123_v0 = vmul.f32 %v5744_v15, %v5744_v15  ;;  %v2125_v56 = vmul.f32 %v5750_v51, %v5750_v51  ;;  %p2601_p1 = scmp.ne.s32.totalorder %s5970_s26, %s2600_s4  ;;  %s2604_s5 = sshll.u32 %s2671_s16, 4  ;;  %s2605_s5 = int_to_ptr.vmem [resolvable:$false] %s2604_s5 }
 0x18c   : > { %vm2173_vm2 = vcmask 1040384   ;;  %s2606_s6 = scalar_lea.vmem %s2605_s5, 64  ;;  %p2607_p4 = scmp.lt.s32.totalorder %s5970_s26, %s2605_s5 }
 0x18d   : > { %v2073_v46 = vadd.f32 %v2072_v52, %v5705_v1  ;;  %v2139_v14 = vadd.f32 %v2138_v32, %v2108_v3  ;;  %v2124_v52 = vmul.f32 %v5747_v36, %v5747_v36  ;;  %p2602_p2 = pnand %p2601_p1, %p2730_p5  ;;  %p2608_p7 = scmp.lt.s32.totalorder %s2606_s6, %s2600_s4 }
 0x18f   : > { %v2074_v31 = vadd.f32 %v2073_v46, %v5709_v62  ;;  %v2140_v28 = vadd.f32 %v2139_v14, %v2109_v25  ;;  %v2126_v25 = vmul.f32 %v5753_v9, %v5753_v9  ;;  %v2128_v14 = vmul.f32 %v5759_v41, %v5759_v41  ;;  %p2603_p3 = pneg %p2602_p2  ;;  %p2609_p8 = por %p2608_p7, %p2607_p4 }
 0x191   : > { %v2075_v16 = vadd.f32 %v2074_v31, %v5713_v2  ;;  %v2141_v30 = vadd.f32 %v2140_v28, %v2110_v4  ;;  %v2127_v31 = vmul.f32 %v5756_v37, %v5756_v37  ;;  %p2610_p9 = pnand %p2609_p8, %p2603_p3 }
 0x193   : > { %v2076_v40 = vadd.f32 %v2075_v16, %v5717_v29  ;;  %v2142_v17 = vadd.f32 %v2141_v30, %v2111_v55  ;;  %v2129_v55 = vmul.f32 %v5762_v23, %v5762_v23  ;;  %v2131_v30 = vmul.f32 %v5768_v49, %v5768_v49 }
 0x195   : > { %v2077_v18 = vadd.f32 %v2076_v40, %v5720_v13  ;;  %v2143_v11 = vadd.f32 %v2142_v17, %v2112_v63  ;;  %v2130_v40 = vmul.f32 %v5765_v50, %v5765_v50 }
 0x197   : > { %v2078_v5 = vadd.f32 %v2077_v18, %v5723_v8  ;;  %v2144_v21 = vadd.f32 %v2143_v11, %v2113_v48  ;;  %v2132_v48 = vmul.f32 %v5771_v47, %v5771_v47  ;;  %v2134_v11 = vmul.f32 %v5777_v39, %v5777_v39 }
 0x199   : > { %v2079_v1 = vadd.f32 %v2078_v5, %v5726_v38  ;;  %v2145_v44 = vadd.f32 %v2144_v21, %v2114_v27  ;;  %v2133_v5 = vmul.f32 %v5774_v19, %v5774_v19 }
 0x19b   : > { %v2080_v62 = vadd.f32 %v2079_v1, %v5729_v6  ;;  %v2146_v20 = vadd.f32 %v2145_v44, %v2115_v35  ;;  %v2135_v35 = vmul.f32 %v5780_v45, %v5780_v45 }
 0x19d   : > { %v2081_v2 = vadd.f32 %v2080_v62, %v5732_v42  ;;  %v2147_v53 = vadd.f32 %v2146_v20, %v2116_v10 }
 0x19f   : > { %v2082_v29 = vadd.f32 %v2081_v2, %v5735_v26  ;;  %v2148_v22 = vadd.f32 %v2147_v53, %v2117_v54 }
 0x1a1   : > { %v2083_v13 = vadd.f32 %v2082_v29, %v5738_v60  ;;  %v2149_v59 = vadd.f32 %v2148_v22, %v2118_v7 }
 0x1a3   : > { %v2084_v8 = vadd.f32 %v2083_v13, %v5741_v24  ;;  %v2150_v57 = vadd.f32 %v2149_v59, %v2119_v61 }
 0x1a5   : > { %v2085_v38 = vadd.f32 %v2084_v8, %v5744_v15  ;;  %v2151_v33 = vadd.f32 %v2150_v57, %v2120_v12 }
 0x1a7   : > { %v2086_v6 = vadd.f32 %v2085_v38, %v5747_v36  ;;  %v2152_v43 = vadd.f32 %v2151_v33, %v2121_v34 }
 0x1a9   : > { %v2087_v42 = vadd.f32 %v2086_v6, %v5750_v51  ;;  %v2153_v3 = vadd.f32 %v2152_v43, %v2122_v58 }
 0x1ab   : > { %v2088_v26 = vadd.f32 %v2087_v42, %v5753_v9  ;;  %v2154_v46 = vadd.f32 %v2153_v3, %v2123_v0 }
 0x1ad   : > { %v2089_v60 = vadd.f32 %v2088_v26, %v5756_v37  ;;  %v2155_v32 = vadd.f32 %v2154_v46, %v2124_v52 }
 0x1af   : > { %v2090_v24 = vadd.f32 %v2089_v60, %v5759_v41  ;;  %v2156_v4 = vadd.f32 %v2155_v32, %v2125_v56 }
 0x1b1   : > { %v2091_v15 = vadd.f32 %v2090_v24, %v5762_v23  ;;  %v2157_v16 = vadd.f32 %v2156_v4, %v2126_v25 }
 0x1b3   : > { %v2092_v36 = vadd.f32 %v2091_v15, %v5765_v50  ;;  %v2158_v28 = vadd.f32 %v2157_v16, %v2127_v31 }
 0x1b5   : > { %v2093_v51 = vadd.f32 %v2092_v36, %v5768_v49  ;;  %v2159_v63 = vadd.f32 %v2158_v28, %v2128_v14 }
 0x1b7   : > { %v2094_v9 = vadd.f32 %v2093_v51, %v5771_v47  ;;  %v2160_v18 = vadd.f32 %v2159_v63, %v2129_v55 }
 0x1b9   : > { %v2095_v37 = vadd.f32 %v2094_v9, %v5774_v19  ;;  %v2161_v23 = vadd.f32 %v2160_v18, %v2130_v40 }
 0x1bb   : > { %v2096_v41 = vadd.f32 %v2095_v37, %v5777_v39  ;;  %v2162_v50 = vadd.f32 %v2161_v23, %v2131_v30 }
 0x1bd   : > { %v2097_v17 = vadd.f32 %v2096_v41, %v5780_v45  ;;  %v2163_v1 = vadd.f32 %v2162_v50, %v2132_v48 }
 0x1bf   : > { %v2098_v27 = vrot.slane %v2097_v17, 4  ;;  %v2164_v21 = vadd.f32 %v2163_v1, %v2133_v5 }
 0x1c1   : > { %v2099_v49 = vadd.f32 %v2098_v27, %v2097_v17  ;;  %v2165_v62 = vadd.f32 %v2164_v21, %v2134_v11 }
 0x1c3   : > { %v2100_v47 = vrot.slane %v2099_v49, 2  ;;  %v2166_v10 = vadd.f32 %v2165_v62, %v2135_v35 }
 0x1c5   : > { %v2101_v44 = vadd.f32 %v2100_v47, %v2099_v49  ;;  %v2167_v2 = vrot.slane %v2166_v10, 4 }
 0x1c7   : > { %v2168_v19 = vadd.f32 %v2167_v2, %v2166_v10  ;;  %v2102_v54 = vrot.slane %v2101_v44, 1 }
 0x1c9   : > { %v2169_v20 = vrot.slane %v2168_v19, 2  ;;  %v2103_v39 = vadd.f32 %v2102_v54, %v2101_v44 }
 0x1cb   : > { %v2170_v29 = vadd.f32 %v2169_v20, %v2168_v19 }
 0x1cd   : > { %v2171_v7 = vrot.slane %v2170_v29, 1 }
 0x1cf   : > { %v2172_v45 = vadd.f32 %v2171_v7, %v2170_v29 }
 0x1d1   : > { %v2174_v53 = vsel %vm2173_vm2, %v2103_v39, %v2172_v45 }
 0x1d2   : > { %2175 = vst [vmem:[%s174_s25] sm:$0x3] %v2174_v53 }
 0x1d3   : > { %2613 = shalt.err (!%p2610_p9)
}
 0x1d4   : > { %s2614_s10 = scalar_lea.hbm %s5968_s29, 32  ;;  %s2618_s9 = scalar_lea.hbm %s6014_s3, 64 }
 0x1d5   : > { %p2615_p10 = scmp.ne.s32.totalorder %s5968_s29, %s2614_s10  ;;  %p2619_p13 = scmp.lt.u32.totalorder %s5968_s29, %s6014_s3 }
 0x1d6   : > { %p2620_p0 = scmp.lt.u32.totalorder %s2618_s9, %s2614_s10  ;;  %p2622_p2 = scmp.lt.u32.totalorder %s2614_s10, %s5968_s29 }
 0x1d7   : > { %p2616_p11 = pnand %p2615_p10, %p2730_p5 }
 0x1d8   : > { %p2621_p1 = por %p2620_p0, %p2619_p13 }
 0x1d9   : > { %p2617_p12 = pneg %p2616_p11 }
 0x1da   : > { %p2623_p3 = por %p2622_p2, %p2621_p1 }
 0x1dc   : > { %p2624_p4 = pnand %p2623_p3, %p2617_p12 }
 0x1de   : > { %2627 = shalt.err (!%p2624_p4)
}
 0x1df   : > { %2478 = dma.vmem_to_hbm [thread:$0]  (%p2730_p5), %s5970_s26, 32, %s5968_s29, %s2182_s30  }
 0x1e0 PF: > { %p2488_p7 = scmp.ge.s32.totalorder %s2666_s15, 2  ;;  %s2223_s19 = sand.u32 1, %s2654_s12  }
 0x1e1   : > { %s2224_s20 = scalar_lea.sflag [#allocation3], %s2223_s19 }
 0x1e2   : > { %p2482_p8 = pnand %p2488_p7, %p2734_p6 }
 0x1e4   : > { %2645 = dma.done.wait (!%p2482_p8), %s2224_s20, 2048  }
 0x1e5   : > { %2647 = vsyncadd (!%p2482_p8), %s2224_s20, 4294965248  ;;  %s2233_s24 = scalar_lea.sflag [#allocation5], %s2223_s19 }
 0x1e6   : > { %2649 = dma.done.wait (!%p2482_p8), %s2233_s24, 32  }
 0x1e7   : > { %2651 = vsyncadd (!%p2482_p8), %s2233_s24, 4294967264  ;;  %p17_p5 = scmp.ge.s32.totalorder %s2717_s18, 4   ;;  %s6938_s12 = smov %s2658_s13 }
 0x1e8   : > { %s6939_s13 = smov %s2662_s14  ;;  %s6940_s14 = smov %s2728_s21 }
 0x1e9   : > { %s6941_s15 = smov %s2717_s18  ;;  %19 = sbr.rel (!%p17_p5) target bundleno = 5 (0x5), region = 80 }
 0x1f0   :  { %2238 = vsyncpa [#allocation3], 1 }
 0x1f1   :  { %2240 = vsyncpa [#allocation3 + $0x1], 1 }
 0x1f2   :  { %2241 = vsyncpa [#allocation5], 1 }
 0x1f3   :  { %2243 = vsyncpa [#allocation5 + $0x1], 1 }

</bundles_post_ra>
